<compile_context>
chip_gen: v7x
topology: tpu7x:2x2x1
jax: 0.10.0
libtpu: 0.0.40
codegen_flags: <defaults>
</compile_context>

<pallas_src>
import functools
import math

import numpy as np
import jax
import jax.numpy as jnp
from jax.experimental import pallas as pl
from jax.experimental.pallas import tpu as pltpu


# -----------------------------------------------------------------------------
# Fused Pallas GEMM kernel (K-tiled, f32 VMEM accumulator):
#   out = relu?( (A @ B) * scale + shift [+ residual] )
# -----------------------------------------------------------------------------

_TM = 512                # rows-of-pixels tile (pipelined / megacore axis)
_LANES = 128             # pad K and N (channels) to lane-dense multiples
_MIN_PALLAS_ROWS = 512   # below this, launch overhead dominates -> plain XLA


def _round_up(x, m):
    return (x + m - 1) // m * m


def _pad_kn(K, N):
    """Padded K/N and the K/N tile sizes (static, shape-only)."""
    Kp = _round_up(K, _LANES)
    Np = _round_up(N, _LANES)
    tk = 512 if Kp % 512 == 0 else (256 if Kp % 256 == 0 else 128)
    tn = 256 if Np % 256 == 0 else 128   # 256-wide MXU columns on v6e/v7x
    return Kp, Np, tk, tn


def _pick_tm(M):
    """M tile: 512 when there is plenty of work, otherwise split so the
    'parallel' M axis has >= 2 tiles (keeps both v7x TensorCores busy)."""
    if M >= 2 * _TM:
        return _TM
    return max(8, _round_up((M + 1) // 2, 8))


def _gemm_bn_kernel(*refs, relu, has_residual):
    if has_residual:
        a_ref, b_ref, scale_ref, shift_ref, res_ref, o_ref, acc_ref = refs
    else:
        a_ref, b_ref, scale_ref, shift_ref, o_ref, acc_ref = refs

    k = pl.program_id(2)

    @pl.when(k == 0)
    def _():
        acc_ref[...] = jnp.zeros_like(acc_ref)

    # bf16 x bf16 -> f32 accumulate on the MXU.
    acc_ref[...] += jnp.dot(a_ref[...], b_ref[...],
                            preferred_element_type=jnp.float32)

    @pl.when(k == pl.num_programs(2) - 1)
    def _():
        out = acc_ref[...] * scale_ref[...] + shift_ref[...]
        if has_residual:
            out = out + res_ref[...].astype(jnp.float32)   # residual DMA'd bf16
        if relu:
            out = jnp.maximum(out, 0.0)
        o_ref[...] = out.astype(o_ref.dtype)                # bf16 store


def matmul_affine(a, cp, relu=False, residual=None):
    """out = relu?( (a @ W) * scale + shift [+ residual] )  -> bf16.

    a:  (M, K) activations / im2col patches (any float dtype).
    cp: prepared conv dict (see prep_conv) holding pre-padded bf16 weights and
        folded-BN scale/shift.
    residual: optional (M, N) tensor fused into the epilogue.
    """
    M, K = a.shape
    K2, N = cp['w16'].shape
    assert K == K2, (K, K2)

    if M < _MIN_PALLAS_ROWS:
        # Tiny GEMM (deep layers / PSP branches at small spatial sizes):
        # fixed pallas_call cost dominates; plain XLA with the SAME numerics
        # as the kernel (bf16 operands, f32 accumulate, f32 epilogue).
        out = jnp.dot(a.astype(jnp.bfloat16), cp['w16'],
                      preferred_element_type=jnp.float32)
        out = out * cp['scale'] + cp['shift']
        if residual is not None:
            out = out + residual.astype(jnp.float32)
        if relu:
            out = jnp.maximum(out, 0.0)
        return out.astype(jnp.bfloat16)

    Kp, Np, tk, tn = _pad_kn(K, N)
    tm = _pick_tm(M)
    Mp = _round_up(M, tm)

    a16 = a.astype(jnp.bfloat16)
    if (Mp, Kp) != (M, K):                       # guarded no-op when aligned
        a16 = jnp.pad(a16, ((0, Mp - M), (0, Kp - K)))

    operands = [a16, cp['wp'], cp['scale_p'], cp['shift_p']]
    in_specs = [
        pl.BlockSpec((tm, tk), lambda i, j, k: (i, k)),   # A: (i, k) tile
        pl.BlockSpec((tk, tn), lambda i, j, k: (k, j)),   # B: (k, j) tile
        pl.BlockSpec((1, tn), lambda i, j, k: (0, j)),    # scale (revisit: no re-DMA)
        pl.BlockSpec((1, tn), lambda i, j, k: (0, j)),    # shift
    ]
    has_residual = residual is not None
    if has_residual:
        r16 = residual.astype(jnp.bfloat16)
        if (Mp, Np) != r16.shape:
            r16 = jnp.pad(r16, ((0, Mp - M), (0, Np - N)))
        operands.append(r16)
        in_specs.append(pl.BlockSpec((tm, tn), lambda i, j, k: (i, j)))

    bytes_accessed = 2 * (Mp * Kp + Kp * Np
                          + Mp * Np * (2 if has_residual else 1)) + 8 * Np

    out = pl.pallas_call(
        functools.partial(_gemm_bn_kernel, relu=relu,
                          has_residual=has_residual),
        out_shape=jax.ShapeDtypeStruct((Mp, Np), jnp.bfloat16),
        grid=(Mp // tm, Np // tn, Kp // tk),
        in_specs=in_specs,
        out_specs=pl.BlockSpec((tm, tn), lambda i, j, k: (i, j)),
        scratch_shapes=[pltpu.VMEM((tm, tn), jnp.float32)],   # f32 accumulator
        compiler_params=pltpu.CompilerParams(
            dimension_semantics=("parallel", "parallel", "arbitrary"),
            vmem_limit_bytes=32 * 1024 * 1024),
        cost_estimate=pl.CostEstimate(flops=2 * M * K * N, transcendentals=0,
                                      bytes_accessed=int(bytes_accessed)),
    )(*operands)

    if (Mp, Np) != (M, N):                       # guarded no-op when aligned
        out = out[:M, :N]
    return out


# -----------------------------------------------------------------------------
# Convolution / pooling / interpolation glue
# -----------------------------------------------------------------------------

def extract_patches(x, kh, kw, stride, pad):
    """x: (N,H,W,C) -> im2col patches (N*Ho*Wo, kh*kw*C) ordered (kh, kw, C)."""
    N, H, W, C = x.shape
    xp = jnp.pad(x, ((0, 0), (pad, pad), (pad, pad), (0, 0)))
    Ho = (H + 2 * pad - kh) // stride + 1
    Wo = (W + 2 * pad - kw) // stride + 1
    taps = []
    for i in range(kh):
        for j in range(kw):
            taps.append(xp[:, i:i + stride * (Ho - 1) + 1:stride,
                           j:j + stride * (Wo - 1) + 1:stride, :])
    patches = jnp.stack(taps, axis=3)            # (N,Ho,Wo,kh*kw,C)
    return patches.reshape(N * Ho * Wo, kh * kw * C), Ho, Wo


def conv2d_bn(x, cp, stride=1, pad=0, relu=False, residual=None):
    """x: NHWC, cp: prepared conv dict. BN folded; residual fused in epilogue."""
    Cout, Cin, kh, kw = cp['w_raw'].shape        # static shapes only
    N = x.shape[0]
    x16 = x.astype(jnp.bfloat16)                 # bf16 activations / patches
    if kh == 1 and kw == 1 and pad == 0:
        xs = x16[:, ::stride, ::stride, :] if stride > 1 else x16
        _, Ho, Wo, _ = xs.shape
        a = xs.reshape(N * Ho * Wo, Cin)
    else:
        # TODO(synk): fuse this im2col into the GEMM (halo loads) to avoid the
        #             kh*kw-duplicated HBM tensor.
        a, Ho, Wo = extract_patches(x16, kh, kw, stride, pad)
    res = residual.reshape(-1, Cout) if residual is not None else None
    out = matmul_affine(a, cp, relu=relu, residual=res)
    return out.reshape(N, Ho, Wo, Cout)


def maxpool_3x3_s2_p1(x):
    """3x3 / stride 2 / pad 1 max pool as a pairwise max tree (XLA fuses it).

    -inf padding is safe here: every window contains at least one real pixel.
    """
    N, H, W, C = x.shape
    xp = jnp.pad(x, ((0, 0), (1, 1), (1, 1), (0, 0)), constant_values=-np.inf)
    Ho = (H + 2 - 3) // 2 + 1
    Wo = (W + 2 - 3) // 2 + 1
    out = None
    for i in range(3):
        for j in range(3):
            tap = xp[:, i:i + 2 * (Ho - 1) + 1:2, j:j + 2 * (Wo - 1) + 1:2, :]
            out = tap if out is None else jnp.maximum(out, tap)
    return out


def adaptive_pool_matrix(in_h, in_w, out_h, out_w):
    def mat1d(I, O):
        m = np.zeros((O, I), np.float32)
        for o in range(O):
            s = (o * I) // O
            e = -((-(o + 1) * I) // O)           # ceil((o+1)*I/O)
            m[o, s:e] = 1.0 / (e - s)
        return m
    return np.kron(mat1d(in_h, out_h), mat1d(in_w, out_w))


def interp_matrix_1d(in_size, out_size, align_corners):
    m = np.zeros((out_size, in_size), np.float32)
    for o in range(out_size):
        if align_corners:
            src = o * (in_size - 1) / (out_size - 1) if out_size > 1 else 0.0
        else:
            src = (o + 0.5) * in_size / out_size - 0.5
            src = max(src, 0.0)
        x0 = min(int(math.floor(src)), in_size - 1)
        x1 = min(x0 + 1, in_size - 1)
        lam = src - x0
        m[o, x0] += 1.0 - lam
        m[o, x1] += lam
    return m


def interp_matrix_2d(in_h, in_w, out_h, out_w, align_corners):
    return np.kron(interp_matrix_1d(in_h, out_h, align_corners),
                   interp_matrix_1d(in_w, out_w, align_corners))


def apply_spatial_matrix(P, x):
    """out[n,o,c] = sum_hw P[o,hw] * x[n,h,w,c]  (tiny PSP maps -> plain XLA)."""
    N, H, W, C = x.shape
    return jnp.einsum('op,npc->noc', jnp.asarray(P, jnp.float32),
                      x.reshape(N, H * W, C).astype(jnp.float32))


# -----------------------------------------------------------------------------
# Parameters: deterministic synthetic init + one-time GEMM prep (eager)
# -----------------------------------------------------------------------------

BLOCKS = (3, 4, 6, 3)        # ResNet-50 bottleneck block counts
LAYER_STRIDES = (1, 2, 2, 2)
BIN_SIZES = (1, 2, 3, 6)
BASE = 8                     # reduced base width (torchvision uses 64)
EXPANSION = 4


class KeyGen:
    def __init__(self, seed):
        self.key = jax.random.PRNGKey(seed)

    def __call__(self):
        self.key, sub = jax.random.split(self.key)
        return sub


def conv_init(kg, cout, cin, kh, kw):
    fan_in = cin * kh * kw
    std = math.sqrt(2.0 / fan_in)  # kaiming normal, relu gain
    return std * jax.random.normal(kg(), (cout, cin, kh, kw), dtype=jnp.float32)


def prep_conv(w, gamma=None, beta=None, bias=None, mean=0.0, var=1.0, eps=1e-5):
    """Fold BN (or bias) and pre-build padded GEMM operands. Runs once, eagerly,
    so no per-call weight transpose/pad appears inside the jitted forward."""
    w = jnp.asarray(w, jnp.float32)
    Cout, Cin, kh, kw = w.shape
    K, N = kh * kw * Cin, Cout
    wmat = jnp.transpose(w, (2, 3, 1, 0)).reshape(K, N)   # (kh,kw,Cin) x Cout
    if gamma is not None:
        scale = gamma / jnp.sqrt(var + eps)
        shift = beta - mean * scale
    else:
        scale = jnp.ones((N,), jnp.float32)
        shift = (jnp.zeros((N,), jnp.float32) if bias is None
                 else jnp.asarray(bias, jnp.float32))
    scale = scale.reshape(1, N).astype(jnp.float32)
    shift = shift.reshape(1, N).astype(jnp.float32)
    Kp, Np, _, _ = _pad_kn(K, N)
    return {
        'w_raw': w,                                   # shape reference only
        'w16': wmat.astype(jnp.bfloat16),             # XLA-fallback weight
        'scale': scale, 'shift': shift,
        'wp': jnp.pad(wmat, ((0, Kp - K), (0, Np - N))).astype(jnp.bfloat16),
        'scale_p': jnp.pad(scale, ((0, 0), (0, Np - N))),
        'shift_p': jnp.pad(shift, ((0, 0), (0, Np - N))),
    }


def make_params(kg, n_channels, n_classes):
    f32 = jnp.float32
    ones = lambda c: jnp.ones((c,), f32)
    zeros = lambda c: jnp.zeros((c,), f32)

    params = {}
    params['stem'] = prep_conv(conv_init(kg, BASE, n_channels, 7, 7),
                               gamma=ones(BASE), beta=zeros(BASE))

    layers = []
    inplanes = BASE
    planes_list = [BASE, BASE * 2, BASE * 4, BASE * 8]
    for planes, n_blocks, lstride in zip(planes_list, BLOCKS, LAYER_STRIDES):
        layer = []
        for bi in range(n_blocks):
            stride = lstride if bi == 0 else 1
            blk = {
                'c1': prep_conv(conv_init(kg, planes, inplanes, 1, 1),
                                gamma=ones(planes), beta=zeros(planes)),
                'c2': prep_conv(conv_init(kg, planes, planes, 3, 3),
                                gamma=ones(planes), beta=zeros(planes)),
                'c3': prep_conv(conv_init(kg, planes * EXPANSION, planes, 1, 1),
                                gamma=ones(planes * EXPANSION),
                                beta=zeros(planes * EXPANSION)),
            }
            if bi == 0 and (stride != 1 or inplanes != planes * EXPANSION):
                blk['down'] = prep_conv(
                    conv_init(kg, planes * EXPANSION, inplanes, 1, 1),
                    gamma=ones(planes * EXPANSION),
                    beta=zeros(planes * EXPANSION))
            layer.append(blk)
            inplanes = planes * EXPANSION
        layers.append(layer)
    params['layers'] = layers

    m_out = inplanes                        # "m_out_sz"
    out_ch = m_out // len(BIN_SIZES)        # PSP branch channels
    # initialize_weights: BN weight=1.0, bias=1e-4 in the master branch.
    params['stages'] = [
        prep_conv(conv_init(kg, out_ch, m_out, 1, 1),
                  gamma=ones(out_ch), beta=jnp.full((out_ch,), 1e-4, f32))
        for _ in BIN_SIZES
    ]
    params['bott'] = prep_conv(
        conv_init(kg, out_ch, m_out + out_ch * len(BIN_SIZES), 3, 3),
        gamma=ones(out_ch), beta=jnp.full((out_ch,), 1e-4, f32))
    params['final'] = prep_conv(conv_init(kg, n_classes, out_ch, 1, 1),
                                bias=zeros(n_classes))
    return params


# -----------------------------------------------------------------------------
# Model forward
# -----------------------------------------------------------------------------

def bottleneck_block(x, p, stride):
    identity = x
    out = conv2d_bn(x, p['c1'], 1, 0, relu=True)
    out = conv2d_bn(out, p['c2'], stride, 1, relu=True)
    if 'down' in p:
        identity = conv2d_bn(x, p['down'], stride, 0, relu=False)
    # conv3 + BN + residual-add + ReLU fused into one GEMM epilogue.
    out = conv2d_bn(out, p['c3'], 1, 0, relu=True, residual=identity)
    return out


def pspnet_forward(params, x_nchw):
    N, Cin, H, W = x_nchw.shape
    x = jnp.transpose(x_nchw, (0, 2, 3, 1)).astype(jnp.float32)   # -> NHWC

    # initial: conv7x7 s2 + BN + ReLU + maxpool3x3 s2
    x = conv2d_bn(x, params['stem'], stride=2, pad=3, relu=True)
    x = maxpool_3x3_s2_p1(x)

    # layer1..layer4 (layer3 output == x_aux in the reference; the auxiliary
    # branch is not part of the returned eval forward).
    for layer_p, lstride in zip(params['layers'], LAYER_STRIDES):
        for bi, blk in enumerate(layer_p):
            x = bottleneck_block(x, blk, lstride if bi == 0 else 1)

    features = x
    Nf, Hf, Wf, Cf = features.shape

    # _PSPModule: pyramid pooling branches (tiny maps -> XLA einsums)
    pyramids = [features.astype(jnp.float32)]
    for bs, st in zip(BIN_SIZES, params['stages']):
        Pm = adaptive_pool_matrix(Hf, Wf, bs, bs)
        pooled = apply_spatial_matrix(Pm, features).reshape(Nf, bs, bs, Cf)
        s = conv2d_bn(pooled, st, stride=1, pad=0, relu=True)
        Im = interp_matrix_2d(bs, bs, Hf, Wf, align_corners=True)
        up = apply_spatial_matrix(Im, s).reshape(Nf, Hf, Wf, -1)
        pyramids.append(up)
    cat = jnp.concatenate(pyramids, axis=-1)

    # PSP bottleneck: conv3x3 + BN + ReLU (+ Dropout2d -> identity in eval)
    x = conv2d_bn(cat, params['bott'], stride=1, pad=1, relu=True)

    # final 1x1 conv to n_classes (with bias)
    logits = conv2d_bn(x, params['final'], stride=1, pad=0, relu=False)

    # F.interpolate(..., size=input_size, mode='bilinear') (align_corners=False)
    Pfin = interp_matrix_2d(Hf, Wf, H, W, align_corners=False)
    out = apply_spatial_matrix(Pfin, logits).reshape(N, H, W, -1)
    # output[:, :, :H, :W] is the identity here.
    return jnp.transpose(out, (0, 3, 1, 2)).astype(jnp.float32)   # -> NCHW


# -----------------------------------------------------------------------------
# Main
# -----------------------------------------------------------------------------

if __name__ == "__main__":
    n_channels, n_classes = 4, 3
    kg = KeyGen(0)                          # derived from jax.random.PRNGKey(0)
    params = make_params(kg, n_channels, n_classes)   # eager one-time GEMM prep

    # 64x64 input: ResNet-50 downsamples by 32 -> 2x2 PSP feature map.
    x = jax.random.normal(kg(), (2, n_channels, 64, 64), dtype=jnp.float32)

    out = jax.jit(pspnet_forward)(params, x)
    out = jax.block_until_ready(out)
    assert out.shape == (2, n_classes, 64, 64), out.shape
    assert bool(jnp.all(jnp.isfinite(out)))
    print("KERNEL_OK")
</pallas_src>

<mosaic_0001>
module attributes {stable_mosaic.version = 11 : i64} {
  func.func @_gemm_bn_kernel(%arg0: i32, %arg1: i32, %arg2: i32, %arg3: memref<512x256xbf16, #tpu.memory_space<vmem>>, %arg4: memref<256x128xbf16, #tpu.memory_space<vmem>>, %arg5: memref<1x128xf32, #tpu.memory_space<vmem>>, %arg6: memref<1x128xf32, #tpu.memory_space<vmem>>, %arg7: memref<512x128xbf16, #tpu.memory_space<vmem>>, %arg8: memref<512x128xf32, #tpu.memory_space<vmem>>) attributes {dimension_semantics = [#tpu.dimension_semantics<parallel>, #tpu.dimension_semantics<parallel>, #tpu.dimension_semantics<arbitrary>], iteration_bounds = array<i64: 4, 1, 1>, scalar_prefetch = 0 : i64, scratch_operands = 1 : i64, tpu.core_type = #tpu.core_type<tc>, window_params = [{transform_indices = @transform_0, window_bounds = array<i64: 512, 256>}, {transform_indices = @transform_1, window_bounds = array<i64: 256, 128>}, {transform_indices = @transform_2, window_bounds = array<i64: 1, 128>}, {transform_indices = @transform_3, window_bounds = array<i64: 1, 128>}, {transform_indices = @transform_4, window_bounds = array<i64: 512, 128>}]} {
    %c0_i32 = arith.constant 0 : i32
    %0 = arith.cmpi eq, %arg2, %c0_i32 : i32
    %1 = arith.extui %0 : i1 to i32
    %c0_i32_0 = arith.constant 0 : i32
    %2 = arith.cmpi ne, %1, %c0_i32_0 : i32
    scf.if %2 {
      %cst_10 = arith.constant 0.000000e+00 : f32
      %12 = vector.broadcast %cst_10 : f32 to vector<512x128xf32>
      %c0_11 = arith.constant 0 : index
      %c0_12 = arith.constant 0 : index
      %13 = vector.load %arg8[%c0_11, %c0_12] : memref<512x128xf32, #tpu.memory_space<vmem>>, vector<512x128xf32>
      tpu.vector_store %arg8[%c0_11, %c0_12], %12 {strides = array<i32>} : memref<512x128xf32, #tpu.memory_space<vmem>>, vector<512x128xf32>,
    } else {
    }
    %c0 = arith.constant 0 : index
    %c0_1 = arith.constant 0 : index
    %3 = vector.load %arg8[%c0, %c0_1] : memref<512x128xf32, #tpu.memory_space<vmem>>, vector<512x128xf32>
    %c0_2 = arith.constant 0 : index
    %c0_3 = arith.constant 0 : index
    %4 = vector.load %arg3[%c0_2, %c0_3] : memref<512x256xbf16, #tpu.memory_space<vmem>>, vector<512x256xbf16>
    %c0_4 = arith.constant 0 : index
    %c0_5 = arith.constant 0 : index
    %5 = vector.load %arg4[%c0_4, %c0_5] : memref<256x128xbf16, #tpu.memory_space<vmem>>, vector<256x128xbf16>
    %cst = arith.constant dense<0.000000e+00> : vector<512x128xf32>
    %6 = tpu.matmul %4, %5, %cst {dimension_numbers = #tpu.dot_dimension_numbers<[1], [0], [0], [1], [0, 0, 1, 1], [], []>} : vector<512x256xbf16>, vector<256x128xbf16>, vector<512x128xf32> -> vector<512x128xf32>
    %7 = arith.addf %3, %6 : vector<512x128xf32>
    %c0_6 = arith.constant 0 : index
    %c0_7 = arith.constant 0 : index
    %8 = vector.load %arg8[%c0_6, %c0_7] : memref<512x128xf32, #tpu.memory_space<vmem>>, vector<512x128xf32>
    tpu.vector_store %arg8[%c0_6, %c0_7], %7 {strides = array<i32>} : memref<512x128xf32, #tpu.memory_space<vmem>>, vector<512x128xf32>,
    %c0_i32_8 = arith.constant 0 : i32
    %9 = arith.cmpi eq, %arg2, %c0_i32_8 : i32
    %10 = arith.extui %9 : i1 to i32
    %c0_i32_9 = arith.constant 0 : i32
    %11 = arith.cmpi ne, %10, %c0_i32_9 : i32
    scf.if %11 {
      %c0_10 = arith.constant 0 : index
      %c0_11 = arith.constant 0 : index
      %12 = vector.load %arg8[%c0_10, %c0_11] : memref<512x128xf32, #tpu.memory_space<vmem>>, vector<512x128xf32>
      %c0_12 = arith.constant 0 : index
      %c0_13 = arith.constant 0 : index
      %13 = vector.load %arg5[%c0_12, %c0_13] : memref<1x128xf32, #tpu.memory_space<vmem>>, vector<1x128xf32>
      %14 = vector.broadcast %13 : vector<1x128xf32> to vector<512x128xf32>
      %15 = arith.mulf %12, %14 : vector<512x128xf32>
      %c0_14 = arith.constant 0 : index
      %c0_15 = arith.constant 0 : index
      %16 = vector.load %arg6[%c0_14, %c0_15] : memref<1x128xf32, #tpu.memory_space<vmem>>, vector<1x128xf32>
      %17 = vector.broadcast %16 : vector<1x128xf32> to vector<512x128xf32>
      %18 = arith.addf %15, %17 : vector<512x128xf32>
      %cst_16 = arith.constant 0.000000e+00 : f32
      %19 = vector.broadcast %cst_16 : f32 to vector<512x128xf32>
      %20 = arith.maximumf %18, %19 : vector<512x128xf32>
      %21 = arith.truncf %20 : vector<512x128xf32> to vector<512x128xbf16>
      %c0_17 = arith.constant 0 : index
      %c0_18 = arith.constant 0 : index
      %22 = vector.load %arg7[%c0_17, %c0_18] : memref<512x128xbf16, #tpu.memory_space<vmem>>, vector<512x128xbf16>
      tpu.vector_store %arg7[%c0_17, %c0_18], %21 {strides = array<i32>} : memref<512x128xbf16, #tpu.memory_space<vmem>>, vector<512x128xbf16>,
    } else {
    }
    return
  }
  func.func @transform_0(%arg0: i32, %arg1: i32, %arg2: i32) -> (i32, i32) {
    %c0_i32 = arith.constant 0 : i32
    return %arg0, %arg2 : i32, i32
  }
  func.func @transform_1(%arg0: i32, %arg1: i32, %arg2: i32) -> (i32, i32) {
    %c0_i32 = arith.constant 0 : i32
    return %arg2, %arg1 : i32, i32
  }
  func.func @transform_2(%arg0: i32, %arg1: i32, %arg2: i32) -> (i32, i32) {
    %c0_i32 = arith.constant 0 : i32
    %c0_i32_0 = arith.constant 0 : i32
    return %c0_i32, %arg1 : i32, i32
  }
  func.func @transform_3(%arg0: i32, %arg1: i32, %arg2: i32) -> (i32, i32) {
    %c0_i32 = arith.constant 0 : i32
    %c0_i32_0 = arith.constant 0 : i32
    return %c0_i32, %arg1 : i32, i32
  }
  func.func @transform_4(%arg0: i32, %arg1: i32, %arg2: i32) -> (i32, i32) {
    %c0_i32 = arith.constant 0 : i32
    return %arg0, %arg1 : i32, i32
  }
}

module attributes {stable_mosaic.version = 11 : i64} {
  func.func @_gemm_bn_kernel(%arg0: i32, %arg1: i32, %arg2: i32, %arg3: memref<256x128xbf16, #tpu.memory_space<vmem>>, %arg4: memref<128x128xbf16, #tpu.memory_space<vmem>>, %arg5: memref<1x128xf32, #tpu.memory_space<vmem>>, %arg6: memref<1x128xf32, #tpu.memory_space<vmem>>, %arg7: memref<256x128xbf16, #tpu.memory_space<vmem>>, %arg8: memref<256x128xf32, #tpu.memory_space<vmem>>) attributes {dimension_semantics = [#tpu.dimension_semantics<parallel>, #tpu.dimension_semantics<parallel>, #tpu.dimension_semantics<arbitrary>], iteration_bounds = array<i64: 2, 1, 1>, scalar_prefetch = 0 : i64, scratch_operands = 1 : i64, tpu.core_type = #tpu.core_type<tc>, window_params = [{transform_indices = @transform_0, window_bounds = array<i64: 256, 128>}, {transform_indices = @transform_1, window_bounds = array<i64: 128, 128>}, {transform_indices = @transform_2, window_bounds = array<i64: 1, 128>}, {transform_indices = @transform_3, window_bounds = array<i64: 1, 128>}, {transform_indices = @transform_4, window_bounds = array<i64: 256, 128>}]} {
    %c0_i32 = arith.constant 0 : i32
    %0 = arith.cmpi eq, %arg2, %c0_i32 : i32
    %1 = arith.extui %0 : i1 to i32
    %c0_i32_0 = arith.constant 0 : i32
    %2 = arith.cmpi ne, %1, %c0_i32_0 : i32
    scf.if %2 {
      %cst_10 = arith.constant 0.000000e+00 : f32
      %12 = vector.broadcast %cst_10 : f32 to vector<256x128xf32>
      %c0_11 = arith.constant 0 : index
      %c0_12 = arith.constant 0 : index
      %13 = vector.load %arg8[%c0_11, %c0_12] : memref<256x128xf32, #tpu.memory_space<vmem>>, vector<256x128xf32>
      tpu.vector_store %arg8[%c0_11, %c0_12], %12 {strides = array<i32>} : memref<256x128xf32, #tpu.memory_space<vmem>>, vector<256x128xf32>,
    } else {
    }
    %c0 = arith.constant 0 : index
    %c0_1 = arith.constant 0 : index
    %3 = vector.load %arg8[%c0, %c0_1] : memref<256x128xf32, #tpu.memory_space<vmem>>, vector<256x128xf32>
    %c0_2 = arith.constant 0 : index
    %c0_3 = arith.constant 0 : index
    %4 = vector.load %arg3[%c0_2, %c0_3] : memref<256x128xbf16, #tpu.memory_space<vmem>>, vector<256x128xbf16>
    %c0_4 = arith.constant 0 : index
    %c0_5 = arith.constant 0 : index
    %5 = vector.load %arg4[%c0_4, %c0_5] : memref<128x128xbf16, #tpu.memory_space<vmem>>, vector<128x128xbf16>
    %cst = arith.constant dense<0.000000e+00> : vector<256x128xf32>
    %6 = tpu.matmul %4, %5, %cst {dimension_numbers = #tpu.dot_dimension_numbers<[1], [0], [0], [1], [0, 0, 1, 1], [], []>} : vector<256x128xbf16>, vector<128x128xbf16>, vector<256x128xf32> -> vector<256x128xf32>
    %7 = arith.addf %3, %6 : vector<256x128xf32>
    %c0_6 = arith.constant 0 : index
    %c0_7 = arith.constant 0 : index
    %8 = vector.load %arg8[%c0_6, %c0_7] : memref<256x128xf32, #tpu.memory_space<vmem>>, vector<256x128xf32>
    tpu.vector_store %arg8[%c0_6, %c0_7], %7 {strides = array<i32>} : memref<256x128xf32, #tpu.memory_space<vmem>>, vector<256x128xf32>,
    %c0_i32_8 = arith.constant 0 : i32
    %9 = arith.cmpi eq, %arg2, %c0_i32_8 : i32
    %10 = arith.extui %9 : i1 to i32
    %c0_i32_9 = arith.constant 0 : i32
    %11 = arith.cmpi ne, %10, %c0_i32_9 : i32
    scf.if %11 {
      %c0_10 = arith.constant 0 : index
      %c0_11 = arith.constant 0 : index
      %12 = vector.load %arg8[%c0_10, %c0_11] : memref<256x128xf32, #tpu.memory_space<vmem>>, vector<256x128xf32>
      %c0_12 = arith.constant 0 : index
      %c0_13 = arith.constant 0 : index
      %13 = vector.load %arg5[%c0_12, %c0_13] : memref<1x128xf32, #tpu.memory_space<vmem>>, vector<1x128xf32>
      %14 = vector.broadcast %13 : vector<1x128xf32> to vector<256x128xf32>
      %15 = arith.mulf %12, %14 : vector<256x128xf32>
      %c0_14 = arith.constant 0 : index
      %c0_15 = arith.constant 0 : index
      %16 = vector.load %arg6[%c0_14, %c0_15] : memref<1x128xf32, #tpu.memory_space<vmem>>, vector<1x128xf32>
      %17 = vector.broadcast %16 : vector<1x128xf32> to vector<256x128xf32>
      %18 = arith.addf %15, %17 : vector<256x128xf32>
      %cst_16 = arith.constant 0.000000e+00 : f32
      %19 = vector.broadcast %cst_16 : f32 to vector<256x128xf32>
      %20 = arith.maximumf %18, %19 : vector<256x128xf32>
      %21 = arith.truncf %20 : vector<256x128xf32> to vector<256x128xbf16>
      %c0_17 = arith.constant 0 : index
      %c0_18 = arith.constant 0 : index
      %22 = vector.load %arg7[%c0_17, %c0_18] : memref<256x128xbf16, #tpu.memory_space<vmem>>, vector<256x128xbf16>
      tpu.vector_store %arg7[%c0_17, %c0_18], %21 {strides = array<i32>} : memref<256x128xbf16, #tpu.memory_space<vmem>>, vector<256x128xbf16>,
    } else {
    }
    return
  }
  func.func @transform_0(%arg0: i32, %arg1: i32, %arg2: i32) -> (i32, i32) {
    %c0_i32 = arith.constant 0 : i32
    return %arg0, %arg2 : i32, i32
  }
  func.func @transform_1(%arg0: i32, %arg1: i32, %arg2: i32) -> (i32, i32) {
    %c0_i32 = arith.constant 0 : i32
    return %arg2, %arg1 : i32, i32
  }
  func.func @transform_2(%arg0: i32, %arg1: i32, %arg2: i32) -> (i32, i32) {
    %c0_i32 = arith.constant 0 : i32
    %c0_i32_0 = arith.constant 0 : i32
    return %c0_i32, %arg1 : i32, i32
  }
  func.func @transform_3(%arg0: i32, %arg1: i32, %arg2: i32) -> (i32, i32) {
    %c0_i32 = arith.constant 0 : i32
    %c0_i32_0 = arith.constant 0 : i32
    return %c0_i32, %arg1 : i32, i32
  }
  func.func @transform_4(%arg0: i32, %arg1: i32, %arg2: i32) -> (i32, i32) {
    %c0_i32 = arith.constant 0 : i32
    return %arg0, %arg1 : i32, i32
  }
}

module attributes {stable_mosaic.version = 11 : i64} {
  func.func @_gemm_bn_kernel(%arg0: i32, %arg1: i32, %arg2: i32, %arg3: memref<256x128xbf16, #tpu.memory_space<vmem>>, %arg4: memref<128x128xbf16, #tpu.memory_space<vmem>>, %arg5: memref<1x128xf32, #tpu.memory_space<vmem>>, %arg6: memref<1x128xf32, #tpu.memory_space<vmem>>, %arg7: memref<256x128xbf16, #tpu.memory_space<vmem>>, %arg8: memref<256x128xf32, #tpu.memory_space<vmem>>) attributes {dimension_semantics = [#tpu.dimension_semantics<parallel>, #tpu.dimension_semantics<parallel>, #tpu.dimension_semantics<arbitrary>], iteration_bounds = array<i64: 2, 1, 1>, scalar_prefetch = 0 : i64, scratch_operands = 1 : i64, tpu.core_type = #tpu.core_type<tc>, window_params = [{transform_indices = @transform_0, window_bounds = array<i64: 256, 128>}, {transform_indices = @transform_1, window_bounds = array<i64: 128, 128>}, {transform_indices = @transform_2, window_bounds = array<i64: 1, 128>}, {transform_indices = @transform_3, window_bounds = array<i64: 1, 128>}, {transform_indices = @transform_4, window_bounds = array<i64: 256, 128>}]} {
    %c0_i32 = arith.constant 0 : i32
    %0 = arith.cmpi eq, %arg2, %c0_i32 : i32
    %1 = arith.extui %0 : i1 to i32
    %c0_i32_0 = arith.constant 0 : i32
    %2 = arith.cmpi ne, %1, %c0_i32_0 : i32
    scf.if %2 {
      %cst_10 = arith.constant 0.000000e+00 : f32
      %12 = vector.broadcast %cst_10 : f32 to vector<256x128xf32>
      %c0_11 = arith.constant 0 : index
      %c0_12 = arith.constant 0 : index
      %13 = vector.load %arg8[%c0_11, %c0_12] : memref<256x128xf32, #tpu.memory_space<vmem>>, vector<256x128xf32>
      tpu.vector_store %arg8[%c0_11, %c0_12], %12 {strides = array<i32>} : memref<256x128xf32, #tpu.memory_space<vmem>>, vector<256x128xf32>,
    } else {
    }
    %c0 = arith.constant 0 : index
    %c0_1 = arith.constant 0 : index
    %3 = vector.load %arg8[%c0, %c0_1] : memref<256x128xf32, #tpu.memory_space<vmem>>, vector<256x128xf32>
    %c0_2 = arith.constant 0 : index
    %c0_3 = arith.constant 0 : index
    %4 = vector.load %arg3[%c0_2, %c0_3] : memref<256x128xbf16, #tpu.memory_space<vmem>>, vector<256x128xbf16>
    %c0_4 = arith.constant 0 : index
    %c0_5 = arith.constant 0 : index
    %5 = vector.load %arg4[%c0_4, %c0_5] : memref<128x128xbf16, #tpu.memory_space<vmem>>, vector<128x128xbf16>
    %cst = arith.constant dense<0.000000e+00> : vector<256x128xf32>
    %6 = tpu.matmul %4, %5, %cst {dimension_numbers = #tpu.dot_dimension_numbers<[1], [0], [0], [1], [0, 0, 1, 1], [], []>} : vector<256x128xbf16>, vector<128x128xbf16>, vector<256x128xf32> -> vector<256x128xf32>
    %7 = arith.addf %3, %6 : vector<256x128xf32>
    %c0_6 = arith.constant 0 : index
    %c0_7 = arith.constant 0 : index
    %8 = vector.load %arg8[%c0_6, %c0_7] : memref<256x128xf32, #tpu.memory_space<vmem>>, vector<256x128xf32>
    tpu.vector_store %arg8[%c0_6, %c0_7], %7 {strides = array<i32>} : memref<256x128xf32, #tpu.memory_space<vmem>>, vector<256x128xf32>,
    %c0_i32_8 = arith.constant 0 : i32
    %9 = arith.cmpi eq, %arg2, %c0_i32_8 : i32
    %10 = arith.extui %9 : i1 to i32
    %c0_i32_9 = arith.constant 0 : i32
    %11 = arith.cmpi ne, %10, %c0_i32_9 : i32
    scf.if %11 {
      %c0_10 = arith.constant 0 : index
      %c0_11 = arith.constant 0 : index
      %12 = vector.load %arg8[%c0_10, %c0_11] : memref<256x128xf32, #tpu.memory_space<vmem>>, vector<256x128xf32>
      %c0_12 = arith.constant 0 : index
      %c0_13 = arith.constant 0 : index
      %13 = vector.load %arg5[%c0_12, %c0_13] : memref<1x128xf32, #tpu.memory_space<vmem>>, vector<1x128xf32>
      %14 = vector.broadcast %13 : vector<1x128xf32> to vector<256x128xf32>
      %15 = arith.mulf %12, %14 : vector<256x128xf32>
      %c0_14 = arith.constant 0 : index
      %c0_15 = arith.constant 0 : index
      %16 = vector.load %arg6[%c0_14, %c0_15] : memref<1x128xf32, #tpu.memory_space<vmem>>, vector<1x128xf32>
      %17 = vector.broadcast %16 : vector<1x128xf32> to vector<256x128xf32>
      %18 = arith.addf %15, %17 : vector<256x128xf32>
      %cst_16 = arith.constant 0.000000e+00 : f32
      %19 = vector.broadcast %cst_16 : f32 to vector<256x128xf32>
      %20 = arith.maximumf %18, %19 : vector<256x128xf32>
      %21 = arith.truncf %20 : vector<256x128xf32> to vector<256x128xbf16>
      %c0_17 = arith.constant 0 : index
      %c0_18 = arith.constant 0 : index
      %22 = vector.load %arg7[%c0_17, %c0_18] : memref<256x128xbf16, #tpu.memory_space<vmem>>, vector<256x128xbf16>
      tpu.vector_store %arg7[%c0_17, %c0_18], %21 {strides = array<i32>} : memref<256x128xbf16, #tpu.memory_space<vmem>>, vector<256x128xbf16>,
    } else {
    }
    return
  }
  func.func @transform_0(%arg0: i32, %arg1: i32, %arg2: i32) -> (i32, i32) {
    %c0_i32 = arith.constant 0 : i32
    return %arg0, %arg2 : i32, i32
  }
  func.func @transform_1(%arg0: i32, %arg1: i32, %arg2: i32) -> (i32, i32) {
    %c0_i32 = arith.constant 0 : i32
    return %arg2, %arg1 : i32, i32
  }
  func.func @transform_2(%arg0: i32, %arg1: i32, %arg2: i32) -> (i32, i32) {
    %c0_i32 = arith.constant 0 : i32
    %c0_i32_0 = arith.constant 0 : i32
    return %c0_i32, %arg1 : i32, i32
  }
  func.func @transform_3(%arg0: i32, %arg1: i32, %arg2: i32) -> (i32, i32) {
    %c0_i32 = arith.constant 0 : i32
    %c0_i32_0 = arith.constant 0 : i32
    return %c0_i32, %arg1 : i32, i32
  }
  func.func @transform_4(%arg0: i32, %arg1: i32, %arg2: i32) -> (i32, i32) {
    %c0_i32 = arith.constant 0 : i32
    return %arg0, %arg1 : i32, i32
  }
}

module attributes {stable_mosaic.version = 11 : i64} {
  func.func @_gemm_bn_kernel(%arg0: i32, %arg1: i32, %arg2: i32, %arg3: memref<256x128xbf16, #tpu.memory_space<vmem>>, %arg4: memref<128x128xbf16, #tpu.memory_space<vmem>>, %arg5: memref<1x128xf32, #tpu.memory_space<vmem>>, %arg6: memref<1x128xf32, #tpu.memory_space<vmem>>, %arg7: memref<256x128xbf16, #tpu.memory_space<vmem>>, %arg8: memref<256x128xf32, #tpu.memory_space<vmem>>) attributes {dimension_semantics = [#tpu.dimension_semantics<parallel>, #tpu.dimension_semantics<parallel>, #tpu.dimension_semantics<arbitrary>], iteration_bounds = array<i64: 2, 1, 1>, scalar_prefetch = 0 : i64, scratch_operands = 1 : i64, tpu.core_type = #tpu.core_type<tc>, window_params = [{transform_indices = @transform_0, window_bounds = array<i64: 256, 128>}, {transform_indices = @transform_1, window_bounds = array<i64: 128, 128>}, {transform_indices = @transform_2, window_bounds = array<i64: 1, 128>}, {transform_indices = @transform_3, window_bounds = array<i64: 1, 128>}, {transform_indices = @transform_4, window_bounds = array<i64: 256, 128>}]} {
    %c0_i32 = arith.constant 0 : i32
    %0 = arith.cmpi eq, %arg2, %c0_i32 : i32
    %1 = arith.extui %0 : i1 to i32
    %c0_i32_0 = arith.constant 0 : i32
    %2 = arith.cmpi ne, %1, %c0_i32_0 : i32
    scf.if %2 {
      %cst_10 = arith.constant 0.000000e+00 : f32
      %12 = vector.broadcast %cst_10 : f32 to vector<256x128xf32>
      %c0_11 = arith.constant 0 : index
      %c0_12 = arith.constant 0 : index
      %13 = vector.load %arg8[%c0_11, %c0_12] : memref<256x128xf32, #tpu.memory_space<vmem>>, vector<256x128xf32>
      tpu.vector_store %arg8[%c0_11, %c0_12], %12 {strides = array<i32>} : memref<256x128xf32, #tpu.memory_space<vmem>>, vector<256x128xf32>,
    } else {
    }
    %c0 = arith.constant 0 : index
    %c0_1 = arith.constant 0 : index
    %3 = vector.load %arg8[%c0, %c0_1] : memref<256x128xf32, #tpu.memory_space<vmem>>, vector<256x128xf32>
    %c0_2 = arith.constant 0 : index
    %c0_3 = arith.constant 0 : index
    %4 = vector.load %arg3[%c0_2, %c0_3] : memref<256x128xbf16, #tpu.memory_space<vmem>>, vector<256x128xbf16>
    %c0_4 = arith.constant 0 : index
    %c0_5 = arith.constant 0 : index
    %5 = vector.load %arg4[%c0_4, %c0_5] : memref<128x128xbf16, #tpu.memory_space<vmem>>, vector<128x128xbf16>
    %cst = arith.constant dense<0.000000e+00> : vector<256x128xf32>
    %6 = tpu.matmul %4, %5, %cst {dimension_numbers = #tpu.dot_dimension_numbers<[1], [0], [0], [1], [0, 0, 1, 1], [], []>} : vector<256x128xbf16>, vector<128x128xbf16>, vector<256x128xf32> -> vector<256x128xf32>
    %7 = arith.addf %3, %6 : vector<256x128xf32>
    %c0_6 = arith.constant 0 : index
    %c0_7 = arith.constant 0 : index
    %8 = vector.load %arg8[%c0_6, %c0_7] : memref<256x128xf32, #tpu.memory_space<vmem>>, vector<256x128xf32>
    tpu.vector_store %arg8[%c0_6, %c0_7], %7 {strides = array<i32>} : memref<256x128xf32, #tpu.memory_space<vmem>>, vector<256x128xf32>,
    %c0_i32_8 = arith.constant 0 : i32
    %9 = arith.cmpi eq, %arg2, %c0_i32_8 : i32
    %10 = arith.extui %9 : i1 to i32
    %c0_i32_9 = arith.constant 0 : i32
    %11 = arith.cmpi ne, %10, %c0_i32_9 : i32
    scf.if %11 {
      %c0_10 = arith.constant 0 : index
      %c0_11 = arith.constant 0 : index
      %12 = vector.load %arg8[%c0_10, %c0_11] : memref<256x128xf32, #tpu.memory_space<vmem>>, vector<256x128xf32>
      %c0_12 = arith.constant 0 : index
      %c0_13 = arith.constant 0 : index
      %13 = vector.load %arg5[%c0_12, %c0_13] : memref<1x128xf32, #tpu.memory_space<vmem>>, vector<1x128xf32>
      %14 = vector.broadcast %13 : vector<1x128xf32> to vector<256x128xf32>
      %15 = arith.mulf %12, %14 : vector<256x128xf32>
      %c0_14 = arith.constant 0 : index
      %c0_15 = arith.constant 0 : index
      %16 = vector.load %arg6[%c0_14, %c0_15] : memref<1x128xf32, #tpu.memory_space<vmem>>, vector<1x128xf32>
      %17 = vector.broadcast %16 : vector<1x128xf32> to vector<256x128xf32>
      %18 = arith.addf %15, %17 : vector<256x128xf32>
      %19 = arith.truncf %18 : vector<256x128xf32> to vector<256x128xbf16>
      %c0_16 = arith.constant 0 : index
      %c0_17 = arith.constant 0 : index
      %20 = vector.load %arg7[%c0_16, %c0_17] : memref<256x128xbf16, #tpu.memory_space<vmem>>, vector<256x128xbf16>
      tpu.vector_store %arg7[%c0_16, %c0_17], %19 {strides = array<i32>} : memref<256x128xbf16, #tpu.memory_space<vmem>>, vector<256x128xbf16>,
    } else {
    }
    return
  }
  func.func @transform_0(%arg0: i32, %arg1: i32, %arg2: i32) -> (i32, i32) {
    %c0_i32 = arith.constant 0 : i32
    return %arg0, %arg2 : i32, i32
  }
  func.func @transform_1(%arg0: i32, %arg1: i32, %arg2: i32) -> (i32, i32) {
    %c0_i32 = arith.constant 0 : i32
    return %arg2, %arg1 : i32, i32
  }
  func.func @transform_2(%arg0: i32, %arg1: i32, %arg2: i32) -> (i32, i32) {
    %c0_i32 = arith.constant 0 : i32
    %c0_i32_0 = arith.constant 0 : i32
    return %c0_i32, %arg1 : i32, i32
  }
  func.func @transform_3(%arg0: i32, %arg1: i32, %arg2: i32) -> (i32, i32) {
    %c0_i32 = arith.constant 0 : i32
    %c0_i32_0 = arith.constant 0 : i32
    return %c0_i32, %arg1 : i32, i32
  }
  func.func @transform_4(%arg0: i32, %arg1: i32, %arg2: i32) -> (i32, i32) {
    %c0_i32 = arith.constant 0 : i32
    return %arg0, %arg1 : i32, i32
  }
}

module attributes {stable_mosaic.version = 11 : i64} {
  func.func @_gemm_bn_kernel(%arg0: i32, %arg1: i32, %arg2: i32, %arg3: memref<256x128xbf16, #tpu.memory_space<vmem>>, %arg4: memref<128x128xbf16, #tpu.memory_space<vmem>>, %arg5: memref<1x128xf32, #tpu.memory_space<vmem>>, %arg6: memref<1x128xf32, #tpu.memory_space<vmem>>, %arg7: memref<256x128xbf16, #tpu.memory_space<vmem>>, %arg8: memref<256x128xbf16, #tpu.memory_space<vmem>>, %arg9: memref<256x128xf32, #tpu.memory_space<vmem>>) attributes {dimension_semantics = [#tpu.dimension_semantics<parallel>, #tpu.dimension_semantics<parallel>, #tpu.dimension_semantics<arbitrary>], iteration_bounds = array<i64: 2, 1, 1>, scalar_prefetch = 0 : i64, scratch_operands = 1 : i64, tpu.core_type = #tpu.core_type<tc>, window_params = [{transform_indices = @transform_0, window_bounds = array<i64: 256, 128>}, {transform_indices = @transform_1, window_bounds = array<i64: 128, 128>}, {transform_indices = @transform_2, window_bounds = array<i64: 1, 128>}, {transform_indices = @transform_3, window_bounds = array<i64: 1, 128>}, {transform_indices = @transform_4, window_bounds = array<i64: 256, 128>}, {transform_indices = @transform_5, window_bounds = array<i64: 256, 128>}]} {
    %c0_i32 = arith.constant 0 : i32
    %0 = arith.cmpi eq, %arg2, %c0_i32 : i32
    %1 = arith.extui %0 : i1 to i32
    %c0_i32_0 = arith.constant 0 : i32
    %2 = arith.cmpi ne, %1, %c0_i32_0 : i32
    scf.if %2 {
      %cst_10 = arith.constant 0.000000e+00 : f32
      %12 = vector.broadcast %cst_10 : f32 to vector<256x128xf32>
      %c0_11 = arith.constant 0 : index
      %c0_12 = arith.constant 0 : index
      %13 = vector.load %arg9[%c0_11, %c0_12] : memref<256x128xf32, #tpu.memory_space<vmem>>, vector<256x128xf32>
      tpu.vector_store %arg9[%c0_11, %c0_12], %12 {strides = array<i32>} : memref<256x128xf32, #tpu.memory_space<vmem>>, vector<256x128xf32>,
    } else {
    }
    %c0 = arith.constant 0 : index
    %c0_1 = arith.constant 0 : index
    %3 = vector.load %arg9[%c0, %c0_1] : memref<256x128xf32, #tpu.memory_space<vmem>>, vector<256x128xf32>
    %c0_2 = arith.constant 0 : index
    %c0_3 = arith.constant 0 : index
    %4 = vector.load %arg3[%c0_2, %c0_3] : memref<256x128xbf16, #tpu.memory_space<vmem>>, vector<256x128xbf16>
    %c0_4 = arith.constant 0 : index
    %c0_5 = arith.constant 0 : index
    %5 = vector.load %arg4[%c0_4, %c0_5] : memref<128x128xbf16, #tpu.memory_space<vmem>>, vector<128x128xbf16>
    %cst = arith.constant dense<0.000000e+00> : vector<256x128xf32>
    %6 = tpu.matmul %4, %5, %cst {dimension_numbers = #tpu.dot_dimension_numbers<[1], [0], [0], [1], [0, 0, 1, 1], [], []>} : vector<256x128xbf16>, vector<128x128xbf16>, vector<256x128xf32> -> vector<256x128xf32>
    %7 = arith.addf %3, %6 : vector<256x128xf32>
    %c0_6 = arith.constant 0 : index
    %c0_7 = arith.constant 0 : index
    %8 = vector.load %arg9[%c0_6, %c0_7] : memref<256x128xf32, #tpu.memory_space<vmem>>, vector<256x128xf32>
    tpu.vector_store %arg9[%c0_6, %c0_7], %7 {strides = array<i32>} : memref<256x128xf32, #tpu.memory_space<vmem>>, vector<256x128xf32>,
    %c0_i32_8 = arith.constant 0 : i32
    %9 = arith.cmpi eq, %arg2, %c0_i32_8 : i32
    %10 = arith.extui %9 : i1 to i32
    %c0_i32_9 = arith.constant 0 : i32
    %11 = arith.cmpi ne, %10, %c0_i32_9 : i32
    scf.if %11 {
      %c0_10 = arith.constant 0 : index
      %c0_11 = arith.constant 0 : index
      %12 = vector.load %arg9[%c0_10, %c0_11] : memref<256x128xf32, #tpu.memory_space<vmem>>, vector<256x128xf32>
      %c0_12 = arith.constant 0 : index
      %c0_13 = arith.constant 0 : index
      %13 = vector.load %arg5[%c0_12, %c0_13] : memref<1x128xf32, #tpu.memory_space<vmem>>, vector<1x128xf32>
      %14 = vector.broadcast %13 : vector<1x128xf32> to vector<256x128xf32>
      %15 = arith.mulf %12, %14 : vector<256x128xf32>
      %c0_14 = arith.constant 0 : index
      %c0_15 = arith.constant 0 : index
      %16 = vector.load %arg6[%c0_14, %c0_15] : memref<1x128xf32, #tpu.memory_space<vmem>>, vector<1x128xf32>
      %17 = vector.broadcast %16 : vector<1x128xf32> to vector<256x128xf32>
      %18 = arith.addf %15, %17 : vector<256x128xf32>
      %c0_16 = arith.constant 0 : index
      %c0_17 = arith.constant 0 : index
      %19 = vector.load %arg7[%c0_16, %c0_17] : memref<256x128xbf16, #tpu.memory_space<vmem>>, vector<256x128xbf16>
      %20 = arith.extf %19 : vector<256x128xbf16> to vector<256x128xf32>
      %21 = arith.addf %18, %20 : vector<256x128xf32>
      %cst_18 = arith.constant 0.000000e+00 : f32
      %22 = vector.broadcast %cst_18 : f32 to vector<256x128xf32>
      %23 = arith.maximumf %21, %22 : vector<256x128xf32>
      %24 = arith.truncf %23 : vector<256x128xf32> to vector<256x128xbf16>
      %c0_19 = arith.constant 0 : index
      %c0_20 = arith.constant 0 : index
      %25 = vector.load %arg8[%c0_19, %c0_20] : memref<256x128xbf16, #tpu.memory_space<vmem>>, vector<256x128xbf16>
      tpu.vector_store %arg8[%c0_19, %c0_20], %24 {strides = array<i32>} : memref<256x128xbf16, #tpu.memory_space<vmem>>, vector<256x128xbf16>,
    } else {
    }
    return
  }
  func.func @transform_0(%arg0: i32, %arg1: i32, %arg2: i32) -> (i32, i32) {
    %c0_i32 = arith.constant 0 : i32
    return %arg0, %arg2 : i32, i32
  }
  func.func @transform_1(%arg0: i32, %arg1: i32, %arg2: i32) -> (i32, i32) {
    %c0_i32 = arith.constant 0 : i32
    return %arg2, %arg1 : i32, i32
  }
  func.func @transform_2(%arg0: i32, %arg1: i32, %arg2: i32) -> (i32, i32) {
    %c0_i32 = arith.constant 0 : i32
    %c0_i32_0 = arith.constant 0 : i32
    return %c0_i32, %arg1 : i32, i32
  }
  func.func @transform_3(%arg0: i32, %arg1: i32, %arg2: i32) -> (i32, i32) {
    %c0_i32 = arith.constant 0 : i32
    %c0_i32_0 = arith.constant 0 : i32
    return %c0_i32, %arg1 : i32, i32
  }
  func.func @transform_4(%arg0: i32, %arg1: i32, %arg2: i32) -> (i32, i32) {
    %c0_i32 = arith.constant 0 : i32
    return %arg0, %arg1 : i32, i32
  }
  func.func @transform_5(%arg0: i32, %arg1: i32, %arg2: i32) -> (i32, i32) {
    %c0_i32 = arith.constant 0 : i32
    return %arg0, %arg1 : i32, i32
  }
}

module attributes {stable_mosaic.version = 11 : i64} {
  func.func @_gemm_bn_kernel(%arg0: i32, %arg1: i32, %arg2: i32, %arg3: memref<256x128xbf16, #tpu.memory_space<vmem>>, %arg4: memref<128x128xbf16, #tpu.memory_space<vmem>>, %arg5: memref<1x128xf32, #tpu.memory_space<vmem>>, %arg6: memref<1x128xf32, #tpu.memory_space<vmem>>, %arg7: memref<256x128xbf16, #tpu.memory_space<vmem>>, %arg8: memref<256x128xf32, #tpu.memory_space<vmem>>) attributes {dimension_semantics = [#tpu.dimension_semantics<parallel>, #tpu.dimension_semantics<parallel>, #tpu.dimension_semantics<arbitrary>], iteration_bounds = array<i64: 2, 1, 1>, scalar_prefetch = 0 : i64, scratch_operands = 1 : i64, tpu.core_type = #tpu.core_type<tc>, window_params = [{transform_indices = @transform_0, window_bounds = array<i64: 256, 128>}, {transform_indices = @transform_1, window_bounds = array<i64: 128, 128>}, {transform_indices = @transform_2, window_bounds = array<i64: 1, 128>}, {transform_indices = @transform_3, window_bounds = array<i64: 1, 128>}, {transform_indices = @transform_4, window_bounds = array<i64: 256, 128>}]} {
    %c0_i32 = arith.constant 0 : i32
    %0 = arith.cmpi eq, %arg2, %c0_i32 : i32
    %1 = arith.extui %0 : i1 to i32
    %c0_i32_0 = arith.constant 0 : i32
    %2 = arith.cmpi ne, %1, %c0_i32_0 : i32
    scf.if %2 {
      %cst_10 = arith.constant 0.000000e+00 : f32
      %12 = vector.broadcast %cst_10 : f32 to vector<256x128xf32>
      %c0_11 = arith.constant 0 : index
      %c0_12 = arith.constant 0 : index
      %13 = vector.load %arg8[%c0_11, %c0_12] : memref<256x128xf32, #tpu.memory_space<vmem>>, vector<256x128xf32>
      tpu.vector_store %arg8[%c0_11, %c0_12], %12 {strides = array<i32>} : memref<256x128xf32, #tpu.memory_space<vmem>>, vector<256x128xf32>,
    } else {
    }
    %c0 = arith.constant 0 : index
    %c0_1 = arith.constant 0 : index
    %3 = vector.load %arg8[%c0, %c0_1] : memref<256x128xf32, #tpu.memory_space<vmem>>, vector<256x128xf32>
    %c0_2 = arith.constant 0 : index
    %c0_3 = arith.constant 0 : index
    %4 = vector.load %arg3[%c0_2, %c0_3] : memref<256x128xbf16, #tpu.memory_space<vmem>>, vector<256x128xbf16>
    %c0_4 = arith.constant 0 : index
    %c0_5 = arith.constant 0 : index
    %5 = vector.load %arg4[%c0_4, %c0_5] : memref<128x128xbf16, #tpu.memory_space<vmem>>, vector<128x128xbf16>
    %cst = arith.constant dense<0.000000e+00> : vector<256x128xf32>
    %6 = tpu.matmul %4, %5, %cst {dimension_numbers = #tpu.dot_dimension_numbers<[1], [0], [0], [1], [0, 0, 1, 1], [], []>} : vector<256x128xbf16>, vector<128x128xbf16>, vector<256x128xf32> -> vector<256x128xf32>
    %7 = arith.addf %3, %6 : vector<256x128xf32>
    %c0_6 = arith.constant 0 : index
    %c0_7 = arith.constant 0 : index
    %8 = vector.load %arg8[%c0_6, %c0_7] : memref<256x128xf32, #tpu.memory_space<vmem>>, vector<256x128xf32>
    tpu.vector_store %arg8[%c0_6, %c0_7], %7 {strides = array<i32>} : memref<256x128xf32, #tpu.memory_space<vmem>>, vector<256x128xf32>,
    %c0_i32_8 = arith.constant 0 : i32
    %9 = arith.cmpi eq, %arg2, %c0_i32_8 : i32
    %10 = arith.extui %9 : i1 to i32
    %c0_i32_9 = arith.constant 0 : i32
    %11 = arith.cmpi ne, %10, %c0_i32_9 : i32
    scf.if %11 {
      %c0_10 = arith.constant 0 : index
      %c0_11 = arith.constant 0 : index
      %12 = vector.load %arg8[%c0_10, %c0_11] : memref<256x128xf32, #tpu.memory_space<vmem>>, vector<256x128xf32>
      %c0_12 = arith.constant 0 : index
      %c0_13 = arith.constant 0 : index
      %13 = vector.load %arg5[%c0_12, %c0_13] : memref<1x128xf32, #tpu.memory_space<vmem>>, vector<1x128xf32>
      %14 = vector.broadcast %13 : vector<1x128xf32> to vector<256x128xf32>
      %15 = arith.mulf %12, %14 : vector<256x128xf32>
      %c0_14 = arith.constant 0 : index
      %c0_15 = arith.constant 0 : index
      %16 = vector.load %arg6[%c0_14, %c0_15] : memref<1x128xf32, #tpu.memory_space<vmem>>, vector<1x128xf32>
      %17 = vector.broadcast %16 : vector<1x128xf32> to vector<256x128xf32>
      %18 = arith.addf %15, %17 : vector<256x128xf32>
      %cst_16 = arith.constant 0.000000e+00 : f32
      %19 = vector.broadcast %cst_16 : f32 to vector<256x128xf32>
      %20 = arith.maximumf %18, %19 : vector<256x128xf32>
      %21 = arith.truncf %20 : vector<256x128xf32> to vector<256x128xbf16>
      %c0_17 = arith.constant 0 : index
      %c0_18 = arith.constant 0 : index
      %22 = vector.load %arg7[%c0_17, %c0_18] : memref<256x128xbf16, #tpu.memory_space<vmem>>, vector<256x128xbf16>
      tpu.vector_store %arg7[%c0_17, %c0_18], %21 {strides = array<i32>} : memref<256x128xbf16, #tpu.memory_space<vmem>>, vector<256x128xbf16>,
    } else {
    }
    return
  }
  func.func @transform_0(%arg0: i32, %arg1: i32, %arg2: i32) -> (i32, i32) {
    %c0_i32 = arith.constant 0 : i32
    return %arg0, %arg2 : i32, i32
  }
  func.func @transform_1(%arg0: i32, %arg1: i32, %arg2: i32) -> (i32, i32) {
    %c0_i32 = arith.constant 0 : i32
    return %arg2, %arg1 : i32, i32
  }
  func.func @transform_2(%arg0: i32, %arg1: i32, %arg2: i32) -> (i32, i32) {
    %c0_i32 = arith.constant 0 : i32
    %c0_i32_0 = arith.constant 0 : i32
    return %c0_i32, %arg1 : i32, i32
  }
  func.func @transform_3(%arg0: i32, %arg1: i32, %arg2: i32) -> (i32, i32) {
    %c0_i32 = arith.constant 0 : i32
    %c0_i32_0 = arith.constant 0 : i32
    return %c0_i32, %arg1 : i32, i32
  }
  func.func @transform_4(%arg0: i32, %arg1: i32, %arg2: i32) -> (i32, i32) {
    %c0_i32 = arith.constant 0 : i32
    return %arg0, %arg1 : i32, i32
  }
}

module attributes {stable_mosaic.version = 11 : i64} {
  func.func @_gemm_bn_kernel(%arg0: i32, %arg1: i32, %arg2: i32, %arg3: memref<256x128xbf16, #tpu.memory_space<vmem>>, %arg4: memref<128x128xbf16, #tpu.memory_space<vmem>>, %arg5: memref<1x128xf32, #tpu.memory_space<vmem>>, %arg6: memref<1x128xf32, #tpu.memory_space<vmem>>, %arg7: memref<256x128xbf16, #tpu.memory_space<vmem>>, %arg8: memref<256x128xf32, #tpu.memory_space<vmem>>) attributes {dimension_semantics = [#tpu.dimension_semantics<parallel>, #tpu.dimension_semantics<parallel>, #tpu.dimension_semantics<arbitrary>], iteration_bounds = array<i64: 2, 1, 1>, scalar_prefetch = 0 : i64, scratch_operands = 1 : i64, tpu.core_type = #tpu.core_type<tc>, window_params = [{transform_indices = @transform_0, window_bounds = array<i64: 256, 128>}, {transform_indices = @transform_1, window_bounds = array<i64: 128, 128>}, {transform_indices = @transform_2, window_bounds = array<i64: 1, 128>}, {transform_indices = @transform_3, window_bounds = array<i64: 1, 128>}, {transform_indices = @transform_4, window_bounds = array<i64: 256, 128>}]} {
    %c0_i32 = arith.constant 0 : i32
    %0 = arith.cmpi eq, %arg2, %c0_i32 : i32
    %1 = arith.extui %0 : i1 to i32
    %c0_i32_0 = arith.constant 0 : i32
    %2 = arith.cmpi ne, %1, %c0_i32_0 : i32
    scf.if %2 {
      %cst_10 = arith.constant 0.000000e+00 : f32
      %12 = vector.broadcast %cst_10 : f32 to vector<256x128xf32>
      %c0_11 = arith.constant 0 : index
      %c0_12 = arith.constant 0 : index
      %13 = vector.load %arg8[%c0_11, %c0_12] : memref<256x128xf32, #tpu.memory_space<vmem>>, vector<256x128xf32>
      tpu.vector_store %arg8[%c0_11, %c0_12], %12 {strides = array<i32>} : memref<256x128xf32, #tpu.memory_space<vmem>>, vector<256x128xf32>,
    } else {
    }
    %c0 = arith.constant 0 : index
    %c0_1 = arith.constant 0 : index
    %3 = vector.load %arg8[%c0, %c0_1] : memref<256x128xf32, #tpu.memory_space<vmem>>, vector<256x128xf32>
    %c0_2 = arith.constant 0 : index
    %c0_3 = arith.constant 0 : index
    %4 = vector.load %arg3[%c0_2, %c0_3] : memref<256x128xbf16, #tpu.memory_space<vmem>>, vector<256x128xbf16>
    %c0_4 = arith.constant 0 : index
    %c0_5 = arith.constant 0 : index
    %5 = vector.load %arg4[%c0_4, %c0_5] : memref<128x128xbf16, #tpu.memory_space<vmem>>, vector<128x128xbf16>
    %cst = arith.constant dense<0.000000e+00> : vector<256x128xf32>
    %6 = tpu.matmul %4, %5, %cst {dimension_numbers = #tpu.dot_dimension_numbers<[1], [0], [0], [1], [0, 0, 1, 1], [], []>} : vector<256x128xbf16>, vector<128x128xbf16>, vector<256x128xf32> -> vector<256x128xf32>
    %7 = arith.addf %3, %6 : vector<256x128xf32>
    %c0_6 = arith.constant 0 : index
    %c0_7 = arith.constant 0 : index
    %8 = vector.load %arg8[%c0_6, %c0_7] : memref<256x128xf32, #tpu.memory_space<vmem>>, vector<256x128xf32>
    tpu.vector_store %arg8[%c0_6, %c0_7], %7 {strides = array<i32>} : memref<256x128xf32, #tpu.memory_space<vmem>>, vector<256x128xf32>,
    %c0_i32_8 = arith.constant 0 : i32
    %9 = arith.cmpi eq, %arg2, %c0_i32_8 : i32
    %10 = arith.extui %9 : i1 to i32
    %c0_i32_9 = arith.constant 0 : i32
    %11 = arith.cmpi ne, %10, %c0_i32_9 : i32
    scf.if %11 {
      %c0_10 = arith.constant 0 : index
      %c0_11 = arith.constant 0 : index
      %12 = vector.load %arg8[%c0_10, %c0_11] : memref<256x128xf32, #tpu.memory_space<vmem>>, vector<256x128xf32>
      %c0_12 = arith.constant 0 : index
      %c0_13 = arith.constant 0 : index
      %13 = vector.load %arg5[%c0_12, %c0_13] : memref<1x128xf32, #tpu.memory_space<vmem>>, vector<1x128xf32>
      %14 = vector.broadcast %13 : vector<1x128xf32> to vector<256x128xf32>
      %15 = arith.mulf %12, %14 : vector<256x128xf32>
      %c0_14 = arith.constant 0 : index
      %c0_15 = arith.constant 0 : index
      %16 = vector.load %arg6[%c0_14, %c0_15] : memref<1x128xf32, #tpu.memory_space<vmem>>, vector<1x128xf32>
      %17 = vector.broadcast %16 : vector<1x128xf32> to vector<256x128xf32>
      %18 = arith.addf %15, %17 : vector<256x128xf32>
      %cst_16 = arith.constant 0.000000e+00 : f32
      %19 = vector.broadcast %cst_16 : f32 to vector<256x128xf32>
      %20 = arith.maximumf %18, %19 : vector<256x128xf32>
      %21 = arith.truncf %20 : vector<256x128xf32> to vector<256x128xbf16>
      %c0_17 = arith.constant 0 : index
      %c0_18 = arith.constant 0 : index
      %22 = vector.load %arg7[%c0_17, %c0_18] : memref<256x128xbf16, #tpu.memory_space<vmem>>, vector<256x128xbf16>
      tpu.vector_store %arg7[%c0_17, %c0_18], %21 {strides = array<i32>} : memref<256x128xbf16, #tpu.memory_space<vmem>>, vector<256x128xbf16>,
    } else {
    }
    return
  }
  func.func @transform_0(%arg0: i32, %arg1: i32, %arg2: i32) -> (i32, i32) {
    %c0_i32 = arith.constant 0 : i32
    return %arg0, %arg2 : i32, i32
  }
  func.func @transform_1(%arg0: i32, %arg1: i32, %arg2: i32) -> (i32, i32) {
    %c0_i32 = arith.constant 0 : i32
    return %arg2, %arg1 : i32, i32
  }
  func.func @transform_2(%arg0: i32, %arg1: i32, %arg2: i32) -> (i32, i32) {
    %c0_i32 = arith.constant 0 : i32
    %c0_i32_0 = arith.constant 0 : i32
    return %c0_i32, %arg1 : i32, i32
  }
  func.func @transform_3(%arg0: i32, %arg1: i32, %arg2: i32) -> (i32, i32) {
    %c0_i32 = arith.constant 0 : i32
    %c0_i32_0 = arith.constant 0 : i32
    return %c0_i32, %arg1 : i32, i32
  }
  func.func @transform_4(%arg0: i32, %arg1: i32, %arg2: i32) -> (i32, i32) {
    %c0_i32 = arith.constant 0 : i32
    return %arg0, %arg1 : i32, i32
  }
}

</mosaic_0001>

<bundles_post_ra>
// kernel: pspnet_forward.12
= control target key start
LH: loop header
LB: loop body
LE: loop exit
PB: predicated region body
PF: predicated region fallthrough
CT: control target
= control target key end

     0   :  { %s2725_s15 = smov 0   ;;  %s2727_s16 = smov 0   ;;  %s3080_s0 = inlined_call_operand.vmem [shape: bf16[2048,256], index: 0, kind: input, shape index: {}]   ;;  %s3081_s1 = inlined_call_operand.vmem [shape: bf16[256,128], index: 1, kind: input, shape index: {}]   ;;  %s3082_s2 = inlined_call_operand.vmem [shape: f32[1,128], index: 2, kind: input, shape index: {}]   ;;  %s3083_s3 = inlined_call_operand.vmem [shape: f32[1,128], index: 3, kind: input, shape index: {}]   ;;  %s3084_s4 = inlined_call_operand.vmem [shape: bf16[2048,128], index: 4, kind: output, shape index: {}]  }
   0x1   :  { %s2729_s17 = smov 0  }
   0x2 LB: > { %s33_s18 = sadd.s32 1, %s2693_s16  ;;  %p2096_p0 = scmp.ge.s32.totalorder %s2697_s17, 1  ;;  %s2697_s17 = sphi %s2729_s17, %s14_s17   ;;  %s2693_s16 = sphi %s2727_s16, %s3086_s16   ;;  %s2689_s15 = sphi %s2725_s15, %s3085_s15  }
   0x3   : > { %p35_p1 = scmp.ge.s32.totalorder %s33_s18, 4  ;;  %p224_p2 = scmp.lt.s32.totalorder %s2697_s17, 5 }
   0x5   : > { %s3088_s18 = smov (%p35_p1, %s33_s18), 0  ;;  %p225_p3 = pnand %p2096_p0, %p224_p2 }
   0x6   : > { %v2563_v0 = vld [vmem:[%s3081_s1] sm:$0xff] (!%p225_p3)   ;;  %v2699_v1 = vmov (!%p225_p3), 0   ;;  %s2097_s21 = sshll.u32 (!%p225_p3), %s2689_s15, 6  ;;  %v2564_v2 = vld [vmem:[%s3081_s1 + $0x8] sm:$0xff] (!%p225_p3)   ;;  %v2565_v3 = vld [vmem:[%s3081_s1 + $0x10] sm:$0xff] (!%p225_p3)  }
   0x7   : > { %228 = sbr.rel (%p225_p3) target bundleno = 415 (0x19f), region = 36  ;;  %953 = vmatprep.subr.bf16.mxu0 (!%p225_p3), %v2699_v1  ;;  %2506 = vmatprep.subr.bf16.mxu1 (!%p225_p3), %v2699_v1  ;;  %p274_p4 = scmp.lt.s32.totalorder (!%p225_p3), %s2097_s21, 255  ;;  %v2566_v4 = vld [vmem:[%s3081_s1 + $0x18] sm:$0xff] (!%p225_p3)   ;;  %v2567_v5 = vld [vmem:[%s3081_s1 + $0x20] sm:$0xff] (!%p225_p3)   ;;  %v2568_v7 = vld [vmem:[%s3081_s1 + $0x28] sm:$0xff] (!%p225_p3)  }
   0x8   : > { %954 = vmatpush1.bf16.msra.mxu0 (!%p225_p3), %v2563_v0  ;;  %2522 = vmatpush1.bf16.msra.mxu1 (!%p225_p3), %v2563_v0  ;;  %v2569_v9 = vld [vmem:[%s3081_s1 + $0x30] sm:$0xff] (!%p225_p3)   ;;  %v2570_v10 = vld [vmem:[%s3081_s1 + $0x38] sm:$0xff] (!%p225_p3)   ;;  %v2571_v11 = vld [vmem:[%s3081_s1 + $0x40] sm:$0xff] (!%p225_p3)  }
   0x9   : > { %955 = vmatprep.subr.bf16.mxu0 (!%p225_p3), %v2699_v1  ;;  %2507 = vmatprep.subr.bf16.mxu1 (!%p225_p3), %v2699_v1  ;;  %v2572_v12 = vld [vmem:[%s3081_s1 + $0x48] sm:$0xff] (!%p225_p3)   ;;  %v2573_v13 = vld [vmem:[%s3081_s1 + $0x50] sm:$0xff] (!%p225_p3)   ;;  %v2574_v14 = vld [vmem:[%s3081_s1 + $0x58] sm:$0xff] (!%p225_p3)  }
   0xa   : > { %v2575_v15 = vld [vmem:[%s3081_s1 + $0x60] sm:$0xff] (!%p225_p3)   ;;  %v2576_v16 = vld [vmem:[%s3081_s1 + $0x68] sm:$0xff] (!%p225_p3)   ;;  %v2577_v17 = vld [vmem:[%s3081_s1 + $0x70] sm:$0xff] (!%p225_p3)  }
   0xb   : > { %v2578_v18 = vld [vmem:[%s3081_s1 + $0x78] sm:$0xff] (!%p225_p3)  }
   0xc   : > { %956 = vmatpush1.bf16.msra.mxu0 (!%p225_p3), %v2564_v2  ;;  %2523 = vmatpush1.bf16.msra.mxu1 (!%p225_p3), %v2564_v2 }
   0xd   : > { %957 = vmatprep.subr.bf16.mxu0 (!%p225_p3), %v2699_v1  ;;  %2508 = vmatprep.subr.bf16.mxu1 (!%p225_p3), %v2699_v1 }
   0xe   : > { %s3090_s21 = smov (!%p274_p4, %s2097_s21), 255 }
   0xf   : > { %s2250_s28 = sshll.u32 %s3090_s21, 3 }
  0x10   : > { %958 = vmatpush1.bf16.msra.mxu0 %v2565_v3  ;;  %2524 = vmatpush1.bf16.msra.mxu1 %v2565_v3  ;;  %s2772_s7 = scalar_lea.vmem %s3080_s0, %s2250_s28 }
  0x11   : > { %959 = vmatprep.subr.bf16.mxu0 %v2699_v1  ;;  %2509 = vmatprep.subr.bf16.mxu1 %v2699_v1  ;;  %v2581_v6 = vld [vmem:[%s2772_s7 + $0x4] ss:$8 sps:$4 sm:$0xff]   ;;  %v2579_v19 = vld [vmem:[%s2772_s7] ss:$8 sps:$4 sm:$0xff]   ;;  %v2585_v21 = vld [vmem:[%s2772_s7 + $0x14] ss:$8 sps:$4 sm:$0xff]  }
  0x12   : > { %v2584_v8 = vld [vmem:[%s2772_s7 + $0x104] ss:$8 sps:$4 sm:$0xff]   ;;  %985 = vmatprep.mubr.bf16.mxu0 %v2581_v6  ;;  %v2582_v20 = vld [vmem:[%s2772_s7 + $0x100] ss:$8 sps:$4 sm:$0xff]   ;;  %v2587_v22 = vld [vmem:[%s2772_s7 + $0x114] ss:$8 sps:$4 sm:$0xff]  }
  0x13   : > { %1113 = vmatprep.mubr.bf16.mxu1 %v2584_v8  ;;  %v2589_v23 = vld [vmem:[%s2772_s7 + $0x10] ss:$8 sps:$4 sm:$0xff]   ;;  %v2591_v25 = vld [vmem:[%s2772_s7 + $0x24] ss:$8 sps:$4 sm:$0xff]   ;;  %v2595_v27 = vld [vmem:[%s2772_s7 + $0x20] ss:$8 sps:$4 sm:$0xff]  }
  0x14   : > { %960 = vmatpush1.bf16.msra.mxu0 %v2566_v4  ;;  %2525 = vmatpush1.bf16.msra.mxu1 %v2566_v4  ;;  %v2590_v24 = vld [vmem:[%s2772_s7 + $0x110] ss:$8 sps:$4 sm:$0xff]   ;;  %v2593_v26 = vld [vmem:[%s2772_s7 + $0x124] ss:$8 sps:$4 sm:$0xff]   ;;  %v2596_v28 = vld [vmem:[%s2772_s7 + $0x120] ss:$8 sps:$4 sm:$0xff]  }
  0x15   : > { %961 = vmatprep.subr.bf16.mxu0 %v2699_v1  ;;  %2510 = vmatprep.subr.bf16.mxu1 %v2699_v1  ;;  %v2597_v29 = vld [vmem:[%s2772_s7 + $0x34] ss:$8 sps:$4 sm:$0xff]   ;;  %v2601_v31 = vld [vmem:[%s2772_s7 + $0x30] ss:$8 sps:$4 sm:$0xff]   ;;  %v2603_v33 = vld [vmem:[%s2772_s7 + $0x44] ss:$8 sps:$4 sm:$0xff]  }
  0x16   : > { %v2599_v30 = vld [vmem:[%s2772_s7 + $0x134] ss:$8 sps:$4 sm:$0xff]   ;;  %v2602_v32 = vld [vmem:[%s2772_s7 + $0x130] ss:$8 sps:$4 sm:$0xff]   ;;  %v2605_v34 = vld [vmem:[%s2772_s7 + $0x144] ss:$8 sps:$4 sm:$0xff]  }
  0x17   : > { %v2607_v35 = vld [vmem:[%s2772_s7 + $0x40] ss:$8 sps:$4 sm:$0xff]   ;;  %v2609_v37 = vld [vmem:[%s2772_s7 + $0x54] ss:$8 sps:$4 sm:$0xff]   ;;  %v2613_v39 = vld [vmem:[%s2772_s7 + $0x50] ss:$8 sps:$4 sm:$0xff]  }
  0x18   : > { %962 = vmatpush1.bf16.msra.mxu0 %v2567_v5  ;;  %2526 = vmatpush1.bf16.msra.mxu1 %v2567_v5  ;;  %v2608_v36 = vld [vmem:[%s2772_s7 + $0x140] ss:$8 sps:$4 sm:$0xff]   ;;  %v2611_v38 = vld [vmem:[%s2772_s7 + $0x154] ss:$8 sps:$4 sm:$0xff]   ;;  %v2614_v40 = vld [vmem:[%s2772_s7 + $0x150] ss:$8 sps:$4 sm:$0xff]  }
  0x19   : > { %963 = vmatprep.subr.bf16.mxu0 %v2699_v1  ;;  %2511 = vmatprep.subr.bf16.mxu1 %v2699_v1  ;;  %v2615_v41 = vld [vmem:[%s2772_s7 + $0x64] ss:$8 sps:$4 sm:$0xff]   ;;  %v2619_v43 = vld [vmem:[%s2772_s7 + $0x60] ss:$8 sps:$4 sm:$0xff]   ;;  %v2621_v45 = vld [vmem:[%s2772_s7 + $0x74] ss:$8 sps:$4 sm:$0xff]  }
  0x1a   : > { %v2617_v42 = vld [vmem:[%s2772_s7 + $0x164] ss:$8 sps:$4 sm:$0xff]   ;;  %v2620_v44 = vld [vmem:[%s2772_s7 + $0x160] ss:$8 sps:$4 sm:$0xff]   ;;  %v2623_v46 = vld [vmem:[%s2772_s7 + $0x174] ss:$8 sps:$4 sm:$0xff]  }
  0x1b   : > { %v2625_v47 = vld [vmem:[%s2772_s7 + $0x70] ss:$8 sps:$4 sm:$0xff]   ;;  %v2627_v49 = vld [vmem:[%s2772_s7 + $0x84] ss:$8 sps:$4 sm:$0xff]   ;;  %v2631_v51 = vld [vmem:[%s2772_s7 + $0x80] ss:$8 sps:$4 sm:$0xff]  }
  0x1c   : > { %964 = vmatpush1.bf16.msra.mxu0 %v2568_v7  ;;  %2527 = vmatpush1.bf16.msra.mxu1 %v2568_v7  ;;  %v2626_v48 = vld [vmem:[%s2772_s7 + $0x170] ss:$8 sps:$4 sm:$0xff]   ;;  %v2629_v50 = vld [vmem:[%s2772_s7 + $0x184] ss:$8 sps:$4 sm:$0xff]   ;;  %v2632_v52 = vld [vmem:[%s2772_s7 + $0x180] ss:$8 sps:$4 sm:$0xff]  }
  0x1d   : > { %965 = vmatprep.subr.bf16.mxu0 %v2699_v1  ;;  %2512 = vmatprep.subr.bf16.mxu1 %v2699_v1  ;;  %v2633_v53 = vld [vmem:[%s2772_s7 + $0x94] ss:$8 sps:$4 sm:$0xff]   ;;  %v2637_v55 = vld [vmem:[%s2772_s7 + $0x90] ss:$8 sps:$4 sm:$0xff]   ;;  %v2639_v57 = vld [vmem:[%s2772_s7 + $0xa4] ss:$8 sps:$4 sm:$0xff]  }
  0x1e   : > { %v2635_v54 = vld [vmem:[%s2772_s7 + $0x194] ss:$8 sps:$4 sm:$0xff]   ;;  %v2638_v56 = vld [vmem:[%s2772_s7 + $0x190] ss:$8 sps:$4 sm:$0xff]   ;;  %v2641_v58 = vld [vmem:[%s2772_s7 + $0x1a4] ss:$8 sps:$4 sm:$0xff]  }
  0x1f   : > { %v2643_v59 = vld [vmem:[%s2772_s7 + $0xa0] ss:$8 sps:$4 sm:$0xff]   ;;  %v2645_v61 = vld [vmem:[%s2772_s7 + $0xb4] ss:$8 sps:$4 sm:$0xff]   ;;  %v2649_v63 = vld [vmem:[%s2772_s7 + $0xb0] ss:$8 sps:$4 sm:$0xff]  }
  0x20   : > { %966 = vmatpush1.bf16.msra.mxu0 %v2569_v9  ;;  %2528 = vmatpush1.bf16.msra.mxu1 %v2569_v9  ;;  %v2644_v60 = vld [vmem:[%s2772_s7 + $0x1a0] ss:$8 sps:$4 sm:$0xff]   ;;  %v2647_v62 = vld [vmem:[%s2772_s7 + $0x1b4] ss:$8 sps:$4 sm:$0xff]   ;;  %v2650_v0 = vld [vmem:[%s2772_s7 + $0x1b0] ss:$8 sps:$4 sm:$0xff]  }
  0x21   : > { %967 = vmatprep.subr.bf16.mxu0 %v2699_v1  ;;  %2513 = vmatprep.subr.bf16.mxu1 %v2699_v1  ;;  %v2653_v2 = vld [vmem:[%s2772_s7 + $0x1c4] ss:$8 sps:$4 sm:$0xff]   ;;  %v2655_v3 = vld [vmem:[%s2772_s7 + $0xc0] ss:$8 sps:$4 sm:$0xff]   ;;  %v2657_v5 = vld [vmem:[%s2772_s7 + $0xd4] ss:$8 sps:$4 sm:$0xff]  }
  0x22   : > { %v2656_v4 = vld [vmem:[%s2772_s7 + $0x1c0] ss:$8 sps:$4 sm:$0xff]   ;;  %v2659_v6 = vld [vmem:[%s2772_s7 + $0x1d4] ss:$8 sps:$4 sm:$0xff]   ;;  %v2661_v7 = vld [vmem:[%s2772_s7 + $0xd0] ss:$8 sps:$4 sm:$0xff]  }
  0x23   : > { %v2662_v8 = vld [vmem:[%s2772_s7 + $0x1d0] ss:$8 sps:$4 sm:$0xff]   ;;  %v2663_v9 = vld [vmem:[%s2772_s7 + $0xe4] ss:$8 sps:$4 sm:$0xff]  }
  0x24   : > { %968 = vmatpush1.bf16.msra.mxu0 %v2570_v10  ;;  %2529 = vmatpush1.bf16.msra.mxu1 %v2570_v10  ;;  %v2665_v10 = vld [vmem:[%s2772_s7 + $0x1e4] ss:$8 sps:$4 sm:$0xff]  }
  0x25   : > { %969 = vmatprep.subr.bf16.mxu0 %v2699_v1  ;;  %2514 = vmatprep.subr.bf16.mxu1 %v2699_v1 }
  0x28   : > { %970 = vmatpush1.bf16.msra.mxu0 %v2571_v11  ;;  %2530 = vmatpush1.bf16.msra.mxu1 %v2571_v11  ;;  %v2667_v11 = vld [vmem:[%s2772_s7 + $0xe0] ss:$8 sps:$4 sm:$0xff]  }
  0x29   : > { %971 = vmatprep.subr.bf16.mxu0 %v2699_v1  ;;  %2515 = vmatprep.subr.bf16.mxu1 %v2699_v1 }
  0x2c   : > { %972 = vmatpush1.bf16.msra.mxu0 %v2572_v12  ;;  %2531 = vmatpush1.bf16.msra.mxu1 %v2572_v12  ;;  %v2668_v12 = vld [vmem:[%s2772_s7 + $0x1e0] ss:$8 sps:$4 sm:$0xff]  }
  0x2d   : > { %973 = vmatprep.subr.bf16.mxu0 %v2699_v1  ;;  %2516 = vmatprep.subr.bf16.mxu1 %v2699_v1 }
  0x30   : > { %974 = vmatpush1.bf16.msra.mxu0 %v2573_v13  ;;  %2532 = vmatpush1.bf16.msra.mxu1 %v2573_v13  ;;  %v2669_v13 = vld [vmem:[%s2772_s7 + $0xf4] ss:$8 sps:$4 sm:$0xff]  }
  0x31   : > { %975 = vmatprep.subr.bf16.mxu0 %v2699_v1  ;;  %2517 = vmatprep.subr.bf16.mxu1 %v2699_v1 }
  0x34   : > { %976 = vmatpush1.bf16.msra.mxu0 %v2574_v14  ;;  %2533 = vmatpush1.bf16.msra.mxu1 %v2574_v14  ;;  %v2671_v14 = vld [vmem:[%s2772_s7 + $0x1f4] ss:$8 sps:$4 sm:$0xff]  }
  0x35   : > { %977 = vmatprep.subr.bf16.mxu0 %v2699_v1  ;;  %2518 = vmatprep.subr.bf16.mxu1 %v2699_v1 }
  0x38   : > { %978 = vmatpush1.bf16.msra.mxu0 %v2575_v15  ;;  %2534 = vmatpush1.bf16.msra.mxu1 %v2575_v15  ;;  %v2673_v15 = vld [vmem:[%s2772_s7 + $0xf0] ss:$8 sps:$4 sm:$0xff]  }
  0x39   : > { %979 = vmatprep.subr.bf16.mxu0 %v2699_v1  ;;  %2519 = vmatprep.subr.bf16.mxu1 %v2699_v1 }
  0x3c   : > { %980 = vmatpush1.bf16.msra.mxu0 %v2576_v16  ;;  %2535 = vmatpush1.bf16.msra.mxu1 %v2576_v16  ;;  %v2674_v16 = vld [vmem:[%s2772_s7 + $0x1f0] ss:$8 sps:$4 sm:$0xff]  }
  0x3d   : > { %981 = vmatprep.subr.bf16.mxu0 %v2699_v1  ;;  %2520 = vmatprep.subr.bf16.mxu1 %v2699_v1 }
  0x40   : > { %982 = vmatpush1.bf16.msra.mxu0 %v2577_v17  ;;  %2536 = vmatpush1.bf16.msra.mxu1 %v2577_v17  ;;  %v2898_v17 = vld [vmem:[%s3082_s2] ss:$0 sm:$0xff] }
  0x41   : > { %983 = vmatprep.subr.bf16.mxu0 %v2699_v1  ;;  %2521 = vmatprep.subr.bf16.mxu1 %v2699_v1  ;;  %v2651_v1 = vld [vmem:[%s2772_s7 + $0xc4] ss:$8 sps:$4 sm:$0xff]   ;;  %s2101_s7 = sshll.u32 %s3090_s21, 2 }
  0x42   : > { %s2917_s15 = scalar_lea.vmem %s3084_s4, %s2101_s7 }
  0x44   : > { %984 = vmatpush1.bf16.msra.mxu0 %v2578_v18  ;;  %2537 = vmatpush1.bf16.msra.mxu1 %v2578_v18 }
  0x47   : > { %986 = vmatmul.mubr.bf16.vlgmr.msra.gmra.mrb[0].mxu0 %v2579_v19  ;;  %1114 = vmatmul.mubr.bf16.vlgmr.msra.gmra.mrb[0].mxu1 %v2582_v20  ;;  %v2903_v19 = vld [vmem:[%s3083_s3] ss:$0 sm:$0xff] }
  0x48   : > { %993 = vmatprep.mubr.bf16.mxu0 %v2585_v21  ;;  %1121 = vmatprep.mubr.bf16.mxu1 %v2587_v22 }
  0x4f   : > { %994 = vmatmul.mubr.bf16.gmra.mrb[4].mxu0 %v2589_v23  ;;  %1122 = vmatmul.mubr.bf16.gmra.mrb[4].mxu1 %v2590_v24 }
  0x50   : > { %1001 = vmatprep.mubr.bf16.mxu0 %v2591_v25  ;;  %1129 = vmatprep.mubr.bf16.mxu1 %v2593_v26 }
  0x57   : > { %1002 = vmatmul.mubr.bf16.gmra.mrb[8].mxu0 %v2595_v27  ;;  %1130 = vmatmul.mubr.bf16.gmra.mrb[8].mxu1 %v2596_v28 }
  0x58   : > { %1009 = vmatprep.mubr.bf16.mxu0 %v2597_v29  ;;  %1137 = vmatprep.mubr.bf16.mxu1 %v2599_v30 }
  0x5f   : > { %1010 = vmatmul.mubr.bf16.gmra.mrb[12].mxu0 %v2601_v31  ;;  %1138 = vmatmul.mubr.bf16.gmra.mrb[12].mxu1 %v2602_v32 }
  0x60   : > { %1017 = vmatprep.mubr.bf16.mxu0 %v2603_v33  ;;  %1145 = vmatprep.mubr.bf16.mxu1 %v2605_v34 }
  0x67   : > { %1018 = vmatmul.mubr.bf16.gmra.mrb[16].mxu0 %v2607_v35  ;;  %1146 = vmatmul.mubr.bf16.gmra.mrb[16].mxu1 %v2608_v36 }
  0x68   : > { %1025 = vmatprep.mubr.bf16.mxu0 %v2609_v37  ;;  %1153 = vmatprep.mubr.bf16.mxu1 %v2611_v38 }
  0x6f   : > { %1026 = vmatmul.mubr.bf16.gmra.mrb[20].mxu0 %v2613_v39  ;;  %1154 = vmatmul.mubr.bf16.gmra.mrb[20].mxu1 %v2614_v40 }
  0x70   : > { %1033 = vmatprep.mubr.bf16.mxu0 %v2615_v41  ;;  %1161 = vmatprep.mubr.bf16.mxu1 %v2617_v42 }
  0x77   : > { %1034 = vmatmul.mubr.bf16.gmra.mrb[24].mxu0 %v2619_v43  ;;  %1162 = vmatmul.mubr.bf16.gmra.mrb[24].mxu1 %v2620_v44 }
  0x78   : > { %1041 = vmatprep.mubr.bf16.mxu0 %v2621_v45  ;;  %1169 = vmatprep.mubr.bf16.mxu1 %v2623_v46 }
  0x7f   : > { %1042 = vmatmul.mubr.bf16.gmra.mrb[28].mxu0 %v2625_v47  ;;  %1170 = vmatmul.mubr.bf16.gmra.mrb[28].mxu1 %v2626_v48 }
  0x80   : > { %1049 = vmatprep.mubr.bf16.mxu0 %v2627_v49  ;;  %1177 = vmatprep.mubr.bf16.mxu1 %v2629_v50 }
  0x87   : > { %1050 = vmatmul.mubr.bf16.gmra.mrb[32].mxu0 %v2631_v51  ;;  %1178 = vmatmul.mubr.bf16.gmra.mrb[32].mxu1 %v2632_v52 }
  0x88   : > { %1057 = vmatprep.mubr.bf16.mxu0 %v2633_v53  ;;  %1185 = vmatprep.mubr.bf16.mxu1 %v2635_v54 }
  0x8f   : > { %1058 = vmatmul.mubr.bf16.gmra.mrb[36].mxu0 %v2637_v55  ;;  %1186 = vmatmul.mubr.bf16.gmra.mrb[36].mxu1 %v2638_v56 }
  0x90   : > { %1065 = vmatprep.mubr.bf16.mxu0 %v2639_v57  ;;  %1193 = vmatprep.mubr.bf16.mxu1 %v2641_v58 }
  0x97   : > { %1066 = vmatmul.mubr.bf16.gmra.mrb[40].mxu0 %v2643_v59  ;;  %1194 = vmatmul.mubr.bf16.gmra.mrb[40].mxu1 %v2644_v60 }
  0x98   : > { %1073 = vmatprep.mubr.bf16.mxu0 %v2645_v61  ;;  %1201 = vmatprep.mubr.bf16.mxu1 %v2647_v62 }
  0x9f   : > { %1074 = vmatmul.mubr.bf16.gmra.mrb[44].mxu0 %v2649_v63  ;;  %1202 = vmatmul.mubr.bf16.gmra.mrb[44].mxu1 %v2650_v0 }
  0xa0   : > { %1081 = vmatprep.mubr.bf16.mxu0 %v2651_v1  ;;  %1209 = vmatprep.mubr.bf16.mxu1 %v2653_v2 }
  0xa7   : > { %1082 = vmatmul.mubr.bf16.gmra.mrb[48].mxu0 %v2655_v3  ;;  %1210 = vmatmul.mubr.bf16.gmra.mrb[48].mxu1 %v2656_v4 }
  0xa8   : > { %1089 = vmatprep.mubr.bf16.mxu0 %v2657_v5  ;;  %1217 = vmatprep.mubr.bf16.mxu1 %v2659_v6 }
  0xaf   : > { %1090 = vmatmul.mubr.bf16.gmra.mrb[52].mxu0 %v2661_v7  ;;  %1218 = vmatmul.mubr.bf16.gmra.mrb[52].mxu1 %v2662_v8 }
  0xb0   : > { %1097 = vmatprep.mubr.bf16.mxu0 %v2663_v9  ;;  %1225 = vmatprep.mubr.bf16.mxu1 %v2665_v10 }
  0xb7   : > { %1098 = vmatmul.mubr.bf16.gmra.mrb[56].mxu0 %v2667_v11  ;;  %1226 = vmatmul.mubr.bf16.gmra.mrb[56].mxu1 %v2668_v12 }
  0xb8   : > { %1105 = vmatprep.mubr.bf16.mxu0 %v2669_v13  ;;  %1233 = vmatprep.mubr.bf16.mxu1 %v2671_v14 }
  0xbf   : > { %1106 = vmatmul.mubr.bf16.gmra.mrb[60].mxu0 %v2673_v15  ;;  %1234 = vmatmul.mubr.bf16.gmra.mrb[60].mxu1 %v2674_v16 }
 0x11a   : > { %v987_v18 = vpop.f32.mrb[0].mxu0  ;;  %v1115_v20 = vpop.f32.mrb[0].mxu1 }
 0x11b   : > { %v1444_v21 = vmul.f32 %v2898_v17, %v987_v18  ;;  %v1476_v22 = vmul.f32 %v2898_v17, %v1115_v20  ;;  %v989_v23 = vpop.f32.mrb[1].mxu0  ;;  %v1117_v24 = vpop.f32.mrb[1].mxu1 }
 0x11c   : > { %v990_v25 = vpop.f32.mrb[2].mxu0  ;;  %v1118_v26 = vpop.f32.mrb[2].mxu1 }
 0x11d   : > { %v1515_v27 = vadd.f32 %v2903_v19, %v1444_v21  ;;  %v1547_v28 = vadd.f32 %v2903_v19, %v1476_v22  ;;  %v1445_v29 = vmul.f32 %v2898_v17, %v990_v25  ;;  %v1477_v30 = vmul.f32 %v2898_v17, %v1118_v26  ;;  %v992_v31 = vpop.f32.mrb[3].mxu0  ;;  %v1120_v32 = vpop.f32.mrb[3].mxu1 }
 0x11f   : > { %v1516_v33 = vadd.f32 %v2903_v19, %v1445_v29  ;;  %v1548_v34 = vadd.f32 %v2903_v19, %v1477_v30  ;;  %v1579_v35 = vmax.f32 %v1515_v27, 0.0  ;;  %v1611_v36 = vmax.f32 %v1547_v28, 0.0 }
 0x121   : > { %v1580_v37 = vmax.f32 %v1516_v33, 0.0  ;;  %v1612_v38 = vmax.f32 %v1548_v34, 0.0 }
 0x122   : > { %v995_v39 = vpop.f32.mrb[4].mxu0  ;;  %v1123_v40 = vpop.f32.mrb[4].mxu1 }
 0x123   : > { %v2318_v41 = vpack.c.bf16 %v1580_v37, %v1579_v35  ;;  %v2398_v42 = vpack.c.bf16 %v1612_v38, %v1611_v36  ;;  %v1446_v43 = vmul.f32 %v2898_v17, %v995_v39  ;;  %v1478_v44 = vmul.f32 %v2898_v17, %v1123_v40  ;;  %v997_v45 = vpop.f32.mrb[5].mxu0  ;;  %v1125_v46 = vpop.f32.mrb[5].mxu1 }
 0x124   : > { %v998_v47 = vpop.f32.mrb[6].mxu0  ;;  %v1126_v48 = vpop.f32.mrb[6].mxu1 }
 0x125   : > { %2319 = vst [vmem:[%s2917_s15] sm:$0xff] %v2318_v41   ;;  %2490 = vst [vmem:[%s2917_s15 + $0x80] sm:$0xff] %v2398_v42   ;;  %v1517_v49 = vadd.f32 %v2903_v19, %v1446_v43  ;;  %v1549_v50 = vadd.f32 %v2903_v19, %v1478_v44  ;;  %v1447_v51 = vmul.f32 %v2898_v17, %v998_v47  ;;  %v1000_v53 = vpop.f32.mrb[7].mxu0  ;;  %v1128_v54 = vpop.f32.mrb[7].mxu1 }
 0x126   : > { %v1479_v52 = vmul.f32 %v2898_v17, %v1126_v48 }
 0x127   : > { %v1518_v55 = vadd.f32 %v2903_v19, %v1447_v51  ;;  %v1581_v57 = vmax.f32 %v1517_v49, 0.0  ;;  %v1613_v58 = vmax.f32 %v1549_v50, 0.0 }
 0x128   : > { %v1550_v56 = vadd.f32 %v2903_v19, %v1479_v52 }
 0x129   : > { %v1582_v59 = vmax.f32 %v1518_v55, 0.0 }
 0x12a   : > { %v1614_v60 = vmax.f32 %v1550_v56, 0.0  ;;  %v1003_v61 = vpop.f32.mrb[8].mxu0  ;;  %v1131_v62 = vpop.f32.mrb[8].mxu1 }
 0x12b   : > { %v2323_v63 = vpack.c.bf16 %v1582_v59, %v1581_v57  ;;  %v1448_v1 = vmul.f32 %v2898_v17, %v1003_v61  ;;  %v1480_v2 = vmul.f32 %v2898_v17, %v1131_v62  ;;  %v1005_v3 = vpop.f32.mrb[9].mxu0  ;;  %v1133_v4 = vpop.f32.mrb[9].mxu1 }
 0x12c   : > { %v2403_v0 = vpack.c.bf16 %v1614_v60, %v1613_v58  ;;  %v1006_v5 = vpop.f32.mrb[10].mxu0  ;;  %v1134_v6 = vpop.f32.mrb[10].mxu1 }
 0x12d   : > { %2475 = vst [vmem:[%s2917_s15 + $0x8] sm:$0xff] %v2323_v63   ;;  %v1519_v7 = vadd.f32 %v2903_v19, %v1448_v1  ;;  %v1551_v8 = vadd.f32 %v2903_v19, %v1480_v2  ;;  %v1449_v9 = vmul.f32 %v2898_v17, %v1006_v5  ;;  %v1481_v10 = vmul.f32 %v2898_v17, %v1134_v6  ;;  %v1008_v11 = vpop.f32.mrb[11].mxu0  ;;  %v1136_v12 = vpop.f32.mrb[11].mxu1 }
 0x12e   : > { %2491 = vst [vmem:[%s2917_s15 + $0x88] sm:$0xff] %v2403_v0  }
 0x12f   : > { %v1520_v13 = vadd.f32 %v2903_v19, %v1449_v9  ;;  %v1552_v14 = vadd.f32 %v2903_v19, %v1481_v10  ;;  %v1583_v15 = vmax.f32 %v1519_v7, 0.0  ;;  %v1615_v16 = vmax.f32 %v1551_v8, 0.0 }
 0x131   : > { %v1584_v18 = vmax.f32 %v1520_v13, 0.0  ;;  %v1616_v20 = vmax.f32 %v1552_v14, 0.0 }
 0x132   : > { %v1011_v21 = vpop.f32.mrb[12].mxu0  ;;  %v1139_v22 = vpop.f32.mrb[12].mxu1 }
 0x133   : > { %v2328_v23 = vpack.c.bf16 %v1584_v18, %v1583_v15  ;;  %v2408_v24 = vpack.c.bf16 %v1616_v20, %v1615_v16  ;;  %v1450_v25 = vmul.f32 %v2898_v17, %v1011_v21  ;;  %v1482_v26 = vmul.f32 %v2898_v17, %v1139_v22  ;;  %v1013_v27 = vpop.f32.mrb[13].mxu0  ;;  %v1141_v28 = vpop.f32.mrb[13].mxu1 }
 0x134   : > { %v1014_v29 = vpop.f32.mrb[14].mxu0  ;;  %v1142_v30 = vpop.f32.mrb[14].mxu1 }
 0x135   : > { %2476 = vst [vmem:[%s2917_s15 + $0x10] sm:$0xff] %v2328_v23   ;;  %2492 = vst [vmem:[%s2917_s15 + $0x90] sm:$0xff] %v2408_v24   ;;  %v1521_v31 = vadd.f32 %v2903_v19, %v1450_v25  ;;  %v1553_v32 = vadd.f32 %v2903_v19, %v1482_v26  ;;  %v1451_v33 = vmul.f32 %v2898_v17, %v1014_v29  ;;  %v1016_v35 = vpop.f32.mrb[15].mxu0  ;;  %v1144_v36 = vpop.f32.mrb[15].mxu1 }
 0x136   : > { %v1483_v34 = vmul.f32 %v2898_v17, %v1142_v30 }
 0x137   : > { %v1522_v37 = vadd.f32 %v2903_v19, %v1451_v33  ;;  %v1585_v39 = vmax.f32 %v1521_v31, 0.0  ;;  %v1617_v40 = vmax.f32 %v1553_v32, 0.0 }
 0x138   : > { %v1554_v38 = vadd.f32 %v2903_v19, %v1483_v34 }
 0x139   : > { %v1586_v41 = vmax.f32 %v1522_v37, 0.0 }
 0x13a   : > { %v1618_v42 = vmax.f32 %v1554_v38, 0.0  ;;  %v1019_v43 = vpop.f32.mrb[16].mxu0  ;;  %v1147_v44 = vpop.f32.mrb[16].mxu1 }
 0x13b   : > { %v2333_v45 = vpack.c.bf16 %v1586_v41, %v1585_v39  ;;  %v1452_v47 = vmul.f32 %v2898_v17, %v1019_v43  ;;  %v1484_v48 = vmul.f32 %v2898_v17, %v1147_v44  ;;  %v1021_v49 = vpop.f32.mrb[17].mxu0  ;;  %v1149_v50 = vpop.f32.mrb[17].mxu1 }
 0x13c   : > { %v2413_v46 = vpack.c.bf16 %v1618_v42, %v1617_v40  ;;  %v1022_v51 = vpop.f32.mrb[18].mxu0  ;;  %v1150_v52 = vpop.f32.mrb[18].mxu1 }
 0x13d   : > { %2477 = vst [vmem:[%s2917_s15 + $0x18] sm:$0xff] %v2333_v45   ;;  %v1523_v53 = vadd.f32 %v2903_v19, %v1452_v47  ;;  %v1555_v54 = vadd.f32 %v2903_v19, %v1484_v48  ;;  %v1453_v55 = vmul.f32 %v2898_v17, %v1022_v51  ;;  %v1485_v56 = vmul.f32 %v2898_v17, %v1150_v52  ;;  %v1024_v57 = vpop.f32.mrb[19].mxu0  ;;  %v1152_v58 = vpop.f32.mrb[19].mxu1 }
 0x13e   : > { %2493 = vst [vmem:[%s2917_s15 + $0x98] sm:$0xff] %v2413_v46  }
 0x13f   : > { %v1524_v59 = vadd.f32 %v2903_v19, %v1453_v55  ;;  %v1556_v60 = vadd.f32 %v2903_v19, %v1485_v56  ;;  %v1587_v61 = vmax.f32 %v1523_v53, 0.0  ;;  %v1619_v62 = vmax.f32 %v1555_v54, 0.0 }
 0x141   : > { %v1588_v63 = vmax.f32 %v1524_v59, 0.0  ;;  %v1620_v0 = vmax.f32 %v1556_v60, 0.0 }
 0x142   : > { %v1027_v1 = vpop.f32.mrb[20].mxu0  ;;  %v1155_v2 = vpop.f32.mrb[20].mxu1 }
 0x143   : > { %v2338_v3 = vpack.c.bf16 %v1588_v63, %v1587_v61  ;;  %v2418_v4 = vpack.c.bf16 %v1620_v0, %v1619_v62  ;;  %v1454_v5 = vmul.f32 %v2898_v17, %v1027_v1  ;;  %v1486_v6 = vmul.f32 %v2898_v17, %v1155_v2  ;;  %v1029_v7 = vpop.f32.mrb[21].mxu0  ;;  %v1157_v8 = vpop.f32.mrb[21].mxu1 }
 0x144   : > { %v1030_v9 = vpop.f32.mrb[22].mxu0  ;;  %v1158_v10 = vpop.f32.mrb[22].mxu1 }
 0x145   : > { %2478 = vst [vmem:[%s2917_s15 + $0x20] sm:$0xff] %v2338_v3   ;;  %2494 = vst [vmem:[%s2917_s15 + $0xa0] sm:$0xff] %v2418_v4   ;;  %v1525_v11 = vadd.f32 %v2903_v19, %v1454_v5  ;;  %v1557_v12 = vadd.f32 %v2903_v19, %v1486_v6  ;;  %v1455_v13 = vmul.f32 %v2898_v17, %v1030_v9  ;;  %v1032_v15 = vpop.f32.mrb[23].mxu0  ;;  %v1160_v16 = vpop.f32.mrb[23].mxu1 }
 0x146   : > { %v1487_v14 = vmul.f32 %v2898_v17, %v1158_v10 }
 0x147   : > { %v1526_v18 = vadd.f32 %v2903_v19, %v1455_v13  ;;  %v1589_v21 = vmax.f32 %v1525_v11, 0.0  ;;  %v1621_v22 = vmax.f32 %v1557_v12, 0.0 }
 0x148   : > { %v1558_v20 = vadd.f32 %v2903_v19, %v1487_v14 }
 0x149   : > { %v1590_v23 = vmax.f32 %v1526_v18, 0.0 }
 0x14a   : > { %v1622_v24 = vmax.f32 %v1558_v20, 0.0  ;;  %v1035_v25 = vpop.f32.mrb[24].mxu0  ;;  %v1163_v26 = vpop.f32.mrb[24].mxu1 }
 0x14b   : > { %v2343_v27 = vpack.c.bf16 %v1590_v23, %v1589_v21  ;;  %v1456_v29 = vmul.f32 %v2898_v17, %v1035_v25  ;;  %v1488_v30 = vmul.f32 %v2898_v17, %v1163_v26  ;;  %v1037_v31 = vpop.f32.mrb[25].mxu0  ;;  %v1165_v32 = vpop.f32.mrb[25].mxu1 }
 0x14c   : > { %v2423_v28 = vpack.c.bf16 %v1622_v24, %v1621_v22  ;;  %v1038_v33 = vpop.f32.mrb[26].mxu0  ;;  %v1166_v34 = vpop.f32.mrb[26].mxu1 }
 0x14d   : > { %2479 = vst [vmem:[%s2917_s15 + $0x28] sm:$0xff] %v2343_v27   ;;  %v1527_v35 = vadd.f32 %v2903_v19, %v1456_v29  ;;  %v1559_v36 = vadd.f32 %v2903_v19, %v1488_v30  ;;  %v1457_v37 = vmul.f32 %v2898_v17, %v1038_v33  ;;  %v1489_v38 = vmul.f32 %v2898_v17, %v1166_v34  ;;  %v1040_v39 = vpop.f32.mrb[27].mxu0  ;;  %v1168_v40 = vpop.f32.mrb[27].mxu1 }
 0x14e   : > { %2495 = vst [vmem:[%s2917_s15 + $0xa8] sm:$0xff] %v2423_v28  }
 0x14f   : > { %v1528_v41 = vadd.f32 %v2903_v19, %v1457_v37  ;;  %v1560_v42 = vadd.f32 %v2903_v19, %v1489_v38  ;;  %v1591_v43 = vmax.f32 %v1527_v35, 0.0  ;;  %v1623_v44 = vmax.f32 %v1559_v36, 0.0 }
 0x151   : > { %v1592_v45 = vmax.f32 %v1528_v41, 0.0  ;;  %v1624_v46 = vmax.f32 %v1560_v42, 0.0 }
 0x152   : > { %v1043_v47 = vpop.f32.mrb[28].mxu0  ;;  %v1171_v48 = vpop.f32.mrb[28].mxu1 }
 0x153   : > { %v2348_v49 = vpack.c.bf16 %v1592_v45, %v1591_v43  ;;  %v2428_v50 = vpack.c.bf16 %v1624_v46, %v1623_v44  ;;  %v1458_v51 = vmul.f32 %v2898_v17, %v1043_v47  ;;  %v1490_v52 = vmul.f32 %v2898_v17, %v1171_v48  ;;  %v1045_v53 = vpop.f32.mrb[29].mxu0  ;;  %v1173_v54 = vpop.f32.mrb[29].mxu1 }
 0x154   : > { %v1046_v55 = vpop.f32.mrb[30].mxu0  ;;  %v1174_v56 = vpop.f32.mrb[30].mxu1 }
 0x155   : > { %2480 = vst [vmem:[%s2917_s15 + $0x30] sm:$0xff] %v2348_v49   ;;  %2496 = vst [vmem:[%s2917_s15 + $0xb0] sm:$0xff] %v2428_v50   ;;  %v1529_v57 = vadd.f32 %v2903_v19, %v1458_v51  ;;  %v1561_v58 = vadd.f32 %v2903_v19, %v1490_v52  ;;  %v1459_v59 = vmul.f32 %v2898_v17, %v1046_v55  ;;  %v1048_v61 = vpop.f32.mrb[31].mxu0  ;;  %v1176_v62 = vpop.f32.mrb[31].mxu1 }
 0x156   : > { %v1491_v60 = vmul.f32 %v2898_v17, %v1174_v56 }
 0x157   : > { %v1530_v63 = vadd.f32 %v2903_v19, %v1459_v59  ;;  %v1593_v1 = vmax.f32 %v1529_v57, 0.0  ;;  %v1625_v2 = vmax.f32 %v1561_v58, 0.0 }
 0x158   : > { %v1562_v0 = vadd.f32 %v2903_v19, %v1491_v60 }
 0x159   : > { %v1594_v3 = vmax.f32 %v1530_v63, 0.0 }
 0x15a   : > { %v1626_v4 = vmax.f32 %v1562_v0, 0.0  ;;  %v1051_v5 = vpop.f32.mrb[32].mxu0  ;;  %v1179_v6 = vpop.f32.mrb[32].mxu1 }
 0x15b   : > { %v2353_v7 = vpack.c.bf16 %v1594_v3, %v1593_v1  ;;  %v1460_v9 = vmul.f32 %v2898_v17, %v1051_v5  ;;  %v1492_v10 = vmul.f32 %v2898_v17, %v1179_v6  ;;  %v1053_v11 = vpop.f32.mrb[33].mxu0  ;;  %v1181_v12 = vpop.f32.mrb[33].mxu1 }
 0x15c   : > { %v2433_v8 = vpack.c.bf16 %v1626_v4, %v1625_v2  ;;  %v1054_v13 = vpop.f32.mrb[34].mxu0  ;;  %v1182_v14 = vpop.f32.mrb[34].mxu1 }
 0x15d   : > { %2481 = vst [vmem:[%s2917_s15 + $0x38] sm:$0xff] %v2353_v7   ;;  %v1531_v15 = vadd.f32 %v2903_v19, %v1460_v9  ;;  %v1563_v16 = vadd.f32 %v2903_v19, %v1492_v10  ;;  %v1461_v18 = vmul.f32 %v2898_v17, %v1054_v13  ;;  %v1493_v20 = vmul.f32 %v2898_v17, %v1182_v14  ;;  %v1056_v21 = vpop.f32.mrb[35].mxu0  ;;  %v1184_v22 = vpop.f32.mrb[35].mxu1 }
 0x15e   : > { %2497 = vst [vmem:[%s2917_s15 + $0xb8] sm:$0xff] %v2433_v8  }
 0x15f   : > { %v1532_v23 = vadd.f32 %v2903_v19, %v1461_v18  ;;  %v1564_v24 = vadd.f32 %v2903_v19, %v1493_v20  ;;  %v1595_v25 = vmax.f32 %v1531_v15, 0.0  ;;  %v1627_v26 = vmax.f32 %v1563_v16, 0.0 }
 0x161   : > { %v1596_v27 = vmax.f32 %v1532_v23, 0.0  ;;  %v1628_v28 = vmax.f32 %v1564_v24, 0.0 }
 0x162   : > { %v1059_v29 = vpop.f32.mrb[36].mxu0  ;;  %v1187_v30 = vpop.f32.mrb[36].mxu1 }
 0x163   : > { %v2358_v31 = vpack.c.bf16 %v1596_v27, %v1595_v25  ;;  %v2438_v32 = vpack.c.bf16 %v1628_v28, %v1627_v26  ;;  %v1462_v33 = vmul.f32 %v2898_v17, %v1059_v29  ;;  %v1494_v34 = vmul.f32 %v2898_v17, %v1187_v30  ;;  %v1061_v35 = vpop.f32.mrb[37].mxu0  ;;  %v1189_v36 = vpop.f32.mrb[37].mxu1 }
 0x164   : > { %v1062_v37 = vpop.f32.mrb[38].mxu0  ;;  %v1190_v38 = vpop.f32.mrb[38].mxu1 }
 0x165   : > { %2482 = vst [vmem:[%s2917_s15 + $0x40] sm:$0xff] %v2358_v31   ;;  %2498 = vst [vmem:[%s2917_s15 + $0xc0] sm:$0xff] %v2438_v32   ;;  %v1533_v39 = vadd.f32 %v2903_v19, %v1462_v33  ;;  %v1565_v40 = vadd.f32 %v2903_v19, %v1494_v34  ;;  %v1463_v41 = vmul.f32 %v2898_v17, %v1062_v37  ;;  %v1064_v43 = vpop.f32.mrb[39].mxu0  ;;  %v1192_v44 = vpop.f32.mrb[39].mxu1 }
 0x166   : > { %v1495_v42 = vmul.f32 %v2898_v17, %v1190_v38 }
 0x167   : > { %v1534_v45 = vadd.f32 %v2903_v19, %v1463_v41  ;;  %v1597_v47 = vmax.f32 %v1533_v39, 0.0  ;;  %v1629_v48 = vmax.f32 %v1565_v40, 0.0 }
 0x168   : > { %v1566_v46 = vadd.f32 %v2903_v19, %v1495_v42 }
 0x169   : > { %v1598_v49 = vmax.f32 %v1534_v45, 0.0 }
 0x16a   : > { %v1630_v50 = vmax.f32 %v1566_v46, 0.0  ;;  %v1067_v51 = vpop.f32.mrb[40].mxu0  ;;  %v1195_v52 = vpop.f32.mrb[40].mxu1 }
 0x16b   : > { %v2363_v53 = vpack.c.bf16 %v1598_v49, %v1597_v47  ;;  %v1464_v55 = vmul.f32 %v2898_v17, %v1067_v51  ;;  %v1496_v56 = vmul.f32 %v2898_v17, %v1195_v52  ;;  %v1069_v57 = vpop.f32.mrb[41].mxu0  ;;  %v1197_v58 = vpop.f32.mrb[41].mxu1 }
 0x16c   : > { %v2443_v54 = vpack.c.bf16 %v1630_v50, %v1629_v48  ;;  %v1070_v59 = vpop.f32.mrb[42].mxu0  ;;  %v1198_v60 = vpop.f32.mrb[42].mxu1 }
 0x16d   : > { %2483 = vst [vmem:[%s2917_s15 + $0x48] sm:$0xff] %v2363_v53   ;;  %v1535_v61 = vadd.f32 %v2903_v19, %v1464_v55  ;;  %v1567_v62 = vadd.f32 %v2903_v19, %v1496_v56  ;;  %v1465_v63 = vmul.f32 %v2898_v17, %v1070_v59  ;;  %v1497_v0 = vmul.f32 %v2898_v17, %v1198_v60  ;;  %v1072_v1 = vpop.f32.mrb[43].mxu0  ;;  %v1200_v2 = vpop.f32.mrb[43].mxu1 }
 0x16e   : > { %2499 = vst [vmem:[%s2917_s15 + $0xc8] sm:$0xff] %v2443_v54  }
 0x16f   : > { %v1536_v3 = vadd.f32 %v2903_v19, %v1465_v63  ;;  %v1568_v4 = vadd.f32 %v2903_v19, %v1497_v0  ;;  %v1599_v5 = vmax.f32 %v1535_v61, 0.0  ;;  %v1631_v6 = vmax.f32 %v1567_v62, 0.0 }
 0x171   : > { %v1600_v7 = vmax.f32 %v1536_v3, 0.0  ;;  %v1632_v8 = vmax.f32 %v1568_v4, 0.0 }
 0x172   : > { %v1075_v9 = vpop.f32.mrb[44].mxu0  ;;  %v1203_v10 = vpop.f32.mrb[44].mxu1 }
 0x173   : > { %v2368_v11 = vpack.c.bf16 %v1600_v7, %v1599_v5  ;;  %v2448_v12 = vpack.c.bf16 %v1632_v8, %v1631_v6  ;;  %v1466_v13 = vmul.f32 %v2898_v17, %v1075_v9  ;;  %v1498_v14 = vmul.f32 %v2898_v17, %v1203_v10  ;;  %v1077_v15 = vpop.f32.mrb[45].mxu0  ;;  %v1205_v16 = vpop.f32.mrb[45].mxu1 }
 0x174   : > { %v1078_v18 = vpop.f32.mrb[46].mxu0  ;;  %v1206_v20 = vpop.f32.mrb[46].mxu1 }
 0x175   : > { %2484 = vst [vmem:[%s2917_s15 + $0x50] sm:$0xff] %v2368_v11   ;;  %2500 = vst [vmem:[%s2917_s15 + $0xd0] sm:$0xff] %v2448_v12   ;;  %v1537_v21 = vadd.f32 %v2903_v19, %v1466_v13  ;;  %v1569_v22 = vadd.f32 %v2903_v19, %v1498_v14  ;;  %v1467_v23 = vmul.f32 %v2898_v17, %v1078_v18  ;;  %v1080_v25 = vpop.f32.mrb[47].mxu0  ;;  %v1208_v26 = vpop.f32.mrb[47].mxu1 }
 0x176   : > { %v1499_v24 = vmul.f32 %v2898_v17, %v1206_v20 }
 0x177   : > { %v1538_v27 = vadd.f32 %v2903_v19, %v1467_v23  ;;  %v1601_v29 = vmax.f32 %v1537_v21, 0.0  ;;  %v1633_v30 = vmax.f32 %v1569_v22, 0.0 }
 0x178   : > { %v1570_v28 = vadd.f32 %v2903_v19, %v1499_v24 }
 0x179   : > { %v1602_v31 = vmax.f32 %v1538_v27, 0.0 }
 0x17a   : > { %v1634_v32 = vmax.f32 %v1570_v28, 0.0  ;;  %v1083_v33 = vpop.f32.mrb[48].mxu0  ;;  %v1211_v34 = vpop.f32.mrb[48].mxu1 }
 0x17b   : > { %v2373_v35 = vpack.c.bf16 %v1602_v31, %v1601_v29  ;;  %v1468_v37 = vmul.f32 %v2898_v17, %v1083_v33  ;;  %v1500_v38 = vmul.f32 %v2898_v17, %v1211_v34  ;;  %v1085_v39 = vpop.f32.mrb[49].mxu0  ;;  %v1213_v40 = vpop.f32.mrb[49].mxu1 }
 0x17c   : > { %v2453_v36 = vpack.c.bf16 %v1634_v32, %v1633_v30  ;;  %v1086_v41 = vpop.f32.mrb[50].mxu0  ;;  %v1214_v42 = vpop.f32.mrb[50].mxu1 }
 0x17d   : > { %2485 = vst [vmem:[%s2917_s15 + $0x58] sm:$0xff] %v2373_v35   ;;  %v1539_v43 = vadd.f32 %v2903_v19, %v1468_v37  ;;  %v1571_v44 = vadd.f32 %v2903_v19, %v1500_v38  ;;  %v1469_v45 = vmul.f32 %v2898_v17, %v1086_v41  ;;  %v1501_v46 = vmul.f32 %v2898_v17, %v1214_v42  ;;  %v1088_v47 = vpop.f32.mrb[51].mxu0  ;;  %v1216_v48 = vpop.f32.mrb[51].mxu1 }
 0x17e   : > { %2501 = vst [vmem:[%s2917_s15 + $0xd8] sm:$0xff] %v2453_v36  }
 0x17f   : > { %v1540_v49 = vadd.f32 %v2903_v19, %v1469_v45  ;;  %v1572_v50 = vadd.f32 %v2903_v19, %v1501_v46  ;;  %v1603_v51 = vmax.f32 %v1539_v43, 0.0  ;;  %v1635_v52 = vmax.f32 %v1571_v44, 0.0 }
 0x181   : > { %v1604_v53 = vmax.f32 %v1540_v49, 0.0  ;;  %v1636_v54 = vmax.f32 %v1572_v50, 0.0 }
 0x182   : > { %v1091_v55 = vpop.f32.mrb[52].mxu0  ;;  %v1219_v56 = vpop.f32.mrb[52].mxu1 }
 0x183   : > { %v2378_v57 = vpack.c.bf16 %v1604_v53, %v1603_v51  ;;  %v2458_v58 = vpack.c.bf16 %v1636_v54, %v1635_v52  ;;  %v1470_v59 = vmul.f32 %v2898_v17, %v1091_v55  ;;  %v1502_v60 = vmul.f32 %v2898_v17, %v1219_v56  ;;  %v1093_v61 = vpop.f32.mrb[53].mxu0  ;;  %v1221_v62 = vpop.f32.mrb[53].mxu1 }
 0x184   : > { %v1094_v63 = vpop.f32.mrb[54].mxu0  ;;  %v1222_v0 = vpop.f32.mrb[54].mxu1 }
 0x185   : > { %2486 = vst [vmem:[%s2917_s15 + $0x60] sm:$0xff] %v2378_v57   ;;  %2502 = vst [vmem:[%s2917_s15 + $0xe0] sm:$0xff] %v2458_v58   ;;  %v1541_v1 = vadd.f32 %v2903_v19, %v1470_v59  ;;  %v1573_v2 = vadd.f32 %v2903_v19, %v1502_v60  ;;  %v1471_v3 = vmul.f32 %v2898_v17, %v1094_v63  ;;  %v1096_v5 = vpop.f32.mrb[55].mxu0  ;;  %v1224_v6 = vpop.f32.mrb[55].mxu1 }
 0x186   : > { %v1503_v4 = vmul.f32 %v2898_v17, %v1222_v0 }
 0x187   : > { %v1542_v7 = vadd.f32 %v2903_v19, %v1471_v3  ;;  %v1605_v9 = vmax.f32 %v1541_v1, 0.0  ;;  %v1637_v10 = vmax.f32 %v1573_v2, 0.0 }
 0x188   : > { %v1574_v8 = vadd.f32 %v2903_v19, %v1503_v4 }
 0x189   : > { %v1606_v11 = vmax.f32 %v1542_v7, 0.0 }
 0x18a   : > { %v1638_v12 = vmax.f32 %v1574_v8, 0.0  ;;  %v1099_v13 = vpop.f32.mrb[56].mxu0  ;;  %v1227_v14 = vpop.f32.mrb[56].mxu1 }
 0x18b   : > { %v2383_v15 = vpack.c.bf16 %v1606_v11, %v1605_v9  ;;  %v1472_v18 = vmul.f32 %v2898_v17, %v1099_v13  ;;  %v1504_v20 = vmul.f32 %v2898_v17, %v1227_v14  ;;  %v1101_v21 = vpop.f32.mrb[57].mxu0  ;;  %v1229_v22 = vpop.f32.mrb[57].mxu1 }
 0x18c   : > { %v2463_v16 = vpack.c.bf16 %v1638_v12, %v1637_v10  ;;  %v1102_v23 = vpop.f32.mrb[58].mxu0  ;;  %v1230_v24 = vpop.f32.mrb[58].mxu1 }
 0x18d   : > { %2487 = vst [vmem:[%s2917_s15 + $0x68] sm:$0xff] %v2383_v15   ;;  %v1543_v25 = vadd.f32 %v2903_v19, %v1472_v18  ;;  %v1575_v26 = vadd.f32 %v2903_v19, %v1504_v20  ;;  %v1473_v27 = vmul.f32 %v2898_v17, %v1102_v23  ;;  %v1505_v28 = vmul.f32 %v2898_v17, %v1230_v24  ;;  %v1104_v29 = vpop.f32.mrb[59].mxu0  ;;  %v1232_v30 = vpop.f32.mrb[59].mxu1 }
 0x18e   : > { %2503 = vst [vmem:[%s2917_s15 + $0xe8] sm:$0xff] %v2463_v16  }
 0x18f   : > { %v1544_v31 = vadd.f32 %v2903_v19, %v1473_v27  ;;  %v1576_v32 = vadd.f32 %v2903_v19, %v1505_v28  ;;  %v1607_v33 = vmax.f32 %v1543_v25, 0.0  ;;  %v1639_v34 = vmax.f32 %v1575_v26, 0.0 }
 0x191   : > { %v1608_v35 = vmax.f32 %v1544_v31, 0.0  ;;  %v1640_v36 = vmax.f32 %v1576_v32, 0.0 }
 0x192   : > { %v1107_v37 = vpop.f32.mrb[60].mxu0  ;;  %v1235_v38 = vpop.f32.mrb[60].mxu1 }
 0x193   : > { %v2388_v39 = vpack.c.bf16 %v1608_v35, %v1607_v33  ;;  %v2468_v40 = vpack.c.bf16 %v1640_v36, %v1639_v34  ;;  %v1474_v41 = vmul.f32 %v2898_v17, %v1107_v37  ;;  %v1506_v42 = vmul.f32 %v2898_v17, %v1235_v38  ;;  %v1109_v43 = vpop.f32.mrb[61].mxu0  ;;  %v1237_v44 = vpop.f32.mrb[61].mxu1 }
 0x194   : > { %v1110_v45 = vpop.f32.mrb[62].mxu0  ;;  %v1238_v46 = vpop.f32.mrb[62].mxu1 }
 0x195   : > { %2488 = vst [vmem:[%s2917_s15 + $0x70] sm:$0xff] %v2388_v39   ;;  %2504 = vst [vmem:[%s2917_s15 + $0xf0] sm:$0xff] %v2468_v40   ;;  %v1545_v47 = vadd.f32 %v2903_v19, %v1474_v41  ;;  %v1577_v48 = vadd.f32 %v2903_v19, %v1506_v42  ;;  %v1475_v49 = vmul.f32 %v2898_v17, %v1110_v45  ;;  %v1112_v51 = vpop.f32.mrb[63].mxu0  ;;  %v1240_v52 = vpop.f32.mrb[63].mxu1 }
 0x196   : > { %v1507_v50 = vmul.f32 %v2898_v17, %v1238_v46 }
 0x197   : > { %v1546_v53 = vadd.f32 %v2903_v19, %v1475_v49  ;;  %v1609_v55 = vmax.f32 %v1545_v47, 0.0  ;;  %v1641_v56 = vmax.f32 %v1577_v48, 0.0 }
 0x198   : > { %v1578_v54 = vadd.f32 %v2903_v19, %v1507_v50 }
 0x199   : > { %v1610_v57 = vmax.f32 %v1546_v53, 0.0 }
 0x19a   : > { %v1642_v58 = vmax.f32 %v1578_v54, 0.0 }
 0x19b   : > { %v2393_v59 = vpack.c.bf16 %v1610_v57, %v1609_v55 }
 0x19c   : > { %v2473_v60 = vpack.c.bf16 %v1642_v58, %v1641_v56 }
 0x19d   : > { %2489 = vst [vmem:[%s2917_s15 + $0x78] sm:$0xff] %v2393_v59  }
 0x19e   : > { %2505 = vst [vmem:[%s2917_s15 + $0xf8] sm:$0xff] %v2473_v60  }
 0x19f PF: > { %s14_s17 = sadd.s32 1, %s2697_s17   ;;  %s3085_s15 = smov %s2693_s16 }
 0x1a0   : > { %p11_p5 = scmp.ge.s32.totalorder %s14_s17, 6   ;;  %s3086_s16 = smov %s3088_s18 }
 0x1a2   :  { %13 = sbr.rel (!%p11_p5) target bundleno = 2 (0x2), region = 83 }

// kernel: pspnet_forward.13
= control target key start
LH: loop header
LB: loop body
LE: loop exit
PB: predicated region body
PF: predicated region fallthrough
CT: control target
= control target key end

     0   :  { %s1598_s15 = smov 0   ;;  %s1600_s16 = smov 0   ;;  %s1772_s0 = inlined_call_operand.vmem [shape: bf16[512,128], index: 0, kind: input, shape index: {}]   ;;  %s1773_s1 = inlined_call_operand.vmem [shape: bf16[128,128], index: 1, kind: input, shape index: {}]   ;;  %s1774_s2 = inlined_call_operand.vmem [shape: f32[1,128], index: 2, kind: input, shape index: {}]   ;;  %s1775_s3 = inlined_call_operand.vmem [shape: f32[1,128], index: 3, kind: input, shape index: {}]   ;;  %s1776_s4 = inlined_call_operand.vmem [shape: bf16[512,128], index: 4, kind: output, shape index: {}]  }
   0x1   :  { %s1602_s17 = smov 0  }
   0x2 LB: > { %s33_s18 = sadd.s32 1, %s1567_s16  ;;  %p1221_p0 = scmp.ge.s32.totalorder %s1571_s17, 1  ;;  %s1571_s17 = sphi %s1602_s17, %s14_s17   ;;  %s1567_s16 = sphi %s1600_s16, %s1778_s16   ;;  %s1563_s15 = sphi %s1598_s15, %s1777_s15  }
   0x3   : > { %p35_p1 = scmp.ge.s32.totalorder %s33_s18, 2  ;;  %p221_p2 = scmp.lt.s32.totalorder %s1571_s17, 3 }
   0x5   : > { %s1780_s18 = smov (%p35_p1, %s33_s18), 0  ;;  %p222_p3 = pnand %p1221_p0, %p221_p2 }
   0x6   : > { %v1525_v0 = vld [vmem:[%s1773_s1] sm:$0xff] (!%p222_p3)   ;;  %s1222_s21 = sshll.u32 (!%p222_p3), %s1563_s15, 5  ;;  %v1526_v1 = vld [vmem:[%s1773_s1 + $0x8] sm:$0xff] (!%p222_p3)   ;;  %v1527_v2 = vld [vmem:[%s1773_s1 + $0x10] sm:$0xff] (!%p222_p3)  }
   0x7   : > { %225 = sbr.rel (%p222_p3) target bundleno = 288 (0x120), region = 36  ;;  %p268_p4 = scmp.lt.s32.totalorder (!%p222_p3), %s1222_s21, 63  ;;  %1437 = vmatprep.subr.bf16.mxu0 (!%p222_p3), %v1525_v0  ;;  %1485 = vmatprep.subr.bf16.mxu1 (!%p222_p3), %v1525_v0  ;;  %v1528_v3 = vld [vmem:[%s1773_s1 + $0x18] sm:$0xff] (!%p222_p3)   ;;  %v1529_v6 = vld [vmem:[%s1773_s1 + $0x20] sm:$0xff] (!%p222_p3)   ;;  %v1530_v7 = vld [vmem:[%s1773_s1 + $0x28] sm:$0xff] (!%p222_p3)  }
   0x8   : > { %1438 = vmatpush3.bf16.msra.mxu0 (!%p222_p3), %v1525_v0  ;;  %1493 = vmatpush3.bf16.msra.mxu1 (!%p222_p3), %v1525_v0  ;;  %v1531_v8 = vld [vmem:[%s1773_s1 + $0x30] sm:$0xff] (!%p222_p3)   ;;  %v1532_v9 = vld [vmem:[%s1773_s1 + $0x38] sm:$0xff] (!%p222_p3)   ;;  %v1669_v24 = vld [vmem:[%s1774_s2] ss:$0 sm:$0xff] (!%p222_p3) }
   0x9   : > { %1439 = vmatprep.subr.bf16.mxu0 (!%p222_p3), %v1526_v1  ;;  %1486 = vmatprep.subr.bf16.mxu1 (!%p222_p3), %v1526_v1  ;;  %v1674_v26 = vld [vmem:[%s1775_s3] ss:$0 sm:$0xff] (!%p222_p3) }
   0xc   : > { %1440 = vmatpush3.bf16.msra.mxu0 (!%p222_p3), %v1526_v1  ;;  %1494 = vmatpush3.bf16.msra.mxu1 (!%p222_p3), %v1526_v1 }
   0xd   : > { %1441 = vmatprep.subr.bf16.mxu0 (!%p222_p3), %v1527_v2  ;;  %1487 = vmatprep.subr.bf16.mxu1 (!%p222_p3), %v1527_v2 }
   0xe   : > { %s1782_s21 = smov (!%p268_p4, %s1222_s21), 63 }
   0xf   : > { %s1223_s26 = sshll.u32 %s1782_s21, 2 }
  0x10   : > { %s1633_s29 = scalar_lea.vmem %s1772_s0, %s1223_s26  ;;  %1442 = vmatpush3.bf16.msra.mxu0 %v1527_v2  ;;  %1495 = vmatpush3.bf16.msra.mxu1 %v1527_v2  ;;  %s1697_s24 = scalar_lea.vmem %s1776_s4, %s1223_s26 }
  0x11   : > { %v1533_v4 = vld [vmem:[%s1633_s29] sm:$0xff]   ;;  %1443 = vmatprep.subr.bf16.mxu0 %v1528_v3  ;;  %1488 = vmatprep.subr.bf16.mxu1 %v1528_v3  ;;  %v1535_v10 = vld [vmem:[%s1633_s29 + $0x8] sm:$0xff]   ;;  %v1537_v12 = vld [vmem:[%s1633_s29 + $0x10] sm:$0xff]  }
  0x12   : > { %v1534_v5 = vld [vmem:[%s1633_s29 + $0x40] sm:$0xff]   ;;  %1453 = vmatprep.mubr.bf16.mxu0 %v1533_v4  ;;  %v1536_v11 = vld [vmem:[%s1633_s29 + $0x48] sm:$0xff]   ;;  %v1538_v13 = vld [vmem:[%s1633_s29 + $0x50] sm:$0xff]  }
  0x13   : > { %1469 = vmatprep.mubr.bf16.mxu1 %v1534_v5  ;;  %v1539_v14 = vld [vmem:[%s1633_s29 + $0x18] sm:$0xff]   ;;  %v1541_v16 = vld [vmem:[%s1633_s29 + $0x20] sm:$0xff]   ;;  %v1543_v18 = vld [vmem:[%s1633_s29 + $0x28] sm:$0xff]  }
  0x14   : > { %1444 = vmatpush3.bf16.msra.mxu0 %v1528_v3  ;;  %1496 = vmatpush3.bf16.msra.mxu1 %v1528_v3  ;;  %v1540_v15 = vld [vmem:[%s1633_s29 + $0x58] sm:$0xff]   ;;  %v1542_v17 = vld [vmem:[%s1633_s29 + $0x60] sm:$0xff]   ;;  %v1544_v19 = vld [vmem:[%s1633_s29 + $0x68] sm:$0xff]  }
  0x15   : > { %1445 = vmatprep.subr.bf16.mxu0 %v1529_v6  ;;  %1489 = vmatprep.subr.bf16.mxu1 %v1529_v6  ;;  %v1545_v20 = vld [vmem:[%s1633_s29 + $0x30] sm:$0xff]   ;;  %v1547_v22 = vld [vmem:[%s1633_s29 + $0x38] sm:$0xff]  }
  0x16   : > { %v1546_v21 = vld [vmem:[%s1633_s29 + $0x70] sm:$0xff]   ;;  %v1548_v23 = vld [vmem:[%s1633_s29 + $0x78] sm:$0xff]  }
  0x18   : > { %1446 = vmatpush3.bf16.msra.mxu0 %v1529_v6  ;;  %1497 = vmatpush3.bf16.msra.mxu1 %v1529_v6 }
  0x19   : > { %1447 = vmatprep.subr.bf16.mxu0 %v1530_v7  ;;  %1490 = vmatprep.subr.bf16.mxu1 %v1530_v7 }
  0x1c   : > { %1448 = vmatpush3.bf16.msra.mxu0 %v1530_v7  ;;  %1498 = vmatpush3.bf16.msra.mxu1 %v1530_v7 }
  0x1d   : > { %1449 = vmatprep.subr.bf16.mxu0 %v1531_v8  ;;  %1491 = vmatprep.subr.bf16.mxu1 %v1531_v8 }
  0x20   : > { %1450 = vmatpush3.bf16.msra.mxu0 %v1531_v8  ;;  %1499 = vmatpush3.bf16.msra.mxu1 %v1531_v8 }
  0x21   : > { %1451 = vmatprep.subr.bf16.mxu0 %v1532_v9  ;;  %1492 = vmatprep.subr.bf16.mxu1 %v1532_v9 }
  0x24   : > { %1452 = vmatpush3.bf16.msra.mxu0 %v1532_v9  ;;  %1500 = vmatpush3.bf16.msra.mxu1 %v1532_v9 }
  0x27   : > { %1454 = vmatmul.mubr.bf16.vlgmr.msra.gmra.mrb[0].mxu0 %v1535_v10  ;;  %1470 = vmatmul.mubr.bf16.vlgmr.msra.gmra.mrb[0].mxu1 %v1536_v11 }
  0x28   : > { %1457 = vmatprep.mubr.bf16.mxu0 %v1537_v12  ;;  %1473 = vmatprep.mubr.bf16.mxu1 %v1538_v13 }
  0x2f   : > { %1458 = vmatmul.mubr.bf16.gmra.mrb[4].mxu0 %v1539_v14  ;;  %1474 = vmatmul.mubr.bf16.gmra.mrb[4].mxu1 %v1540_v15 }
  0x30   : > { %1461 = vmatprep.mubr.bf16.mxu0 %v1541_v16  ;;  %1477 = vmatprep.mubr.bf16.mxu1 %v1542_v17 }
  0x37   : > { %1462 = vmatmul.mubr.bf16.gmra.mrb[8].mxu0 %v1543_v18  ;;  %1478 = vmatmul.mubr.bf16.gmra.mrb[8].mxu1 %v1544_v19 }
  0x38   : > { %1465 = vmatprep.mubr.bf16.mxu0 %v1545_v20  ;;  %1481 = vmatprep.mubr.bf16.mxu1 %v1546_v21 }
  0x3f   : > { %1466 = vmatmul.mubr.bf16.gmra.mrb[12].mxu0 %v1547_v22  ;;  %1482 = vmatmul.mubr.bf16.gmra.mrb[12].mxu1 %v1548_v23 }
  0xfa   : > { %v1455_v25 = vpop.f32.mrb[0].mxu0  ;;  %v1471_v27 = vpop.f32.mrb[0].mxu1 }
  0xfb   : > { %v830_v28 = vmul.f32 %v1455_v25, %v1669_v24  ;;  %v846_v29 = vmul.f32 %v1471_v27, %v1669_v24  ;;  %v595_v30 = vpop.f32.mrb[1].mxu0  ;;  %v659_v31 = vpop.f32.mrb[1].mxu1 }
  0xfc   : > { %v828_v32 = vmul.f32 %v1669_v24, %v595_v30  ;;  %v844_v33 = vmul.f32 %v1669_v24, %v659_v31  ;;  %v1456_v34 = vpop.f32.mrb[2].mxu0  ;;  %v1472_v35 = vpop.f32.mrb[2].mxu1 }
  0xfd   : > { %v869_v36 = vadd.f32 %v1674_v26, %v830_v28  ;;  %v885_v37 = vadd.f32 %v1674_v26, %v846_v29  ;;  %v831_v38 = vmul.f32 %v1456_v34, %v1669_v24  ;;  %v847_v39 = vmul.f32 %v1472_v35, %v1669_v24  ;;  %v598_v40 = vpop.f32.mrb[3].mxu0  ;;  %v662_v41 = vpop.f32.mrb[3].mxu1 }
  0xfe   : > { %v867_v42 = vadd.f32 %v1674_v26, %v828_v32  ;;  %v883_v43 = vadd.f32 %v1674_v26, %v844_v33  ;;  %v829_v44 = vmul.f32 %v1669_v24, %v598_v40  ;;  %v845_v45 = vmul.f32 %v1669_v24, %v662_v41 }
  0xff   : > { %v870_v46 = vadd.f32 %v1674_v26, %v831_v38  ;;  %v886_v47 = vadd.f32 %v1674_v26, %v847_v39  ;;  %v901_v50 = vmax.f32 %v869_v36, 0.0  ;;  %v917_v51 = vmax.f32 %v885_v37, 0.0 }
 0x100   : > { %v868_v48 = vadd.f32 %v1674_v26, %v829_v44  ;;  %v884_v49 = vadd.f32 %v1674_v26, %v845_v45  ;;  %v899_v54 = vmax.f32 %v867_v42, 0.0  ;;  %v915_v55 = vmax.f32 %v883_v43, 0.0 }
 0x101   : > { %v902_v52 = vmax.f32 %v870_v46, 0.0  ;;  %v918_v53 = vmax.f32 %v886_v47, 0.0 }
 0x102   : > { %v900_v56 = vmax.f32 %v868_v48, 0.0  ;;  %v916_v57 = vmax.f32 %v884_v49, 0.0  ;;  %v1459_v58 = vpop.f32.mrb[4].mxu0  ;;  %v1475_v59 = vpop.f32.mrb[4].mxu1 }
 0x103   : > { %v1326_v60 = vpack.c.bf16 %v902_v52, %v901_v50  ;;  %v1366_v61 = vpack.c.bf16 %v918_v53, %v917_v51  ;;  %v834_v62 = vmul.f32 %v1459_v58, %v1669_v24  ;;  %v850_v63 = vmul.f32 %v1475_v59, %v1669_v24  ;;  %v611_v0 = vpop.f32.mrb[5].mxu0  ;;  %v675_v1 = vpop.f32.mrb[5].mxu1 }
 0x104   : > { %v1321_v2 = vpack.c.bf16 %v900_v56, %v899_v54  ;;  %v1361_v3 = vpack.c.bf16 %v916_v57, %v915_v55  ;;  %v832_v4 = vmul.f32 %v1669_v24, %v611_v0  ;;  %v848_v5 = vmul.f32 %v1669_v24, %v675_v1  ;;  %v1460_v6 = vpop.f32.mrb[6].mxu0  ;;  %v1476_v7 = vpop.f32.mrb[6].mxu1 }
 0x105   : > { %1398 = vst [vmem:[%s1697_s24 + $0x8] sm:$0xff] %v1326_v60   ;;  %1406 = vst [vmem:[%s1697_s24 + $0x48] sm:$0xff] %v1366_v61   ;;  %v873_v8 = vadd.f32 %v1674_v26, %v834_v62  ;;  %v889_v9 = vadd.f32 %v1674_v26, %v850_v63  ;;  %v835_v10 = vmul.f32 %v1460_v6, %v1669_v24  ;;  %v614_v12 = vpop.f32.mrb[7].mxu0  ;;  %v678_v13 = vpop.f32.mrb[7].mxu1 }
 0x106   : > { %v851_v11 = vmul.f32 %v1476_v7, %v1669_v24  ;;  %1322 = vst [vmem:[%s1697_s24] sm:$0xff] %v1321_v2   ;;  %1405 = vst [vmem:[%s1697_s24 + $0x40] sm:$0xff] %v1361_v3   ;;  %v871_v14 = vadd.f32 %v1674_v26, %v832_v4  ;;  %v887_v15 = vadd.f32 %v1674_v26, %v848_v5 }
 0x107   : > { %v833_v16 = vmul.f32 %v1669_v24, %v614_v12  ;;  %v849_v17 = vmul.f32 %v1669_v24, %v678_v13  ;;  %v874_v18 = vadd.f32 %v1674_v26, %v835_v10  ;;  %v905_v22 = vmax.f32 %v873_v8, 0.0 }
 0x108   : > { %v890_v19 = vadd.f32 %v1674_v26, %v851_v11  ;;  %v921_v23 = vmax.f32 %v889_v9, 0.0  ;;  %v903_v28 = vmax.f32 %v871_v14, 0.0  ;;  %v919_v29 = vmax.f32 %v887_v15, 0.0 }
 0x109   : > { %v872_v20 = vadd.f32 %v1674_v26, %v833_v16  ;;  %v888_v21 = vadd.f32 %v1674_v26, %v849_v17  ;;  %v906_v25 = vmax.f32 %v874_v18, 0.0 }
 0x10a   : > { %v922_v27 = vmax.f32 %v890_v19, 0.0  ;;  %v1463_v32 = vpop.f32.mrb[8].mxu0  ;;  %v1479_v33 = vpop.f32.mrb[8].mxu1 }
 0x10b   : > { %v904_v30 = vmax.f32 %v872_v20, 0.0  ;;  %v920_v31 = vmax.f32 %v888_v21, 0.0  ;;  %v1336_v34 = vpack.c.bf16 %v906_v25, %v905_v22  ;;  %v838_v36 = vmul.f32 %v1463_v32, %v1669_v24  ;;  %v627_v38 = vpop.f32.mrb[9].mxu0  ;;  %v691_v39 = vpop.f32.mrb[9].mxu1 }
 0x10c   : > { %v1376_v35 = vpack.c.bf16 %v922_v27, %v921_v23  ;;  %v854_v37 = vmul.f32 %v1479_v33, %v1669_v24  ;;  %v836_v42 = vmul.f32 %v1669_v24, %v627_v38  ;;  %v852_v43 = vmul.f32 %v1669_v24, %v691_v39  ;;  %v1464_v44 = vpop.f32.mrb[10].mxu0  ;;  %v1480_v45 = vpop.f32.mrb[10].mxu1 }
 0x10d   : > { %v1331_v40 = vpack.c.bf16 %v904_v30, %v903_v28  ;;  %v1371_v41 = vpack.c.bf16 %v920_v31, %v919_v29  ;;  %1400 = vst [vmem:[%s1697_s24 + $0x18] sm:$0xff] %v1336_v34   ;;  %v877_v46 = vadd.f32 %v1674_v26, %v838_v36  ;;  %v839_v48 = vmul.f32 %v1464_v44, %v1669_v24  ;;  %v630_v50 = vpop.f32.mrb[11].mxu0  ;;  %v694_v51 = vpop.f32.mrb[11].mxu1 }
 0x10e   : > { %1408 = vst [vmem:[%s1697_s24 + $0x58] sm:$0xff] %v1376_v35   ;;  %v893_v47 = vadd.f32 %v1674_v26, %v854_v37  ;;  %v855_v49 = vmul.f32 %v1480_v45, %v1669_v24  ;;  %v875_v52 = vadd.f32 %v1674_v26, %v836_v42  ;;  %v891_v53 = vadd.f32 %v1674_v26, %v852_v43 }
 0x10f   : > { %1399 = vst [vmem:[%s1697_s24 + $0x10] sm:$0xff] %v1331_v40   ;;  %1407 = vst [vmem:[%s1697_s24 + $0x50] sm:$0xff] %v1371_v41   ;;  %v837_v54 = vmul.f32 %v1669_v24, %v630_v50  ;;  %v853_v55 = vmul.f32 %v1669_v24, %v694_v51  ;;  %v878_v56 = vadd.f32 %v1674_v26, %v839_v48  ;;  %v909_v60 = vmax.f32 %v877_v46, 0.0 }
 0x110   : > { %v894_v57 = vadd.f32 %v1674_v26, %v855_v49  ;;  %v925_v61 = vmax.f32 %v893_v47, 0.0  ;;  %v907_v0 = vmax.f32 %v875_v52, 0.0  ;;  %v923_v1 = vmax.f32 %v891_v53, 0.0 }
 0x111   : > { %v876_v58 = vadd.f32 %v1674_v26, %v837_v54  ;;  %v892_v59 = vadd.f32 %v1674_v26, %v853_v55  ;;  %v910_v62 = vmax.f32 %v878_v56, 0.0 }
 0x112   : > { %v926_v63 = vmax.f32 %v894_v57, 0.0  ;;  %v1467_v4 = vpop.f32.mrb[12].mxu0  ;;  %v1483_v5 = vpop.f32.mrb[12].mxu1 }
 0x113   : > { %v908_v2 = vmax.f32 %v876_v58, 0.0  ;;  %v924_v3 = vmax.f32 %v892_v59, 0.0  ;;  %v1346_v6 = vpack.c.bf16 %v910_v62, %v909_v60  ;;  %v842_v8 = vmul.f32 %v1467_v4, %v1669_v24  ;;  %v643_v10 = vpop.f32.mrb[13].mxu0  ;;  %v707_v11 = vpop.f32.mrb[13].mxu1 }
 0x114   : > { %v1386_v7 = vpack.c.bf16 %v926_v63, %v925_v61  ;;  %v858_v9 = vmul.f32 %v1483_v5, %v1669_v24  ;;  %v840_v14 = vmul.f32 %v1669_v24, %v643_v10  ;;  %v856_v15 = vmul.f32 %v1669_v24, %v707_v11  ;;  %v1468_v16 = vpop.f32.mrb[14].mxu0  ;;  %v1484_v17 = vpop.f32.mrb[14].mxu1 }
 0x115   : > { %v1341_v12 = vpack.c.bf16 %v908_v2, %v907_v0  ;;  %v1381_v13 = vpack.c.bf16 %v924_v3, %v923_v1  ;;  %1402 = vst [vmem:[%s1697_s24 + $0x28] sm:$0xff] %v1346_v6   ;;  %v881_v18 = vadd.f32 %v1674_v26, %v842_v8  ;;  %v843_v20 = vmul.f32 %v1468_v16, %v1669_v24  ;;  %v646_v22 = vpop.f32.mrb[15].mxu0  ;;  %v710_v23 = vpop.f32.mrb[15].mxu1 }
 0x116   : > { %1410 = vst [vmem:[%s1697_s24 + $0x68] sm:$0xff] %v1386_v7   ;;  %v897_v19 = vadd.f32 %v1674_v26, %v858_v9  ;;  %v859_v21 = vmul.f32 %v1484_v17, %v1669_v24  ;;  %v879_v25 = vadd.f32 %v1674_v26, %v840_v14  ;;  %v895_v27 = vadd.f32 %v1674_v26, %v856_v15 }
 0x117   : > { %1401 = vst [vmem:[%s1697_s24 + $0x20] sm:$0xff] %v1341_v12   ;;  %1409 = vst [vmem:[%s1697_s24 + $0x60] sm:$0xff] %v1381_v13   ;;  %v841_v28 = vmul.f32 %v1669_v24, %v646_v22  ;;  %v857_v29 = vmul.f32 %v1669_v24, %v710_v23  ;;  %v882_v30 = vadd.f32 %v1674_v26, %v843_v20  ;;  %v913_v34 = vmax.f32 %v881_v18, 0.0 }
 0x118   : > { %v898_v31 = vadd.f32 %v1674_v26, %v859_v21  ;;  %v929_v35 = vmax.f32 %v897_v19, 0.0  ;;  %v911_v38 = vmax.f32 %v879_v25, 0.0  ;;  %v927_v39 = vmax.f32 %v895_v27, 0.0 }
 0x119   : > { %v880_v32 = vadd.f32 %v1674_v26, %v841_v28  ;;  %v896_v33 = vadd.f32 %v1674_v26, %v857_v29  ;;  %v914_v36 = vmax.f32 %v882_v30, 0.0 }
 0x11a   : > { %v930_v37 = vmax.f32 %v898_v31, 0.0 }
 0x11b   : > { %v912_v40 = vmax.f32 %v880_v32, 0.0  ;;  %v928_v24 = vmax.f32 %v896_v33, 0.0  ;;  %v1356_v41 = vpack.c.bf16 %v914_v36, %v913_v34 }
 0x11c   : > { %v1396_v42 = vpack.c.bf16 %v930_v37, %v929_v35 }
 0x11d   : > { %v1351_v43 = vpack.c.bf16 %v912_v40, %v911_v38  ;;  %v1391_v44 = vpack.c.bf16 %v928_v24, %v927_v39  ;;  %1404 = vst [vmem:[%s1697_s24 + $0x38] sm:$0xff] %v1356_v41  }
 0x11e   : > { %1412 = vst [vmem:[%s1697_s24 + $0x78] sm:$0xff] %v1396_v42  }
 0x11f   : > { %1403 = vst [vmem:[%s1697_s24 + $0x30] sm:$0xff] %v1351_v43   ;;  %1411 = vst [vmem:[%s1697_s24 + $0x70] sm:$0xff] %v1391_v44  }
 0x120 PF: > { %s14_s17 = sadd.s32 1, %s1571_s17   ;;  %s1777_s15 = smov %s1567_s16 }
 0x121   : > { %p11_p5 = scmp.ge.s32.totalorder %s14_s17, 4   ;;  %s1778_s16 = smov %s1780_s18 }
 0x123   :  { %13 = sbr.rel (!%p11_p5) target bundleno = 2 (0x2), region = 83 }

// kernel: pspnet_forward.14
= control target key start
LH: loop header
LB: loop body
LE: loop exit
PB: predicated region body
PF: predicated region fallthrough
CT: control target
= control target key end

     0   :  { %s1598_s15 = smov 0   ;;  %s1600_s16 = smov 0   ;;  %s1772_s0 = inlined_call_operand.vmem [shape: bf16[512,128], index: 0, kind: input, shape index: {}]   ;;  %s1773_s1 = inlined_call_operand.vmem [shape: bf16[128,128], index: 1, kind: input, shape index: {}]   ;;  %s1774_s2 = inlined_call_operand.vmem [shape: f32[1,128], index: 2, kind: input, shape index: {}]   ;;  %s1775_s3 = inlined_call_operand.vmem [shape: f32[1,128], index: 3, kind: input, shape index: {}]   ;;  %s1776_s4 = inlined_call_operand.vmem [shape: bf16[512,128], index: 4, kind: output, shape index: {}]  }
   0x1   :  { %s1602_s17 = smov 0  }
   0x2 LB: > { %s33_s18 = sadd.s32 1, %s1567_s16  ;;  %p1221_p0 = scmp.ge.s32.totalorder %s1571_s17, 1  ;;  %s1571_s17 = sphi %s1602_s17, %s14_s17   ;;  %s1567_s16 = sphi %s1600_s16, %s1778_s16   ;;  %s1563_s15 = sphi %s1598_s15, %s1777_s15  }
   0x3   : > { %p35_p1 = scmp.ge.s32.totalorder %s33_s18, 2  ;;  %p221_p2 = scmp.lt.s32.totalorder %s1571_s17, 3 }
   0x5   : > { %s1780_s18 = smov (%p35_p1, %s33_s18), 0  ;;  %p222_p3 = pnand %p1221_p0, %p221_p2 }
   0x6   : > { %v1525_v0 = vld [vmem:[%s1773_s1] sm:$0xff] (!%p222_p3)   ;;  %s1222_s21 = sshll.u32 (!%p222_p3), %s1563_s15, 5  ;;  %v1526_v1 = vld [vmem:[%s1773_s1 + $0x8] sm:$0xff] (!%p222_p3)   ;;  %v1527_v2 = vld [vmem:[%s1773_s1 + $0x10] sm:$0xff] (!%p222_p3)  }
   0x7   : > { %225 = sbr.rel (%p222_p3) target bundleno = 288 (0x120), region = 36  ;;  %p268_p4 = scmp.lt.s32.totalorder (!%p222_p3), %s1222_s21, 63  ;;  %1437 = vmatprep.subr.bf16.mxu0 (!%p222_p3), %v1525_v0  ;;  %1485 = vmatprep.subr.bf16.mxu1 (!%p222_p3), %v1525_v0  ;;  %v1528_v3 = vld [vmem:[%s1773_s1 + $0x18] sm:$0xff] (!%p222_p3)   ;;  %v1529_v6 = vld [vmem:[%s1773_s1 + $0x20] sm:$0xff] (!%p222_p3)   ;;  %v1530_v7 = vld [vmem:[%s1773_s1 + $0x28] sm:$0xff] (!%p222_p3)  }
   0x8   : > { %1438 = vmatpush3.bf16.msra.mxu0 (!%p222_p3), %v1525_v0  ;;  %1493 = vmatpush3.bf16.msra.mxu1 (!%p222_p3), %v1525_v0  ;;  %v1531_v8 = vld [vmem:[%s1773_s1 + $0x30] sm:$0xff] (!%p222_p3)   ;;  %v1532_v9 = vld [vmem:[%s1773_s1 + $0x38] sm:$0xff] (!%p222_p3)   ;;  %v1669_v24 = vld [vmem:[%s1774_s2] ss:$0 sm:$0xff] (!%p222_p3) }
   0x9   : > { %1439 = vmatprep.subr.bf16.mxu0 (!%p222_p3), %v1526_v1  ;;  %1486 = vmatprep.subr.bf16.mxu1 (!%p222_p3), %v1526_v1  ;;  %v1674_v26 = vld [vmem:[%s1775_s3] ss:$0 sm:$0xff] (!%p222_p3) }
   0xc   : > { %1440 = vmatpush3.bf16.msra.mxu0 (!%p222_p3), %v1526_v1  ;;  %1494 = vmatpush3.bf16.msra.mxu1 (!%p222_p3), %v1526_v1 }
   0xd   : > { %1441 = vmatprep.subr.bf16.mxu0 (!%p222_p3), %v1527_v2  ;;  %1487 = vmatprep.subr.bf16.mxu1 (!%p222_p3), %v1527_v2 }
   0xe   : > { %s1782_s21 = smov (!%p268_p4, %s1222_s21), 63 }
   0xf   : > { %s1223_s26 = sshll.u32 %s1782_s21, 2 }
  0x10   : > { %s1633_s29 = scalar_lea.vmem %s1772_s0, %s1223_s26  ;;  %1442 = vmatpush3.bf16.msra.mxu0 %v1527_v2  ;;  %1495 = vmatpush3.bf16.msra.mxu1 %v1527_v2  ;;  %s1697_s24 = scalar_lea.vmem %s1776_s4, %s1223_s26 }
  0x11   : > { %v1533_v4 = vld [vmem:[%s1633_s29] sm:$0xff]   ;;  %1443 = vmatprep.subr.bf16.mxu0 %v1528_v3  ;;  %1488 = vmatprep.subr.bf16.mxu1 %v1528_v3  ;;  %v1535_v10 = vld [vmem:[%s1633_s29 + $0x8] sm:$0xff]   ;;  %v1537_v12 = vld [vmem:[%s1633_s29 + $0x10] sm:$0xff]  }
  0x12   : > { %v1534_v5 = vld [vmem:[%s1633_s29 + $0x40] sm:$0xff]   ;;  %1453 = vmatprep.mubr.bf16.mxu0 %v1533_v4  ;;  %v1536_v11 = vld [vmem:[%s1633_s29 + $0x48] sm:$0xff]   ;;  %v1538_v13 = vld [vmem:[%s1633_s29 + $0x50] sm:$0xff]  }
  0x13   : > { %1469 = vmatprep.mubr.bf16.mxu1 %v1534_v5  ;;  %v1539_v14 = vld [vmem:[%s1633_s29 + $0x18] sm:$0xff]   ;;  %v1541_v16 = vld [vmem:[%s1633_s29 + $0x20] sm:$0xff]   ;;  %v1543_v18 = vld [vmem:[%s1633_s29 + $0x28] sm:$0xff]  }
  0x14   : > { %1444 = vmatpush3.bf16.msra.mxu0 %v1528_v3  ;;  %1496 = vmatpush3.bf16.msra.mxu1 %v1528_v3  ;;  %v1540_v15 = vld [vmem:[%s1633_s29 + $0x58] sm:$0xff]   ;;  %v1542_v17 = vld [vmem:[%s1633_s29 + $0x60] sm:$0xff]   ;;  %v1544_v19 = vld [vmem:[%s1633_s29 + $0x68] sm:$0xff]  }
  0x15   : > { %1445 = vmatprep.subr.bf16.mxu0 %v1529_v6  ;;  %1489 = vmatprep.subr.bf16.mxu1 %v1529_v6  ;;  %v1545_v20 = vld [vmem:[%s1633_s29 + $0x30] sm:$0xff]   ;;  %v1547_v22 = vld [vmem:[%s1633_s29 + $0x38] sm:$0xff]  }
  0x16   : > { %v1546_v21 = vld [vmem:[%s1633_s29 + $0x70] sm:$0xff]   ;;  %v1548_v23 = vld [vmem:[%s1633_s29 + $0x78] sm:$0xff]  }
  0x18   : > { %1446 = vmatpush3.bf16.msra.mxu0 %v1529_v6  ;;  %1497 = vmatpush3.bf16.msra.mxu1 %v1529_v6 }
  0x19   : > { %1447 = vmatprep.subr.bf16.mxu0 %v1530_v7  ;;  %1490 = vmatprep.subr.bf16.mxu1 %v1530_v7 }
  0x1c   : > { %1448 = vmatpush3.bf16.msra.mxu0 %v1530_v7  ;;  %1498 = vmatpush3.bf16.msra.mxu1 %v1530_v7 }
  0x1d   : > { %1449 = vmatprep.subr.bf16.mxu0 %v1531_v8  ;;  %1491 = vmatprep.subr.bf16.mxu1 %v1531_v8 }
  0x20   : > { %1450 = vmatpush3.bf16.msra.mxu0 %v1531_v8  ;;  %1499 = vmatpush3.bf16.msra.mxu1 %v1531_v8 }
  0x21   : > { %1451 = vmatprep.subr.bf16.mxu0 %v1532_v9  ;;  %1492 = vmatprep.subr.bf16.mxu1 %v1532_v9 }
  0x24   : > { %1452 = vmatpush3.bf16.msra.mxu0 %v1532_v9  ;;  %1500 = vmatpush3.bf16.msra.mxu1 %v1532_v9 }
  0x27   : > { %1454 = vmatmul.mubr.bf16.vlgmr.msra.gmra.mrb[0].mxu0 %v1535_v10  ;;  %1470 = vmatmul.mubr.bf16.vlgmr.msra.gmra.mrb[0].mxu1 %v1536_v11 }
  0x28   : > { %1457 = vmatprep.mubr.bf16.mxu0 %v1537_v12  ;;  %1473 = vmatprep.mubr.bf16.mxu1 %v1538_v13 }
  0x2f   : > { %1458 = vmatmul.mubr.bf16.gmra.mrb[4].mxu0 %v1539_v14  ;;  %1474 = vmatmul.mubr.bf16.gmra.mrb[4].mxu1 %v1540_v15 }
  0x30   : > { %1461 = vmatprep.mubr.bf16.mxu0 %v1541_v16  ;;  %1477 = vmatprep.mubr.bf16.mxu1 %v1542_v17 }
  0x37   : > { %1462 = vmatmul.mubr.bf16.gmra.mrb[8].mxu0 %v1543_v18  ;;  %1478 = vmatmul.mubr.bf16.gmra.mrb[8].mxu1 %v1544_v19 }
  0x38   : > { %1465 = vmatprep.mubr.bf16.mxu0 %v1545_v20  ;;  %1481 = vmatprep.mubr.bf16.mxu1 %v1546_v21 }
  0x3f   : > { %1466 = vmatmul.mubr.bf16.gmra.mrb[12].mxu0 %v1547_v22  ;;  %1482 = vmatmul.mubr.bf16.gmra.mrb[12].mxu1 %v1548_v23 }
  0xfa   : > { %v1455_v25 = vpop.f32.mrb[0].mxu0  ;;  %v1471_v27 = vpop.f32.mrb[0].mxu1 }
  0xfb   : > { %v830_v28 = vmul.f32 %v1455_v25, %v1669_v24  ;;  %v846_v29 = vmul.f32 %v1471_v27, %v1669_v24  ;;  %v595_v30 = vpop.f32.mrb[1].mxu0  ;;  %v659_v31 = vpop.f32.mrb[1].mxu1 }
  0xfc   : > { %v828_v32 = vmul.f32 %v1669_v24, %v595_v30  ;;  %v844_v33 = vmul.f32 %v1669_v24, %v659_v31  ;;  %v1456_v34 = vpop.f32.mrb[2].mxu0  ;;  %v1472_v35 = vpop.f32.mrb[2].mxu1 }
  0xfd   : > { %v869_v36 = vadd.f32 %v1674_v26, %v830_v28  ;;  %v885_v37 = vadd.f32 %v1674_v26, %v846_v29  ;;  %v831_v38 = vmul.f32 %v1456_v34, %v1669_v24  ;;  %v847_v39 = vmul.f32 %v1472_v35, %v1669_v24  ;;  %v598_v40 = vpop.f32.mrb[3].mxu0  ;;  %v662_v41 = vpop.f32.mrb[3].mxu1 }
  0xfe   : > { %v867_v42 = vadd.f32 %v1674_v26, %v828_v32  ;;  %v883_v43 = vadd.f32 %v1674_v26, %v844_v33  ;;  %v829_v44 = vmul.f32 %v1669_v24, %v598_v40  ;;  %v845_v45 = vmul.f32 %v1669_v24, %v662_v41 }
  0xff   : > { %v870_v46 = vadd.f32 %v1674_v26, %v831_v38  ;;  %v886_v47 = vadd.f32 %v1674_v26, %v847_v39  ;;  %v901_v50 = vmax.f32 %v869_v36, 0.0  ;;  %v917_v51 = vmax.f32 %v885_v37, 0.0 }
 0x100   : > { %v868_v48 = vadd.f32 %v1674_v26, %v829_v44  ;;  %v884_v49 = vadd.f32 %v1674_v26, %v845_v45  ;;  %v899_v54 = vmax.f32 %v867_v42, 0.0  ;;  %v915_v55 = vmax.f32 %v883_v43, 0.0 }
 0x101   : > { %v902_v52 = vmax.f32 %v870_v46, 0.0  ;;  %v918_v53 = vmax.f32 %v886_v47, 0.0 }
 0x102   : > { %v900_v56 = vmax.f32 %v868_v48, 0.0  ;;  %v916_v57 = vmax.f32 %v884_v49, 0.0  ;;  %v1459_v58 = vpop.f32.mrb[4].mxu0  ;;  %v1475_v59 = vpop.f32.mrb[4].mxu1 }
 0x103   : > { %v1326_v60 = vpack.c.bf16 %v902_v52, %v901_v50  ;;  %v1366_v61 = vpack.c.bf16 %v918_v53, %v917_v51  ;;  %v834_v62 = vmul.f32 %v1459_v58, %v1669_v24  ;;  %v850_v63 = vmul.f32 %v1475_v59, %v1669_v24  ;;  %v611_v0 = vpop.f32.mrb[5].mxu0  ;;  %v675_v1 = vpop.f32.mrb[5].mxu1 }
 0x104   : > { %v1321_v2 = vpack.c.bf16 %v900_v56, %v899_v54  ;;  %v1361_v3 = vpack.c.bf16 %v916_v57, %v915_v55  ;;  %v832_v4 = vmul.f32 %v1669_v24, %v611_v0  ;;  %v848_v5 = vmul.f32 %v1669_v24, %v675_v1  ;;  %v1460_v6 = vpop.f32.mrb[6].mxu0  ;;  %v1476_v7 = vpop.f32.mrb[6].mxu1 }
 0x105   : > { %1398 = vst [vmem:[%s1697_s24 + $0x8] sm:$0xff] %v1326_v60   ;;  %1406 = vst [vmem:[%s1697_s24 + $0x48] sm:$0xff] %v1366_v61   ;;  %v873_v8 = vadd.f32 %v1674_v26, %v834_v62  ;;  %v889_v9 = vadd.f32 %v1674_v26, %v850_v63  ;;  %v835_v10 = vmul.f32 %v1460_v6, %v1669_v24  ;;  %v614_v12 = vpop.f32.mrb[7].mxu0  ;;  %v678_v13 = vpop.f32.mrb[7].mxu1 }
 0x106   : > { %v851_v11 = vmul.f32 %v1476_v7, %v1669_v24  ;;  %1322 = vst [vmem:[%s1697_s24] sm:$0xff] %v1321_v2   ;;  %1405 = vst [vmem:[%s1697_s24 + $0x40] sm:$0xff] %v1361_v3   ;;  %v871_v14 = vadd.f32 %v1674_v26, %v832_v4  ;;  %v887_v15 = vadd.f32 %v1674_v26, %v848_v5 }
 0x107   : > { %v833_v16 = vmul.f32 %v1669_v24, %v614_v12  ;;  %v849_v17 = vmul.f32 %v1669_v24, %v678_v13  ;;  %v874_v18 = vadd.f32 %v1674_v26, %v835_v10  ;;  %v905_v22 = vmax.f32 %v873_v8, 0.0 }
 0x108   : > { %v890_v19 = vadd.f32 %v1674_v26, %v851_v11  ;;  %v921_v23 = vmax.f32 %v889_v9, 0.0  ;;  %v903_v28 = vmax.f32 %v871_v14, 0.0  ;;  %v919_v29 = vmax.f32 %v887_v15, 0.0 }
 0x109   : > { %v872_v20 = vadd.f32 %v1674_v26, %v833_v16  ;;  %v888_v21 = vadd.f32 %v1674_v26, %v849_v17  ;;  %v906_v25 = vmax.f32 %v874_v18, 0.0 }
 0x10a   : > { %v922_v27 = vmax.f32 %v890_v19, 0.0  ;;  %v1463_v32 = vpop.f32.mrb[8].mxu0  ;;  %v1479_v33 = vpop.f32.mrb[8].mxu1 }
 0x10b   : > { %v904_v30 = vmax.f32 %v872_v20, 0.0  ;;  %v920_v31 = vmax.f32 %v888_v21, 0.0  ;;  %v1336_v34 = vpack.c.bf16 %v906_v25, %v905_v22  ;;  %v838_v36 = vmul.f32 %v1463_v32, %v1669_v24  ;;  %v627_v38 = vpop.f32.mrb[9].mxu0  ;;  %v691_v39 = vpop.f32.mrb[9].mxu1 }
 0x10c   : > { %v1376_v35 = vpack.c.bf16 %v922_v27, %v921_v23  ;;  %v854_v37 = vmul.f32 %v1479_v33, %v1669_v24  ;;  %v836_v42 = vmul.f32 %v1669_v24, %v627_v38  ;;  %v852_v43 = vmul.f32 %v1669_v24, %v691_v39  ;;  %v1464_v44 = vpop.f32.mrb[10].mxu0  ;;  %v1480_v45 = vpop.f32.mrb[10].mxu1 }
 0x10d   : > { %v1331_v40 = vpack.c.bf16 %v904_v30, %v903_v28  ;;  %v1371_v41 = vpack.c.bf16 %v920_v31, %v919_v29  ;;  %1400 = vst [vmem:[%s1697_s24 + $0x18] sm:$0xff] %v1336_v34   ;;  %v877_v46 = vadd.f32 %v1674_v26, %v838_v36  ;;  %v839_v48 = vmul.f32 %v1464_v44, %v1669_v24  ;;  %v630_v50 = vpop.f32.mrb[11].mxu0  ;;  %v694_v51 = vpop.f32.mrb[11].mxu1 }
 0x10e   : > { %1408 = vst [vmem:[%s1697_s24 + $0x58] sm:$0xff] %v1376_v35   ;;  %v893_v47 = vadd.f32 %v1674_v26, %v854_v37  ;;  %v855_v49 = vmul.f32 %v1480_v45, %v1669_v24  ;;  %v875_v52 = vadd.f32 %v1674_v26, %v836_v42  ;;  %v891_v53 = vadd.f32 %v1674_v26, %v852_v43 }
 0x10f   : > { %1399 = vst [vmem:[%s1697_s24 + $0x10] sm:$0xff] %v1331_v40   ;;  %1407 = vst [vmem:[%s1697_s24 + $0x50] sm:$0xff] %v1371_v41   ;;  %v837_v54 = vmul.f32 %v1669_v24, %v630_v50  ;;  %v853_v55 = vmul.f32 %v1669_v24, %v694_v51  ;;  %v878_v56 = vadd.f32 %v1674_v26, %v839_v48  ;;  %v909_v60 = vmax.f32 %v877_v46, 0.0 }
 0x110   : > { %v894_v57 = vadd.f32 %v1674_v26, %v855_v49  ;;  %v925_v61 = vmax.f32 %v893_v47, 0.0  ;;  %v907_v0 = vmax.f32 %v875_v52, 0.0  ;;  %v923_v1 = vmax.f32 %v891_v53, 0.0 }
 0x111   : > { %v876_v58 = vadd.f32 %v1674_v26, %v837_v54  ;;  %v892_v59 = vadd.f32 %v1674_v26, %v853_v55  ;;  %v910_v62 = vmax.f32 %v878_v56, 0.0 }
 0x112   : > { %v926_v63 = vmax.f32 %v894_v57, 0.0  ;;  %v1467_v4 = vpop.f32.mrb[12].mxu0  ;;  %v1483_v5 = vpop.f32.mrb[12].mxu1 }
 0x113   : > { %v908_v2 = vmax.f32 %v876_v58, 0.0  ;;  %v924_v3 = vmax.f32 %v892_v59, 0.0  ;;  %v1346_v6 = vpack.c.bf16 %v910_v62, %v909_v60  ;;  %v842_v8 = vmul.f32 %v1467_v4, %v1669_v24  ;;  %v643_v10 = vpop.f32.mrb[13].mxu0  ;;  %v707_v11 = vpop.f32.mrb[13].mxu1 }
 0x114   : > { %v1386_v7 = vpack.c.bf16 %v926_v63, %v925_v61  ;;  %v858_v9 = vmul.f32 %v1483_v5, %v1669_v24  ;;  %v840_v14 = vmul.f32 %v1669_v24, %v643_v10  ;;  %v856_v15 = vmul.f32 %v1669_v24, %v707_v11  ;;  %v1468_v16 = vpop.f32.mrb[14].mxu0  ;;  %v1484_v17 = vpop.f32.mrb[14].mxu1 }
 0x115   : > { %v1341_v12 = vpack.c.bf16 %v908_v2, %v907_v0  ;;  %v1381_v13 = vpack.c.bf16 %v924_v3, %v923_v1  ;;  %1402 = vst [vmem:[%s1697_s24 + $0x28] sm:$0xff] %v1346_v6   ;;  %v881_v18 = vadd.f32 %v1674_v26, %v842_v8  ;;  %v843_v20 = vmul.f32 %v1468_v16, %v1669_v24  ;;  %v646_v22 = vpop.f32.mrb[15].mxu0  ;;  %v710_v23 = vpop.f32.mrb[15].mxu1 }
 0x116   : > { %1410 = vst [vmem:[%s1697_s24 + $0x68] sm:$0xff] %v1386_v7   ;;  %v897_v19 = vadd.f32 %v1674_v26, %v858_v9  ;;  %v859_v21 = vmul.f32 %v1484_v17, %v1669_v24  ;;  %v879_v25 = vadd.f32 %v1674_v26, %v840_v14  ;;  %v895_v27 = vadd.f32 %v1674_v26, %v856_v15 }
 0x117   : > { %1401 = vst [vmem:[%s1697_s24 + $0x20] sm:$0xff] %v1341_v12   ;;  %1409 = vst [vmem:[%s1697_s24 + $0x60] sm:$0xff] %v1381_v13   ;;  %v841_v28 = vmul.f32 %v1669_v24, %v646_v22  ;;  %v857_v29 = vmul.f32 %v1669_v24, %v710_v23  ;;  %v882_v30 = vadd.f32 %v1674_v26, %v843_v20  ;;  %v913_v34 = vmax.f32 %v881_v18, 0.0 }
 0x118   : > { %v898_v31 = vadd.f32 %v1674_v26, %v859_v21  ;;  %v929_v35 = vmax.f32 %v897_v19, 0.0  ;;  %v911_v38 = vmax.f32 %v879_v25, 0.0  ;;  %v927_v39 = vmax.f32 %v895_v27, 0.0 }
 0x119   : > { %v880_v32 = vadd.f32 %v1674_v26, %v841_v28  ;;  %v896_v33 = vadd.f32 %v1674_v26, %v857_v29  ;;  %v914_v36 = vmax.f32 %v882_v30, 0.0 }
 0x11a   : > { %v930_v37 = vmax.f32 %v898_v31, 0.0 }
 0x11b   : > { %v912_v40 = vmax.f32 %v880_v32, 0.0  ;;  %v928_v24 = vmax.f32 %v896_v33, 0.0  ;;  %v1356_v41 = vpack.c.bf16 %v914_v36, %v913_v34 }
 0x11c   : > { %v1396_v42 = vpack.c.bf16 %v930_v37, %v929_v35 }
 0x11d   : > { %v1351_v43 = vpack.c.bf16 %v912_v40, %v911_v38  ;;  %v1391_v44 = vpack.c.bf16 %v928_v24, %v927_v39  ;;  %1404 = vst [vmem:[%s1697_s24 + $0x38] sm:$0xff] %v1356_v41  }
 0x11e   : > { %1412 = vst [vmem:[%s1697_s24 + $0x78] sm:$0xff] %v1396_v42  }
 0x11f   : > { %1403 = vst [vmem:[%s1697_s24 + $0x30] sm:$0xff] %v1351_v43   ;;  %1411 = vst [vmem:[%s1697_s24 + $0x70] sm:$0xff] %v1391_v44  }
 0x120 PF: > { %s14_s17 = sadd.s32 1, %s1571_s17   ;;  %s1777_s15 = smov %s1567_s16 }
 0x121   : > { %p11_p5 = scmp.ge.s32.totalorder %s14_s17, 4   ;;  %s1778_s16 = smov %s1780_s18 }
 0x123   :  { %13 = sbr.rel (!%p11_p5) target bundleno = 2 (0x2), region = 83 }

// kernel: pspnet_forward.15
= control target key start
LH: loop header
LB: loop body
LE: loop exit
PB: predicated region body
PF: predicated region fallthrough
CT: control target
= control target key end

     0   :  { %s1566_s15 = smov 0   ;;  %s1568_s16 = smov 0   ;;  %s1740_s0 = inlined_call_operand.vmem [shape: bf16[512,128], index: 0, kind: input, shape index: {}]   ;;  %s1741_s1 = inlined_call_operand.vmem [shape: bf16[128,128], index: 1, kind: input, shape index: {}]   ;;  %s1742_s2 = inlined_call_operand.vmem [shape: f32[1,128], index: 2, kind: input, shape index: {}]   ;;  %s1743_s3 = inlined_call_operand.vmem [shape: f32[1,128], index: 3, kind: input, shape index: {}]   ;;  %s1744_s4 = inlined_call_operand.vmem [shape: bf16[512,128], index: 4, kind: output, shape index: {}]  }
   0x1   :  { %s1570_s17 = smov 0  }
   0x2 LB: > { %s33_s18 = sadd.s32 1, %s1535_s16  ;;  %p1189_p0 = scmp.ge.s32.totalorder %s1539_s17, 1  ;;  %s1539_s17 = sphi %s1570_s17, %s14_s17   ;;  %s1535_s16 = sphi %s1568_s16, %s1746_s16   ;;  %s1531_s15 = sphi %s1566_s15, %s1745_s15  }
   0x3   : > { %p35_p1 = scmp.ge.s32.totalorder %s33_s18, 2  ;;  %p221_p2 = scmp.lt.s32.totalorder %s1539_s17, 3 }
   0x5   : > { %s1748_s18 = smov (%p35_p1, %s33_s18), 0  ;;  %p222_p3 = pnand %p1189_p0, %p221_p2 }
   0x6   : > { %v1493_v0 = vld [vmem:[%s1741_s1] sm:$0xff] (!%p222_p3)   ;;  %s1190_s21 = sshll.u32 (!%p222_p3), %s1531_s15, 5  ;;  %v1494_v1 = vld [vmem:[%s1741_s1 + $0x8] sm:$0xff] (!%p222_p3)   ;;  %v1495_v2 = vld [vmem:[%s1741_s1 + $0x10] sm:$0xff] (!%p222_p3)  }
   0x7   : > { %225 = sbr.rel (%p222_p3) target bundleno = 285 (0x11d), region = 36  ;;  %p268_p4 = scmp.lt.s32.totalorder (!%p222_p3), %s1190_s21, 63  ;;  %1405 = vmatprep.subr.bf16.mxu0 (!%p222_p3), %v1493_v0  ;;  %1453 = vmatprep.subr.bf16.mxu1 (!%p222_p3), %v1493_v0  ;;  %v1496_v3 = vld [vmem:[%s1741_s1 + $0x18] sm:$0xff] (!%p222_p3)   ;;  %v1497_v6 = vld [vmem:[%s1741_s1 + $0x20] sm:$0xff] (!%p222_p3)   ;;  %v1498_v7 = vld [vmem:[%s1741_s1 + $0x28] sm:$0xff] (!%p222_p3)  }
   0x8   : > { %1406 = vmatpush3.bf16.msra.mxu0 (!%p222_p3), %v1493_v0  ;;  %1461 = vmatpush3.bf16.msra.mxu1 (!%p222_p3), %v1493_v0  ;;  %v1499_v8 = vld [vmem:[%s1741_s1 + $0x30] sm:$0xff] (!%p222_p3)   ;;  %v1500_v9 = vld [vmem:[%s1741_s1 + $0x38] sm:$0xff] (!%p222_p3)   ;;  %v1637_v24 = vld [vmem:[%s1742_s2] ss:$0 sm:$0xff] (!%p222_p3) }
   0x9   : > { %1407 = vmatprep.subr.bf16.mxu0 (!%p222_p3), %v1494_v1  ;;  %1454 = vmatprep.subr.bf16.mxu1 (!%p222_p3), %v1494_v1  ;;  %v1644_v31 = vld [vmem:[%s1743_s3] ss:$0 sm:$0xff] (!%p222_p3) }
   0xc   : > { %1408 = vmatpush3.bf16.msra.mxu0 (!%p222_p3), %v1494_v1  ;;  %1462 = vmatpush3.bf16.msra.mxu1 (!%p222_p3), %v1494_v1 }
   0xd   : > { %1409 = vmatprep.subr.bf16.mxu0 (!%p222_p3), %v1495_v2  ;;  %1455 = vmatprep.subr.bf16.mxu1 (!%p222_p3), %v1495_v2 }
   0xe   : > { %s1750_s21 = smov (!%p268_p4, %s1190_s21), 63 }
   0xf   : > { %s1191_s26 = sshll.u32 %s1750_s21, 2 }
  0x10   : > { %s1601_s29 = scalar_lea.vmem %s1740_s0, %s1191_s26  ;;  %1410 = vmatpush3.bf16.msra.mxu0 %v1495_v2  ;;  %1463 = vmatpush3.bf16.msra.mxu1 %v1495_v2  ;;  %s1663_s24 = scalar_lea.vmem %s1744_s4, %s1191_s26 }
  0x11   : > { %v1501_v4 = vld [vmem:[%s1601_s29] sm:$0xff]   ;;  %1411 = vmatprep.subr.bf16.mxu0 %v1496_v3  ;;  %1456 = vmatprep.subr.bf16.mxu1 %v1496_v3  ;;  %v1503_v10 = vld [vmem:[%s1601_s29 + $0x8] sm:$0xff]   ;;  %v1505_v12 = vld [vmem:[%s1601_s29 + $0x10] sm:$0xff]  }
  0x12   : > { %v1502_v5 = vld [vmem:[%s1601_s29 + $0x40] sm:$0xff]   ;;  %1421 = vmatprep.mubr.bf16.mxu0 %v1501_v4  ;;  %v1504_v11 = vld [vmem:[%s1601_s29 + $0x48] sm:$0xff]   ;;  %v1506_v13 = vld [vmem:[%s1601_s29 + $0x50] sm:$0xff]  }
  0x13   : > { %1437 = vmatprep.mubr.bf16.mxu1 %v1502_v5  ;;  %v1507_v14 = vld [vmem:[%s1601_s29 + $0x18] sm:$0xff]   ;;  %v1509_v16 = vld [vmem:[%s1601_s29 + $0x20] sm:$0xff]   ;;  %v1511_v18 = vld [vmem:[%s1601_s29 + $0x28] sm:$0xff]  }
  0x14   : > { %1412 = vmatpush3.bf16.msra.mxu0 %v1496_v3  ;;  %1464 = vmatpush3.bf16.msra.mxu1 %v1496_v3  ;;  %v1508_v15 = vld [vmem:[%s1601_s29 + $0x58] sm:$0xff]   ;;  %v1510_v17 = vld [vmem:[%s1601_s29 + $0x60] sm:$0xff]   ;;  %v1512_v19 = vld [vmem:[%s1601_s29 + $0x68] sm:$0xff]  }
  0x15   : > { %1413 = vmatprep.subr.bf16.mxu0 %v1497_v6  ;;  %1457 = vmatprep.subr.bf16.mxu1 %v1497_v6  ;;  %v1513_v20 = vld [vmem:[%s1601_s29 + $0x30] sm:$0xff]   ;;  %v1515_v22 = vld [vmem:[%s1601_s29 + $0x38] sm:$0xff]  }
  0x16   : > { %v1514_v21 = vld [vmem:[%s1601_s29 + $0x70] sm:$0xff]   ;;  %v1516_v23 = vld [vmem:[%s1601_s29 + $0x78] sm:$0xff]  }
  0x18   : > { %1414 = vmatpush3.bf16.msra.mxu0 %v1497_v6  ;;  %1465 = vmatpush3.bf16.msra.mxu1 %v1497_v6 }
  0x19   : > { %1415 = vmatprep.subr.bf16.mxu0 %v1498_v7  ;;  %1458 = vmatprep.subr.bf16.mxu1 %v1498_v7 }
  0x1c   : > { %1416 = vmatpush3.bf16.msra.mxu0 %v1498_v7  ;;  %1466 = vmatpush3.bf16.msra.mxu1 %v1498_v7 }
  0x1d   : > { %1417 = vmatprep.subr.bf16.mxu0 %v1499_v8  ;;  %1459 = vmatprep.subr.bf16.mxu1 %v1499_v8 }
  0x20   : > { %1418 = vmatpush3.bf16.msra.mxu0 %v1499_v8  ;;  %1467 = vmatpush3.bf16.msra.mxu1 %v1499_v8 }
  0x21   : > { %1419 = vmatprep.subr.bf16.mxu0 %v1500_v9  ;;  %1460 = vmatprep.subr.bf16.mxu1 %v1500_v9 }
  0x24   : > { %1420 = vmatpush3.bf16.msra.mxu0 %v1500_v9  ;;  %1468 = vmatpush3.bf16.msra.mxu1 %v1500_v9 }
  0x27   : > { %1422 = vmatmul.mubr.bf16.vlgmr.msra.gmra.mrb[0].mxu0 %v1503_v10  ;;  %1438 = vmatmul.mubr.bf16.vlgmr.msra.gmra.mrb[0].mxu1 %v1504_v11 }
  0x28   : > { %1425 = vmatprep.mubr.bf16.mxu0 %v1505_v12  ;;  %1441 = vmatprep.mubr.bf16.mxu1 %v1506_v13 }
  0x2f   : > { %1426 = vmatmul.mubr.bf16.gmra.mrb[4].mxu0 %v1507_v14  ;;  %1442 = vmatmul.mubr.bf16.gmra.mrb[4].mxu1 %v1508_v15 }
  0x30   : > { %1429 = vmatprep.mubr.bf16.mxu0 %v1509_v16  ;;  %1445 = vmatprep.mubr.bf16.mxu1 %v1510_v17 }
  0x37   : > { %1430 = vmatmul.mubr.bf16.gmra.mrb[8].mxu0 %v1511_v18  ;;  %1446 = vmatmul.mubr.bf16.gmra.mrb[8].mxu1 %v1512_v19 }
  0x38   : > { %1433 = vmatprep.mubr.bf16.mxu0 %v1513_v20  ;;  %1449 = vmatprep.mubr.bf16.mxu1 %v1514_v21 }
  0x3f   : > { %1434 = vmatmul.mubr.bf16.gmra.mrb[12].mxu0 %v1515_v22  ;;  %1450 = vmatmul.mubr.bf16.gmra.mrb[12].mxu1 %v1516_v23 }
  0xfa   : > { %v1423_v25 = vpop.f32.mrb[0].mxu0  ;;  %v1439_v26 = vpop.f32.mrb[0].mxu1 }
  0xfb   : > { %v830_v27 = vmul.f32 %v1423_v25, %v1637_v24  ;;  %v846_v28 = vmul.f32 %v1439_v26, %v1637_v24  ;;  %v595_v29 = vpop.f32.mrb[1].mxu0  ;;  %v659_v30 = vpop.f32.mrb[1].mxu1 }
  0xfc   : > { %v828_v32 = vmul.f32 %v1637_v24, %v595_v29  ;;  %v844_v33 = vmul.f32 %v1637_v24, %v659_v30  ;;  %v1424_v34 = vpop.f32.mrb[2].mxu0  ;;  %v1440_v35 = vpop.f32.mrb[2].mxu1 }
  0xfd   : > { %v831_v36 = vmul.f32 %v1424_v34, %v1637_v24  ;;  %v847_v37 = vmul.f32 %v1440_v35, %v1637_v24  ;;  %v598_v38 = vpop.f32.mrb[3].mxu0  ;;  %v662_v39 = vpop.f32.mrb[3].mxu1  ;;  %v869_v42 = vadd.f32 %v1644_v31, %v830_v27  ;;  %v885_v43 = vadd.f32 %v1644_v31, %v846_v28 }
  0xfe   : > { %v829_v40 = vmul.f32 %v1637_v24, %v598_v38  ;;  %v845_v41 = vmul.f32 %v1637_v24, %v662_v39  ;;  %v867_v46 = vadd.f32 %v1644_v31, %v828_v32  ;;  %v883_v47 = vadd.f32 %v1644_v31, %v844_v33 }
  0xff   : > { %v870_v44 = vadd.f32 %v1644_v31, %v831_v36  ;;  %v886_v45 = vadd.f32 %v1644_v31, %v847_v37 }
 0x100   : > { %v868_v48 = vadd.f32 %v1644_v31, %v829_v40  ;;  %v884_v49 = vadd.f32 %v1644_v31, %v845_v41 }
 0x101   : > { %v1294_v50 = vpack.c.bf16 %v870_v44, %v869_v42  ;;  %v1334_v51 = vpack.c.bf16 %v886_v45, %v885_v43 }
 0x102   : > { %v1289_v52 = vpack.c.bf16 %v868_v48, %v867_v46  ;;  %v1329_v53 = vpack.c.bf16 %v884_v49, %v883_v47  ;;  %v1427_v54 = vpop.f32.mrb[4].mxu0  ;;  %v1443_v55 = vpop.f32.mrb[4].mxu1 }
 0x103   : > { %1366 = vst [vmem:[%s1663_s24 + $0x8] sm:$0xff] %v1294_v50   ;;  %1374 = vst [vmem:[%s1663_s24 + $0x48] sm:$0xff] %v1334_v51   ;;  %v834_v56 = vmul.f32 %v1427_v54, %v1637_v24  ;;  %v850_v57 = vmul.f32 %v1443_v55, %v1637_v24  ;;  %v611_v58 = vpop.f32.mrb[5].mxu0  ;;  %v675_v59 = vpop.f32.mrb[5].mxu1 }
 0x104   : > { %1290 = vst [vmem:[%s1663_s24] sm:$0xff] %v1289_v52   ;;  %1373 = vst [vmem:[%s1663_s24 + $0x40] sm:$0xff] %v1329_v53   ;;  %v832_v60 = vmul.f32 %v1637_v24, %v611_v58  ;;  %v848_v61 = vmul.f32 %v1637_v24, %v675_v59  ;;  %v1428_v62 = vpop.f32.mrb[6].mxu0  ;;  %v1444_v63 = vpop.f32.mrb[6].mxu1 }
 0x105   : > { %v835_v0 = vmul.f32 %v1428_v62, %v1637_v24  ;;  %v851_v1 = vmul.f32 %v1444_v63, %v1637_v24  ;;  %v614_v2 = vpop.f32.mrb[7].mxu0  ;;  %v678_v3 = vpop.f32.mrb[7].mxu1  ;;  %v873_v6 = vadd.f32 %v1644_v31, %v834_v56  ;;  %v889_v7 = vadd.f32 %v1644_v31, %v850_v57 }
 0x106   : > { %v833_v4 = vmul.f32 %v1637_v24, %v614_v2  ;;  %v849_v5 = vmul.f32 %v1637_v24, %v678_v3  ;;  %v871_v10 = vadd.f32 %v1644_v31, %v832_v60  ;;  %v887_v11 = vadd.f32 %v1644_v31, %v848_v61 }
 0x107   : > { %v874_v8 = vadd.f32 %v1644_v31, %v835_v0  ;;  %v890_v9 = vadd.f32 %v1644_v31, %v851_v1 }
 0x108   : > { %v872_v12 = vadd.f32 %v1644_v31, %v833_v4  ;;  %v888_v13 = vadd.f32 %v1644_v31, %v849_v5 }
 0x109   : > { %v1304_v14 = vpack.c.bf16 %v874_v8, %v873_v6  ;;  %v1344_v15 = vpack.c.bf16 %v890_v9, %v889_v7 }
 0x10a   : > { %v1299_v16 = vpack.c.bf16 %v872_v12, %v871_v10  ;;  %v1339_v17 = vpack.c.bf16 %v888_v13, %v887_v11  ;;  %v1431_v18 = vpop.f32.mrb[8].mxu0  ;;  %v1447_v19 = vpop.f32.mrb[8].mxu1 }
 0x10b   : > { %1368 = vst [vmem:[%s1663_s24 + $0x18] sm:$0xff] %v1304_v14   ;;  %1376 = vst [vmem:[%s1663_s24 + $0x58] sm:$0xff] %v1344_v15   ;;  %v838_v20 = vmul.f32 %v1431_v18, %v1637_v24  ;;  %v854_v21 = vmul.f32 %v1447_v19, %v1637_v24  ;;  %v627_v22 = vpop.f32.mrb[9].mxu0  ;;  %v691_v23 = vpop.f32.mrb[9].mxu1 }
 0x10c   : > { %1367 = vst [vmem:[%s1663_s24 + $0x10] sm:$0xff] %v1299_v16   ;;  %1375 = vst [vmem:[%s1663_s24 + $0x50] sm:$0xff] %v1339_v17   ;;  %v836_v25 = vmul.f32 %v1637_v24, %v627_v22  ;;  %v852_v26 = vmul.f32 %v1637_v24, %v691_v23  ;;  %v1432_v27 = vpop.f32.mrb[10].mxu0  ;;  %v1448_v28 = vpop.f32.mrb[10].mxu1 }
 0x10d   : > { %v839_v29 = vmul.f32 %v1432_v27, %v1637_v24  ;;  %v855_v30 = vmul.f32 %v1448_v28, %v1637_v24  ;;  %v630_v32 = vpop.f32.mrb[11].mxu0  ;;  %v694_v33 = vpop.f32.mrb[11].mxu1  ;;  %v877_v36 = vadd.f32 %v1644_v31, %v838_v20  ;;  %v893_v37 = vadd.f32 %v1644_v31, %v854_v21 }
 0x10e   : > { %v837_v34 = vmul.f32 %v1637_v24, %v630_v32  ;;  %v853_v35 = vmul.f32 %v1637_v24, %v694_v33  ;;  %v875_v40 = vadd.f32 %v1644_v31, %v836_v25  ;;  %v891_v41 = vadd.f32 %v1644_v31, %v852_v26 }
 0x10f   : > { %v878_v38 = vadd.f32 %v1644_v31, %v839_v29  ;;  %v894_v39 = vadd.f32 %v1644_v31, %v855_v30 }
 0x110   : > { %v876_v42 = vadd.f32 %v1644_v31, %v837_v34  ;;  %v892_v43 = vadd.f32 %v1644_v31, %v853_v35 }
 0x111   : > { %v1314_v44 = vpack.c.bf16 %v878_v38, %v877_v36  ;;  %v1354_v45 = vpack.c.bf16 %v894_v39, %v893_v37 }
 0x112   : > { %v1309_v46 = vpack.c.bf16 %v876_v42, %v875_v40  ;;  %v1349_v47 = vpack.c.bf16 %v892_v43, %v891_v41  ;;  %v1435_v48 = vpop.f32.mrb[12].mxu0  ;;  %v1451_v49 = vpop.f32.mrb[12].mxu1 }
 0x113   : > { %1370 = vst [vmem:[%s1663_s24 + $0x28] sm:$0xff] %v1314_v44   ;;  %1378 = vst [vmem:[%s1663_s24 + $0x68] sm:$0xff] %v1354_v45   ;;  %v842_v50 = vmul.f32 %v1435_v48, %v1637_v24  ;;  %v858_v51 = vmul.f32 %v1451_v49, %v1637_v24  ;;  %v643_v52 = vpop.f32.mrb[13].mxu0  ;;  %v707_v53 = vpop.f32.mrb[13].mxu1 }
 0x114   : > { %1369 = vst [vmem:[%s1663_s24 + $0x20] sm:$0xff] %v1309_v46   ;;  %1377 = vst [vmem:[%s1663_s24 + $0x60] sm:$0xff] %v1349_v47   ;;  %v840_v54 = vmul.f32 %v1637_v24, %v643_v52  ;;  %v856_v55 = vmul.f32 %v1637_v24, %v707_v53  ;;  %v1436_v56 = vpop.f32.mrb[14].mxu0  ;;  %v1452_v57 = vpop.f32.mrb[14].mxu1 }
 0x115   : > { %v843_v58 = vmul.f32 %v1436_v56, %v1637_v24  ;;  %v859_v59 = vmul.f32 %v1452_v57, %v1637_v24  ;;  %v646_v60 = vpop.f32.mrb[15].mxu0  ;;  %v710_v61 = vpop.f32.mrb[15].mxu1  ;;  %v881_v0 = vadd.f32 %v1644_v31, %v842_v50  ;;  %v897_v1 = vadd.f32 %v1644_v31, %v858_v51 }
 0x116   : > { %v841_v62 = vmul.f32 %v1637_v24, %v646_v60  ;;  %v857_v63 = vmul.f32 %v1637_v24, %v710_v61  ;;  %v879_v4 = vadd.f32 %v1644_v31, %v840_v54  ;;  %v895_v5 = vadd.f32 %v1644_v31, %v856_v55 }
 0x117   : > { %v882_v2 = vadd.f32 %v1644_v31, %v843_v58  ;;  %v898_v3 = vadd.f32 %v1644_v31, %v859_v59 }
 0x118   : > { %v880_v6 = vadd.f32 %v1644_v31, %v841_v62  ;;  %v896_v7 = vadd.f32 %v1644_v31, %v857_v63 }
 0x119   : > { %v1324_v8 = vpack.c.bf16 %v882_v2, %v881_v0  ;;  %v1364_v9 = vpack.c.bf16 %v898_v3, %v897_v1 }
 0x11a   : > { %v1319_v24 = vpack.c.bf16 %v880_v6, %v879_v4  ;;  %v1359_v10 = vpack.c.bf16 %v896_v7, %v895_v5 }
 0x11b   : > { %1372 = vst [vmem:[%s1663_s24 + $0x38] sm:$0xff] %v1324_v8   ;;  %1380 = vst [vmem:[%s1663_s24 + $0x78] sm:$0xff] %v1364_v9  }
 0x11c   : > { %1371 = vst [vmem:[%s1663_s24 + $0x30] sm:$0xff] %v1319_v24   ;;  %1379 = vst [vmem:[%s1663_s24 + $0x70] sm:$0xff] %v1359_v10  }
 0x11d PF: > { %s14_s17 = sadd.s32 1, %s1539_s17   ;;  %s1745_s15 = smov %s1535_s16 }
 0x11e   : > { %p11_p5 = scmp.ge.s32.totalorder %s14_s17, 4   ;;  %s1746_s16 = smov %s1748_s18 }
 0x120   :  { %13 = sbr.rel (!%p11_p5) target bundleno = 2 (0x2), region = 83 }

// kernel: pspnet_forward.16
= control target key start
LH: loop header
LB: loop body
LE: loop exit
PB: predicated region body
PF: predicated region fallthrough
CT: control target
= control target key end

     0   :  { %s1855_s18 = smov 0   ;;  %s1857_s19 = smov 0   ;;  %s2152_s0 = inlined_call_operand.vmem [shape: bf16[512,128], index: 0, kind: input, shape index: {}]   ;;  %s2153_s1 = inlined_call_operand.vmem [shape: bf16[128,128], index: 1, kind: input, shape index: {}]   ;;  %s2154_s2 = inlined_call_operand.vmem [shape: f32[1,128], index: 2, kind: input, shape index: {}]   ;;  %s2155_s3 = inlined_call_operand.vmem [shape: f32[1,128], index: 3, kind: input, shape index: {}]   ;;  %s2156_s4 = inlined_call_operand.vmem [shape: bf16[512,128], index: 4, kind: input, shape index: {}]   ;;  %s2157_s5 = inlined_call_operand.vmem [shape: bf16[512,128], index: 5, kind: output, shape index: {}]  }
   0x1   :  { %s1859_s20 = smov 0  }
   0x2 LB: > { %s34_s21 = sadd.s32 1, %s1819_s19  ;;  %p1392_p0 = scmp.ge.s32.totalorder %s1823_s20, 1  ;;  %s1823_s20 = sphi %s1859_s20, %s15_s20   ;;  %s1819_s19 = sphi %s1857_s19, %s2159_s19   ;;  %s1815_s18 = sphi %s1855_s18, %s2158_s18  }
   0x3   : > { %p36_p1 = scmp.ge.s32.totalorder %s34_s21, 2  ;;  %p262_p2 = scmp.lt.s32.totalorder %s1823_s20, 3 }
   0x5   : > { %s2161_s21 = smov (%p36_p1, %s34_s21), 0  ;;  %p263_p3 = pnand %p1392_p0, %p262_p2 }
   0x6   : > { %v1777_v0 = vld [vmem:[%s2153_s1] sm:$0xff] (!%p263_p3)   ;;  %s1393_s24 = sshll.u32 (!%p263_p3), %s1815_s18, 5  ;;  %v1778_v1 = vld [vmem:[%s2153_s1 + $0x8] sm:$0xff] (!%p263_p3)   ;;  %v1779_v2 = vld [vmem:[%s2153_s1 + $0x10] sm:$0xff] (!%p263_p3)  }
   0x7   : > { %266 = sbr.rel (%p263_p3) target bundleno = 295 (0x127), region = 40  ;;  %p319_p4 = scmp.lt.s32.totalorder (!%p263_p3), %s1393_s24, 63  ;;  %1689 = vmatprep.subr.bf16.mxu0 (!%p263_p3), %v1777_v0  ;;  %1737 = vmatprep.subr.bf16.mxu1 (!%p263_p3), %v1777_v0  ;;  %v1780_v3 = vld [vmem:[%s2153_s1 + $0x18] sm:$0xff] (!%p263_p3)   ;;  %v1781_v6 = vld [vmem:[%s2153_s1 + $0x20] sm:$0xff] (!%p263_p3)   ;;  %v1782_v7 = vld [vmem:[%s2153_s1 + $0x28] sm:$0xff] (!%p263_p3)  }
   0x8   : > { %1690 = vmatpush3.bf16.msra.mxu0 (!%p263_p3), %v1777_v0  ;;  %1745 = vmatpush3.bf16.msra.mxu1 (!%p263_p3), %v1777_v0  ;;  %v1783_v8 = vld [vmem:[%s2153_s1 + $0x30] sm:$0xff] (!%p263_p3)   ;;  %v1784_v9 = vld [vmem:[%s2153_s1 + $0x38] sm:$0xff] (!%p263_p3)   ;;  %v1974_v44 = vld [vmem:[%s2154_s2] ss:$0 sm:$0xff] (!%p263_p3) }
   0x9   : > { %1691 = vmatprep.subr.bf16.mxu0 (!%p263_p3), %v1778_v1  ;;  %1738 = vmatprep.subr.bf16.mxu1 (!%p263_p3), %v1778_v1  ;;  %v1987_v54 = vld [vmem:[%s2155_s3] ss:$0 sm:$0xff] (!%p263_p3) }
   0xc   : > { %1692 = vmatpush3.bf16.msra.mxu0 (!%p263_p3), %v1778_v1  ;;  %1746 = vmatpush3.bf16.msra.mxu1 (!%p263_p3), %v1778_v1 }
   0xd   : > { %1693 = vmatprep.subr.bf16.mxu0 (!%p263_p3), %v1779_v2  ;;  %1739 = vmatprep.subr.bf16.mxu1 (!%p263_p3), %v1779_v2 }
   0xe   : > { %s2163_s24 = smov (!%p319_p4, %s1393_s24), 63 }
   0xf   : > { %s1882_s29 = sshll.u32 %s2163_s24, 2 }
  0x10   : > { %s1888_s7 = scalar_lea.vmem %s2152_s0, %s1882_s29  ;;  %1694 = vmatpush3.bf16.msra.mxu0 %v1779_v2  ;;  %1747 = vmatpush3.bf16.msra.mxu1 %v1779_v2  ;;  %s1925_s23 = scalar_lea.vmem %s2156_s4, %s1882_s29 }
  0x11   : > { %v1785_v4 = vld [vmem:[%s1888_s7] sm:$0xff]   ;;  %1695 = vmatprep.subr.bf16.mxu0 %v1780_v3  ;;  %1740 = vmatprep.subr.bf16.mxu1 %v1780_v3  ;;  %v1787_v10 = vld [vmem:[%s1888_s7 + $0x8] sm:$0xff]   ;;  %v1789_v12 = vld [vmem:[%s1888_s7 + $0x10] sm:$0xff]   ;;  %s2019_s6 = scalar_lea.vmem %s2157_s5, %s1882_s29 }
  0x12   : > { %v1786_v5 = vld [vmem:[%s1888_s7 + $0x40] sm:$0xff]   ;;  %1705 = vmatprep.mubr.bf16.mxu0 %v1785_v4  ;;  %v1788_v11 = vld [vmem:[%s1888_s7 + $0x48] sm:$0xff]   ;;  %v1790_v13 = vld [vmem:[%s1888_s7 + $0x50] sm:$0xff]  }
  0x13   : > { %1721 = vmatprep.mubr.bf16.mxu1 %v1786_v5  ;;  %v1791_v14 = vld [vmem:[%s1888_s7 + $0x18] sm:$0xff]   ;;  %v1793_v16 = vld [vmem:[%s1888_s7 + $0x20] sm:$0xff]   ;;  %v1795_v18 = vld [vmem:[%s1888_s7 + $0x28] sm:$0xff]  }
  0x14   : > { %1696 = vmatpush3.bf16.msra.mxu0 %v1780_v3  ;;  %1748 = vmatpush3.bf16.msra.mxu1 %v1780_v3  ;;  %v1792_v15 = vld [vmem:[%s1888_s7 + $0x58] sm:$0xff]   ;;  %v1794_v17 = vld [vmem:[%s1888_s7 + $0x60] sm:$0xff]   ;;  %v1796_v19 = vld [vmem:[%s1888_s7 + $0x68] sm:$0xff]  }
  0x15   : > { %1697 = vmatprep.subr.bf16.mxu0 %v1781_v6  ;;  %1741 = vmatprep.subr.bf16.mxu1 %v1781_v6  ;;  %v1797_v20 = vld [vmem:[%s1888_s7 + $0x30] sm:$0xff]   ;;  %v1799_v22 = vld [vmem:[%s1888_s7 + $0x38] sm:$0xff]   ;;  %v1928_v24 = vld [vmem:[%s1925_s23 + $0x8] sm:$0xff]  }
  0x16   : > { %v1798_v21 = vld [vmem:[%s1888_s7 + $0x70] sm:$0xff]   ;;  %v1800_v23 = vld [vmem:[%s1888_s7 + $0x78] sm:$0xff]   ;;  %v1931_v25 = vld [vmem:[%s1925_s23 + $0x48] sm:$0xff]   ;;  %v1497_v32 = vunpack.c.l.bf16 %v1928_v24  ;;  %v1498_v37 = vunpack.c.h.bf16 %v1928_v24 }
  0x17   : > { %v1934_v26 = vld [vmem:[%s1925_s23] sm:$0xff]   ;;  %v1940_v28 = vld [vmem:[%s1925_s23 + $0x18] sm:$0xff]   ;;  %v1946_v30 = vld [vmem:[%s1925_s23 + $0x10] sm:$0xff]   ;;  %v1529_v33 = vunpack.c.l.bf16 %v1931_v25  ;;  %v1530_v38 = vunpack.c.h.bf16 %v1931_v25 }
  0x18   : > { %1698 = vmatpush3.bf16.msra.mxu0 %v1781_v6  ;;  %1749 = vmatpush3.bf16.msra.mxu1 %v1781_v6  ;;  %v1937_v27 = vld [vmem:[%s1925_s23 + $0x40] sm:$0xff]   ;;  %v1943_v29 = vld [vmem:[%s1925_s23 + $0x58] sm:$0xff]   ;;  %v1949_v31 = vld [vmem:[%s1925_s23 + $0x50] sm:$0xff]   ;;  %v1493_v34 = vunpack.c.l.bf16 %v1934_v26  ;;  %v1494_v39 = vunpack.c.h.bf16 %v1934_v26  ;;  %v1505_v45 = vunpack.c.l.bf16 %v1940_v28  ;;  %v1501_v47 = vunpack.c.l.bf16 %v1946_v30 }
  0x19   : > { %1699 = vmatprep.subr.bf16.mxu0 %v1782_v7  ;;  %1742 = vmatprep.subr.bf16.mxu1 %v1782_v7  ;;  %v1525_v35 = vunpack.c.l.bf16 %v1937_v27  ;;  %v1956_v36 = vld [vmem:[%s1925_s23 + $0x28] sm:$0xff]   ;;  %v1526_v40 = vunpack.c.h.bf16 %v1937_v27  ;;  %v1966_v42 = vld [vmem:[%s1925_s23 + $0x20] sm:$0xff]   ;;  %v1537_v46 = vunpack.c.l.bf16 %v1943_v29  ;;  %v1533_v48 = vunpack.c.l.bf16 %v1949_v31 }
  0x1a   : > { %v1963_v41 = vld [vmem:[%s1925_s23 + $0x68] sm:$0xff]   ;;  %v1969_v43 = vld [vmem:[%s1925_s23 + $0x60] sm:$0xff]   ;;  %v1506_v49 = vunpack.c.h.bf16 %v1940_v28  ;;  %v1538_v50 = vunpack.c.h.bf16 %v1943_v29  ;;  %v1502_v51 = vunpack.c.h.bf16 %v1946_v30  ;;  %v1534_v52 = vunpack.c.h.bf16 %v1949_v31 }
  0x1b   : > { %v1513_v56 = vunpack.c.l.bf16 %v1956_v36  ;;  %v1545_v57 = vunpack.c.l.bf16 %v1963_v41  ;;  %v1509_v58 = vunpack.c.l.bf16 %v1966_v42  ;;  %v1541_v59 = vunpack.c.l.bf16 %v1969_v43 }
  0x1c   : > { %1700 = vmatpush3.bf16.msra.mxu0 %v1782_v7  ;;  %1750 = vmatpush3.bf16.msra.mxu1 %v1782_v7  ;;  %v1514_v0 = vunpack.c.h.bf16 %v1956_v36  ;;  %v1546_v1 = vunpack.c.h.bf16 %v1963_v41  ;;  %v1510_v6 = vunpack.c.h.bf16 %v1966_v42  ;;  %v1542_v7 = vunpack.c.h.bf16 %v1969_v43 }
  0x1d   : > { %1701 = vmatprep.subr.bf16.mxu0 %v1783_v8  ;;  %1743 = vmatprep.subr.bf16.mxu1 %v1783_v8 }
  0x20   : > { %1702 = vmatpush3.bf16.msra.mxu0 %v1783_v8  ;;  %1751 = vmatpush3.bf16.msra.mxu1 %v1783_v8 }
  0x21   : > { %1703 = vmatprep.subr.bf16.mxu0 %v1784_v9  ;;  %1744 = vmatprep.subr.bf16.mxu1 %v1784_v9 }
  0x24   : > { %1704 = vmatpush3.bf16.msra.mxu0 %v1784_v9  ;;  %1752 = vmatpush3.bf16.msra.mxu1 %v1784_v9 }
  0x27   : > { %1706 = vmatmul.mubr.bf16.vlgmr.msra.gmra.mrb[0].mxu0 %v1787_v10  ;;  %1722 = vmatmul.mubr.bf16.vlgmr.msra.gmra.mrb[0].mxu1 %v1788_v11 }
  0x28   : > { %1709 = vmatprep.mubr.bf16.mxu0 %v1789_v12  ;;  %1725 = vmatprep.mubr.bf16.mxu1 %v1790_v13 }
  0x2f   : > { %1710 = vmatmul.mubr.bf16.gmra.mrb[4].mxu0 %v1791_v14  ;;  %1726 = vmatmul.mubr.bf16.gmra.mrb[4].mxu1 %v1792_v15 }
  0x30   : > { %1713 = vmatprep.mubr.bf16.mxu0 %v1793_v16  ;;  %1729 = vmatprep.mubr.bf16.mxu1 %v1794_v17 }
  0x37   : > { %1714 = vmatmul.mubr.bf16.gmra.mrb[8].mxu0 %v1795_v18  ;;  %1730 = vmatmul.mubr.bf16.gmra.mrb[8].mxu1 %v1796_v19 }
  0x38   : > { %1717 = vmatprep.mubr.bf16.mxu0 %v1797_v20  ;;  %1733 = vmatprep.mubr.bf16.mxu1 %v1798_v21 }
  0x3f   : > { %1718 = vmatmul.mubr.bf16.gmra.mrb[12].mxu0 %v1799_v22  ;;  %1734 = vmatmul.mubr.bf16.gmra.mrb[12].mxu1 %v1800_v23 }
  0xfa   : > { %v1707_v53 = vpop.f32.mrb[0].mxu0  ;;  %v1723_v55 = vpop.f32.mrb[0].mxu1 }
  0xfb   : > { %v890_v60 = vmul.f32 %v1707_v53, %v1974_v44  ;;  %v906_v61 = vmul.f32 %v1723_v55, %v1974_v44  ;;  %v655_v62 = vpop.f32.mrb[1].mxu0  ;;  %v719_v63 = vpop.f32.mrb[1].mxu1 }
  0xfc   : > { %v888_v2 = vmul.f32 %v1974_v44, %v655_v62  ;;  %v904_v3 = vmul.f32 %v1974_v44, %v719_v63  ;;  %v1708_v4 = vpop.f32.mrb[2].mxu0  ;;  %v1724_v5 = vpop.f32.mrb[2].mxu1 }
  0xfd   : > { %v929_v8 = vadd.f32 %v1987_v54, %v890_v60  ;;  %v945_v9 = vadd.f32 %v1987_v54, %v906_v61  ;;  %v891_v10 = vmul.f32 %v1708_v4, %v1974_v44  ;;  %v907_v11 = vmul.f32 %v1724_v5, %v1974_v44  ;;  %v658_v12 = vpop.f32.mrb[3].mxu0  ;;  %v722_v13 = vpop.f32.mrb[3].mxu1 }
  0xfe   : > { %v927_v14 = vadd.f32 %v1987_v54, %v888_v2  ;;  %v943_v15 = vadd.f32 %v1987_v54, %v904_v3  ;;  %v889_v16 = vmul.f32 %v1974_v44, %v658_v12  ;;  %v905_v17 = vmul.f32 %v1974_v44, %v722_v13 }
  0xff   : > { %v1025_v18 = vadd.f32 %v1497_v32, %v929_v8  ;;  %v1041_v19 = vadd.f32 %v1529_v33, %v945_v9  ;;  %v930_v20 = vadd.f32 %v1987_v54, %v891_v10  ;;  %v946_v21 = vadd.f32 %v1987_v54, %v907_v11 }
 0x100   : > { %v1023_v22 = vadd.f32 %v1493_v34, %v927_v14  ;;  %v1039_v23 = vadd.f32 %v1525_v35, %v943_v15  ;;  %v928_v24 = vadd.f32 %v1987_v54, %v889_v16  ;;  %v944_v25 = vadd.f32 %v1987_v54, %v905_v17 }
 0x101   : > { %v1057_v26 = vmax.f32 %v1025_v18, 0.0  ;;  %v1073_v27 = vmax.f32 %v1041_v19, 0.0  ;;  %v1026_v53 = vadd.f32 %v1498_v37, %v930_v20  ;;  %v1042_v55 = vadd.f32 %v1530_v38, %v946_v21 }
 0x102   : > { %v1055_v60 = vmax.f32 %v1023_v22, 0.0  ;;  %v1071_v61 = vmax.f32 %v1039_v23, 0.0  ;;  %v1024_v62 = vadd.f32 %v1494_v39, %v928_v24  ;;  %v1040_v32 = vadd.f32 %v1526_v40, %v944_v25  ;;  %v1711_v33 = vpop.f32.mrb[4].mxu0  ;;  %v1727_v63 = vpop.f32.mrb[4].mxu1 }
 0x103   : > { %v1058_v2 = vmax.f32 %v1026_v53, 0.0  ;;  %v1074_v3 = vmax.f32 %v1042_v55, 0.0  ;;  %v894_v34 = vmul.f32 %v1711_v33, %v1974_v44  ;;  %v910_v35 = vmul.f32 %v1727_v63, %v1974_v44  ;;  %v671_v4 = vpop.f32.mrb[5].mxu0  ;;  %v735_v5 = vpop.f32.mrb[5].mxu1 }
 0x104   : > { %v1056_v37 = vmax.f32 %v1024_v62, 0.0  ;;  %v1072_v38 = vmax.f32 %v1040_v32, 0.0  ;;  %v892_v39 = vmul.f32 %v1974_v44, %v671_v4  ;;  %v908_v40 = vmul.f32 %v1974_v44, %v735_v5  ;;  %v1712_v8 = vpop.f32.mrb[6].mxu0  ;;  %v1728_v9 = vpop.f32.mrb[6].mxu1 }
 0x105   : > { %v1563_v10 = vpack.c.bf16 %v1058_v2, %v1057_v26  ;;  %v1603_v11 = vpack.c.bf16 %v1074_v3, %v1073_v27  ;;  %v933_v12 = vadd.f32 %v1987_v54, %v894_v34  ;;  %v949_v13 = vadd.f32 %v1987_v54, %v910_v35  ;;  %v674_v14 = vpop.f32.mrb[7].mxu0  ;;  %v738_v15 = vpop.f32.mrb[7].mxu1 }
 0x106   : > { %v1558_v16 = vpack.c.bf16 %v1056_v37, %v1055_v60  ;;  %v1598_v17 = vpack.c.bf16 %v1072_v38, %v1071_v61  ;;  %v931_v18 = vadd.f32 %v1987_v54, %v892_v39  ;;  %v947_v19 = vadd.f32 %v1987_v54, %v908_v40  ;;  %v2060_v37 = vld [vmem:[%s1925_s23 + $0x38] sm:$0xff]  }
 0x107   : > { %1650 = vst [vmem:[%s2019_s6 + $0x8] sm:$0xff] %v1563_v10   ;;  %1658 = vst [vmem:[%s2019_s6 + $0x48] sm:$0xff] %v1603_v11   ;;  %v1029_v20 = vadd.f32 %v1505_v45, %v933_v12  ;;  %v1045_v21 = vadd.f32 %v1537_v46, %v949_v13  ;;  %v895_v22 = vmul.f32 %v1712_v8, %v1974_v44  ;;  %v2063_v38 = vld [vmem:[%s1925_s23 + $0x78] sm:$0xff]   ;;  %v1522_v43 = vunpack.c.h.bf16 %v2060_v37 }
 0x108   : > { %v911_v23 = vmul.f32 %v1728_v9, %v1974_v44  ;;  %1559 = vst [vmem:[%s2019_s6] sm:$0xff] %v1558_v16   ;;  %1657 = vst [vmem:[%s2019_s6 + $0x40] sm:$0xff] %v1598_v17   ;;  %v1027_v24 = vadd.f32 %v1501_v47, %v931_v18  ;;  %v1043_v25 = vadd.f32 %v1533_v48, %v947_v19  ;;  %v2071_v9 = vld [vmem:[%s1925_s23 + $0x70] sm:$0xff]   ;;  %v1521_v16 = vunpack.c.l.bf16 %v2060_v37 }
 0x109   : > { %v893_v26 = vmul.f32 %v1974_v44, %v674_v14  ;;  %v909_v27 = vmul.f32 %v1974_v44, %v738_v15  ;;  %v1061_v45 = vmax.f32 %v1029_v20, 0.0  ;;  %v1077_v53 = vmax.f32 %v1045_v21, 0.0 }
 0x10a   : > { %v934_v46 = vadd.f32 %v1987_v54, %v895_v22  ;;  %v950_v55 = vadd.f32 %v1987_v54, %v911_v23  ;;  %v1059_v60 = vmax.f32 %v1027_v24, 0.0  ;;  %v1075_v61 = vmax.f32 %v1043_v25, 0.0  ;;  %v1715_v32 = vpop.f32.mrb[8].mxu0  ;;  %v1731_v48 = vpop.f32.mrb[8].mxu1 }
 0x10b   : > { %v932_v62 = vadd.f32 %v1987_v54, %v893_v26  ;;  %v948_v47 = vadd.f32 %v1987_v54, %v909_v27  ;;  %v898_v2 = vmul.f32 %v1715_v32, %v1974_v44  ;;  %v914_v3 = vmul.f32 %v1731_v48, %v1974_v44  ;;  %v687_v34 = vpop.f32.mrb[9].mxu0  ;;  %v751_v35 = vpop.f32.mrb[9].mxu1 }
 0x10c   : > { %v1030_v33 = vadd.f32 %v1506_v49, %v934_v46  ;;  %v1046_v63 = vadd.f32 %v1538_v50, %v950_v55  ;;  %v896_v28 = vmul.f32 %v1974_v44, %v687_v34  ;;  %v912_v49 = vmul.f32 %v1974_v44, %v751_v35  ;;  %v1716_v29 = vpop.f32.mrb[10].mxu0  ;;  %v1732_v50 = vpop.f32.mrb[10].mxu1 }
 0x10d   : > { %v1028_v4 = vadd.f32 %v1502_v51, %v932_v62  ;;  %v1044_v5 = vadd.f32 %v1534_v52, %v948_v47  ;;  %v937_v8 = vadd.f32 %v1987_v54, %v898_v2  ;;  %v953_v30 = vadd.f32 %v1987_v54, %v914_v3  ;;  %v690_v51 = vpop.f32.mrb[11].mxu0  ;;  %v754_v31 = vpop.f32.mrb[11].mxu1  ;;  %v2068_v52 = vld [vmem:[%s1925_s23 + $0x30] sm:$0xff]  }
 0x10e   : > { %v1062_v39 = vmax.f32 %v1030_v33, 0.0  ;;  %v1078_v40 = vmax.f32 %v1046_v63, 0.0  ;;  %v935_v12 = vadd.f32 %v1987_v54, %v896_v28  ;;  %v951_v13 = vadd.f32 %v1987_v54, %v912_v49 }
 0x10f   : > { %v1060_v10 = vmax.f32 %v1028_v4, 0.0  ;;  %v1076_v11 = vmax.f32 %v1044_v5, 0.0  ;;  %v1553_v17 = vunpack.c.l.bf16 %v2063_v38  ;;  %v1517_v20 = vunpack.c.l.bf16 %v2068_v52 }
 0x110   : > { %v1573_v14 = vpack.c.bf16 %v1062_v39, %v1061_v45  ;;  %v1613_v15 = vpack.c.bf16 %v1078_v40, %v1077_v53  ;;  %v1549_v21 = vunpack.c.l.bf16 %v2071_v9  ;;  %v1033_v22 = vadd.f32 %v1513_v56, %v937_v8 }
 0x111   : > { %v1568_v18 = vpack.c.bf16 %v1060_v10, %v1059_v60  ;;  %v1608_v19 = vpack.c.bf16 %v1076_v11, %v1075_v61  ;;  %v1049_v23 = vadd.f32 %v1545_v57, %v953_v30  ;;  %v899_v24 = vmul.f32 %v1716_v29, %v1974_v44 }
 0x112   : > { %1652 = vst [vmem:[%s2019_s6 + $0x18] sm:$0xff] %v1573_v14   ;;  %1660 = vst [vmem:[%s2019_s6 + $0x58] sm:$0xff] %v1613_v15   ;;  %v915_v25 = vmul.f32 %v1732_v50, %v1974_v44  ;;  %v1031_v26 = vadd.f32 %v1509_v58, %v935_v12  ;;  %v1047_v27 = vadd.f32 %v1541_v59, %v951_v13  ;;  %v1719_v56 = vpop.f32.mrb[12].mxu0  ;;  %v1735_v46 = vpop.f32.mrb[12].mxu1  ;;  %v1065_v2 = vmax.f32 %v1033_v22, 0.0 }
 0x113   : > { %1651 = vst [vmem:[%s2019_s6 + $0x10] sm:$0xff] %v1568_v18   ;;  %1659 = vst [vmem:[%s2019_s6 + $0x50] sm:$0xff] %v1608_v19   ;;  %v897_v45 = vmul.f32 %v1974_v44, %v690_v51  ;;  %v913_v53 = vmul.f32 %v1974_v44, %v754_v31  ;;  %v938_v57 = vadd.f32 %v1987_v54, %v899_v24  ;;  %v703_v62 = vpop.f32.mrb[13].mxu0  ;;  %v767_v47 = vpop.f32.mrb[13].mxu1  ;;  %v1081_v3 = vmax.f32 %v1049_v23, 0.0 }
 0x114   : > { %v954_v55 = vadd.f32 %v1987_v54, %v915_v25  ;;  %v902_v60 = vmul.f32 %v1719_v56, %v1974_v44  ;;  %v918_v61 = vmul.f32 %v1735_v46, %v1974_v44  ;;  %v900_v32 = vmul.f32 %v1974_v44, %v703_v62  ;;  %v1720_v33 = vpop.f32.mrb[14].mxu0  ;;  %v1736_v63 = vpop.f32.mrb[14].mxu1 }
 0x115   : > { %v936_v58 = vadd.f32 %v1987_v54, %v897_v45  ;;  %v952_v59 = vadd.f32 %v1987_v54, %v913_v53  ;;  %v916_v48 = vmul.f32 %v1974_v44, %v767_v47  ;;  %v1034_v34 = vadd.f32 %v1514_v0, %v938_v57  ;;  %v706_v4 = vpop.f32.mrb[15].mxu0  ;;  %v770_v5 = vpop.f32.mrb[15].mxu1 }
 0x116   : > { %v1050_v35 = vadd.f32 %v1546_v1, %v954_v55  ;;  %v1063_v28 = vmax.f32 %v1031_v26, 0.0  ;;  %v1079_v49 = vmax.f32 %v1047_v27, 0.0  ;;  %v941_v36 = vadd.f32 %v1987_v54, %v902_v60 }
 0x117   : > { %v1032_v29 = vadd.f32 %v1510_v6, %v936_v58  ;;  %v1048_v50 = vadd.f32 %v1542_v7, %v952_v59  ;;  %v1066_v39 = vmax.f32 %v1034_v34, 0.0  ;;  %v957_v0 = vadd.f32 %v1987_v54, %v918_v61 }
 0x118   : > { %v1082_v40 = vmax.f32 %v1050_v35, 0.0  ;;  %v939_v8 = vadd.f32 %v1987_v54, %v900_v32  ;;  %v955_v30 = vadd.f32 %v1987_v54, %v916_v48  ;;  %v1554_v7 = vunpack.c.h.bf16 %v2063_v38 }
 0x119   : > { %v1064_v41 = vmax.f32 %v1032_v29, 0.0  ;;  %v1080_v1 = vmax.f32 %v1048_v50, 0.0  ;;  %v1583_v42 = vpack.c.bf16 %v1066_v39, %v1065_v2  ;;  %v1518_v10 = vunpack.c.h.bf16 %v2068_v52 }
 0x11a   : > { %v1623_v6 = vpack.c.bf16 %v1082_v40, %v1081_v3  ;;  %v1550_v11 = vunpack.c.h.bf16 %v2071_v9  ;;  %v903_v12 = vmul.f32 %v1720_v33, %v1974_v44  ;;  %v919_v13 = vmul.f32 %v1736_v63, %v1974_v44 }
 0x11b   : > { %v1578_v51 = vpack.c.bf16 %v1064_v41, %v1063_v28  ;;  %v1618_v31 = vpack.c.bf16 %v1080_v1, %v1079_v49  ;;  %1654 = vst [vmem:[%s2019_s6 + $0x28] sm:$0xff] %v1583_v42   ;;  %v901_v14 = vmul.f32 %v1974_v44, %v706_v4  ;;  %v917_v15 = vmul.f32 %v1974_v44, %v770_v5 }
 0x11c   : > { %1662 = vst [vmem:[%s2019_s6 + $0x68] sm:$0xff] %v1623_v6   ;;  %v1037_v18 = vadd.f32 %v1521_v16, %v941_v36  ;;  %v1053_v19 = vadd.f32 %v1553_v17, %v957_v0  ;;  %v1035_v22 = vadd.f32 %v1517_v20, %v939_v8  ;;  %v1051_v23 = vadd.f32 %v1549_v21, %v955_v30 }
 0x11d   : > { %1653 = vst [vmem:[%s2019_s6 + $0x20] sm:$0xff] %v1578_v51   ;;  %1661 = vst [vmem:[%s2019_s6 + $0x60] sm:$0xff] %v1618_v31   ;;  %v942_v24 = vadd.f32 %v1987_v54, %v903_v12  ;;  %v958_v25 = vadd.f32 %v1987_v54, %v919_v13  ;;  %v940_v44 = vadd.f32 %v1987_v54, %v901_v14 }
 0x11e   : > { %v956_v26 = vadd.f32 %v1987_v54, %v917_v15  ;;  %v1069_v52 = vmax.f32 %v1037_v18, 0.0  ;;  %v1085_v17 = vmax.f32 %v1053_v19, 0.0  ;;  %v1067_v9 = vmax.f32 %v1035_v22, 0.0 }
 0x11f   : > { %v1038_v27 = vadd.f32 %v1522_v43, %v942_v24  ;;  %v1054_v37 = vadd.f32 %v1554_v7, %v958_v25  ;;  %v1036_v38 = vadd.f32 %v1518_v10, %v940_v44  ;;  %v1083_v20 = vmax.f32 %v1051_v23, 0.0 }
 0x120   : > { %v1052_v16 = vadd.f32 %v1550_v11, %v956_v26 }
 0x121   : > { %v1070_v21 = vmax.f32 %v1038_v27, 0.0  ;;  %v1086_v45 = vmax.f32 %v1054_v37, 0.0  ;;  %v1068_v53 = vmax.f32 %v1036_v38, 0.0 }
 0x122   : > { %v1084_v56 = vmax.f32 %v1052_v16, 0.0 }
 0x123   : > { %v1593_v46 = vpack.c.bf16 %v1070_v21, %v1069_v52  ;;  %v1633_v57 = vpack.c.bf16 %v1086_v45, %v1085_v17  ;;  %v1588_v55 = vpack.c.bf16 %v1068_v53, %v1067_v9 }
 0x124   : > { %v1628_v54 = vpack.c.bf16 %v1084_v56, %v1083_v20 }
 0x125   : > { %1656 = vst [vmem:[%s2019_s6 + $0x38] sm:$0xff] %v1593_v46   ;;  %1664 = vst [vmem:[%s2019_s6 + $0x78] sm:$0xff] %v1633_v57  }
 0x126   : > { %1655 = vst [vmem:[%s2019_s6 + $0x30] sm:$0xff] %v1588_v55   ;;  %1663 = vst [vmem:[%s2019_s6 + $0x70] sm:$0xff] %v1628_v54  }
 0x127 PF: > { %s15_s20 = sadd.s32 1, %s1823_s20   ;;  %s2158_s18 = smov %s1819_s19 }
 0x128   : > { %p12_p5 = scmp.ge.s32.totalorder %s15_s20, 4   ;;  %s2159_s19 = smov %s2161_s21 }
 0x12a   :  { %14 = sbr.rel (!%p12_p5) target bundleno = 2 (0x2), region = 90 }

// kernel: pspnet_forward.17
= control target key start
LH: loop header
LB: loop body
LE: loop exit
PB: predicated region body
PF: predicated region fallthrough
CT: control target
= control target key end

     0   :  { %s1598_s15 = smov 0   ;;  %s1600_s16 = smov 0   ;;  %s1772_s0 = inlined_call_operand.vmem [shape: bf16[512,128], index: 0, kind: input, shape index: {}]   ;;  %s1773_s1 = inlined_call_operand.vmem [shape: bf16[128,128], index: 1, kind: input, shape index: {}]   ;;  %s1774_s2 = inlined_call_operand.vmem [shape: f32[1,128], index: 2, kind: input, shape index: {}]   ;;  %s1775_s3 = inlined_call_operand.vmem [shape: f32[1,128], index: 3, kind: input, shape index: {}]   ;;  %s1776_s4 = inlined_call_operand.vmem [shape: bf16[512,128], index: 4, kind: output, shape index: {}]  }
   0x1   :  { %s1602_s17 = smov 0  }
   0x2 LB: > { %s33_s18 = sadd.s32 1, %s1567_s16  ;;  %p1221_p0 = scmp.ge.s32.totalorder %s1571_s17, 1  ;;  %s1571_s17 = sphi %s1602_s17, %s14_s17   ;;  %s1567_s16 = sphi %s1600_s16, %s1778_s16   ;;  %s1563_s15 = sphi %s1598_s15, %s1777_s15  }
   0x3   : > { %p35_p1 = scmp.ge.s32.totalorder %s33_s18, 2  ;;  %p221_p2 = scmp.lt.s32.totalorder %s1571_s17, 3 }
   0x5   : > { %s1780_s18 = smov (%p35_p1, %s33_s18), 0  ;;  %p222_p3 = pnand %p1221_p0, %p221_p2 }
   0x6   : > { %v1525_v0 = vld [vmem:[%s1773_s1] sm:$0xff] (!%p222_p3)   ;;  %s1222_s21 = sshll.u32 (!%p222_p3), %s1563_s15, 5  ;;  %v1526_v1 = vld [vmem:[%s1773_s1 + $0x8] sm:$0xff] (!%p222_p3)   ;;  %v1527_v2 = vld [vmem:[%s1773_s1 + $0x10] sm:$0xff] (!%p222_p3)  }
   0x7   : > { %225 = sbr.rel (%p222_p3) target bundleno = 288 (0x120), region = 36  ;;  %p268_p4 = scmp.lt.s32.totalorder (!%p222_p3), %s1222_s21, 63  ;;  %1437 = vmatprep.subr.bf16.mxu0 (!%p222_p3), %v1525_v0  ;;  %1485 = vmatprep.subr.bf16.mxu1 (!%p222_p3), %v1525_v0  ;;  %v1528_v3 = vld [vmem:[%s1773_s1 + $0x18] sm:$0xff] (!%p222_p3)   ;;  %v1529_v6 = vld [vmem:[%s1773_s1 + $0x20] sm:$0xff] (!%p222_p3)   ;;  %v1530_v7 = vld [vmem:[%s1773_s1 + $0x28] sm:$0xff] (!%p222_p3)  }
   0x8   : > { %1438 = vmatpush3.bf16.msra.mxu0 (!%p222_p3), %v1525_v0  ;;  %1493 = vmatpush3.bf16.msra.mxu1 (!%p222_p3), %v1525_v0  ;;  %v1531_v8 = vld [vmem:[%s1773_s1 + $0x30] sm:$0xff] (!%p222_p3)   ;;  %v1532_v9 = vld [vmem:[%s1773_s1 + $0x38] sm:$0xff] (!%p222_p3)   ;;  %v1669_v24 = vld [vmem:[%s1774_s2] ss:$0 sm:$0xff] (!%p222_p3) }
   0x9   : > { %1439 = vmatprep.subr.bf16.mxu0 (!%p222_p3), %v1526_v1  ;;  %1486 = vmatprep.subr.bf16.mxu1 (!%p222_p3), %v1526_v1  ;;  %v1674_v26 = vld [vmem:[%s1775_s3] ss:$0 sm:$0xff] (!%p222_p3) }
   0xc   : > { %1440 = vmatpush3.bf16.msra.mxu0 (!%p222_p3), %v1526_v1  ;;  %1494 = vmatpush3.bf16.msra.mxu1 (!%p222_p3), %v1526_v1 }
   0xd   : > { %1441 = vmatprep.subr.bf16.mxu0 (!%p222_p3), %v1527_v2  ;;  %1487 = vmatprep.subr.bf16.mxu1 (!%p222_p3), %v1527_v2 }
   0xe   : > { %s1782_s21 = smov (!%p268_p4, %s1222_s21), 63 }
   0xf   : > { %s1223_s26 = sshll.u32 %s1782_s21, 2 }
  0x10   : > { %s1633_s29 = scalar_lea.vmem %s1772_s0, %s1223_s26  ;;  %1442 = vmatpush3.bf16.msra.mxu0 %v1527_v2  ;;  %1495 = vmatpush3.bf16.msra.mxu1 %v1527_v2  ;;  %s1697_s24 = scalar_lea.vmem %s1776_s4, %s1223_s26 }
  0x11   : > { %v1533_v4 = vld [vmem:[%s1633_s29] sm:$0xff]   ;;  %1443 = vmatprep.subr.bf16.mxu0 %v1528_v3  ;;  %1488 = vmatprep.subr.bf16.mxu1 %v1528_v3  ;;  %v1535_v10 = vld [vmem:[%s1633_s29 + $0x8] sm:$0xff]   ;;  %v1537_v12 = vld [vmem:[%s1633_s29 + $0x10] sm:$0xff]  }
  0x12   : > { %v1534_v5 = vld [vmem:[%s1633_s29 + $0x40] sm:$0xff]   ;;  %1453 = vmatprep.mubr.bf16.mxu0 %v1533_v4  ;;  %v1536_v11 = vld [vmem:[%s1633_s29 + $0x48] sm:$0xff]   ;;  %v1538_v13 = vld [vmem:[%s1633_s29 + $0x50] sm:$0xff]  }
  0x13   : > { %1469 = vmatprep.mubr.bf16.mxu1 %v1534_v5  ;;  %v1539_v14 = vld [vmem:[%s1633_s29 + $0x18] sm:$0xff]   ;;  %v1541_v16 = vld [vmem:[%s1633_s29 + $0x20] sm:$0xff]   ;;  %v1543_v18 = vld [vmem:[%s1633_s29 + $0x28] sm:$0xff]  }
  0x14   : > { %1444 = vmatpush3.bf16.msra.mxu0 %v1528_v3  ;;  %1496 = vmatpush3.bf16.msra.mxu1 %v1528_v3  ;;  %v1540_v15 = vld [vmem:[%s1633_s29 + $0x58] sm:$0xff]   ;;  %v1542_v17 = vld [vmem:[%s1633_s29 + $0x60] sm:$0xff]   ;;  %v1544_v19 = vld [vmem:[%s1633_s29 + $0x68] sm:$0xff]  }
  0x15   : > { %1445 = vmatprep.subr.bf16.mxu0 %v1529_v6  ;;  %1489 = vmatprep.subr.bf16.mxu1 %v1529_v6  ;;  %v1545_v20 = vld [vmem:[%s1633_s29 + $0x30] sm:$0xff]   ;;  %v1547_v22 = vld [vmem:[%s1633_s29 + $0x38] sm:$0xff]  }
  0x16   : > { %v1546_v21 = vld [vmem:[%s1633_s29 + $0x70] sm:$0xff]   ;;  %v1548_v23 = vld [vmem:[%s1633_s29 + $0x78] sm:$0xff]  }
  0x18   : > { %1446 = vmatpush3.bf16.msra.mxu0 %v1529_v6  ;;  %1497 = vmatpush3.bf16.msra.mxu1 %v1529_v6 }
  0x19   : > { %1447 = vmatprep.subr.bf16.mxu0 %v1530_v7  ;;  %1490 = vmatprep.subr.bf16.mxu1 %v1530_v7 }
  0x1c   : > { %1448 = vmatpush3.bf16.msra.mxu0 %v1530_v7  ;;  %1498 = vmatpush3.bf16.msra.mxu1 %v1530_v7 }
  0x1d   : > { %1449 = vmatprep.subr.bf16.mxu0 %v1531_v8  ;;  %1491 = vmatprep.subr.bf16.mxu1 %v1531_v8 }
  0x20   : > { %1450 = vmatpush3.bf16.msra.mxu0 %v1531_v8  ;;  %1499 = vmatpush3.bf16.msra.mxu1 %v1531_v8 }
  0x21   : > { %1451 = vmatprep.subr.bf16.mxu0 %v1532_v9  ;;  %1492 = vmatprep.subr.bf16.mxu1 %v1532_v9 }
  0x24   : > { %1452 = vmatpush3.bf16.msra.mxu0 %v1532_v9  ;;  %1500 = vmatpush3.bf16.msra.mxu1 %v1532_v9 }
  0x27   : > { %1454 = vmatmul.mubr.bf16.vlgmr.msra.gmra.mrb[0].mxu0 %v1535_v10  ;;  %1470 = vmatmul.mubr.bf16.vlgmr.msra.gmra.mrb[0].mxu1 %v1536_v11 }
  0x28   : > { %1457 = vmatprep.mubr.bf16.mxu0 %v1537_v12  ;;  %1473 = vmatprep.mubr.bf16.mxu1 %v1538_v13 }
  0x2f   : > { %1458 = vmatmul.mubr.bf16.gmra.mrb[4].mxu0 %v1539_v14  ;;  %1474 = vmatmul.mubr.bf16.gmra.mrb[4].mxu1 %v1540_v15 }
  0x30   : > { %1461 = vmatprep.mubr.bf16.mxu0 %v1541_v16  ;;  %1477 = vmatprep.mubr.bf16.mxu1 %v1542_v17 }
  0x37   : > { %1462 = vmatmul.mubr.bf16.gmra.mrb[8].mxu0 %v1543_v18  ;;  %1478 = vmatmul.mubr.bf16.gmra.mrb[8].mxu1 %v1544_v19 }
  0x38   : > { %1465 = vmatprep.mubr.bf16.mxu0 %v1545_v20  ;;  %1481 = vmatprep.mubr.bf16.mxu1 %v1546_v21 }
  0x3f   : > { %1466 = vmatmul.mubr.bf16.gmra.mrb[12].mxu0 %v1547_v22  ;;  %1482 = vmatmul.mubr.bf16.gmra.mrb[12].mxu1 %v1548_v23 }
  0xfa   : > { %v1455_v25 = vpop.f32.mrb[0].mxu0  ;;  %v1471_v27 = vpop.f32.mrb[0].mxu1 }
  0xfb   : > { %v830_v28 = vmul.f32 %v1455_v25, %v1669_v24  ;;  %v846_v29 = vmul.f32 %v1471_v27, %v1669_v24  ;;  %v595_v30 = vpop.f32.mrb[1].mxu0  ;;  %v659_v31 = vpop.f32.mrb[1].mxu1 }
  0xfc   : > { %v828_v32 = vmul.f32 %v1669_v24, %v595_v30  ;;  %v844_v33 = vmul.f32 %v1669_v24, %v659_v31  ;;  %v1456_v34 = vpop.f32.mrb[2].mxu0  ;;  %v1472_v35 = vpop.f32.mrb[2].mxu1 }
  0xfd   : > { %v869_v36 = vadd.f32 %v1674_v26, %v830_v28  ;;  %v885_v37 = vadd.f32 %v1674_v26, %v846_v29  ;;  %v831_v38 = vmul.f32 %v1456_v34, %v1669_v24  ;;  %v847_v39 = vmul.f32 %v1472_v35, %v1669_v24  ;;  %v598_v40 = vpop.f32.mrb[3].mxu0  ;;  %v662_v41 = vpop.f32.mrb[3].mxu1 }
  0xfe   : > { %v867_v42 = vadd.f32 %v1674_v26, %v828_v32  ;;  %v883_v43 = vadd.f32 %v1674_v26, %v844_v33  ;;  %v829_v44 = vmul.f32 %v1669_v24, %v598_v40  ;;  %v845_v45 = vmul.f32 %v1669_v24, %v662_v41 }
  0xff   : > { %v870_v46 = vadd.f32 %v1674_v26, %v831_v38  ;;  %v886_v47 = vadd.f32 %v1674_v26, %v847_v39  ;;  %v901_v50 = vmax.f32 %v869_v36, 0.0  ;;  %v917_v51 = vmax.f32 %v885_v37, 0.0 }
 0x100   : > { %v868_v48 = vadd.f32 %v1674_v26, %v829_v44  ;;  %v884_v49 = vadd.f32 %v1674_v26, %v845_v45  ;;  %v899_v54 = vmax.f32 %v867_v42, 0.0  ;;  %v915_v55 = vmax.f32 %v883_v43, 0.0 }
 0x101   : > { %v902_v52 = vmax.f32 %v870_v46, 0.0  ;;  %v918_v53 = vmax.f32 %v886_v47, 0.0 }
 0x102   : > { %v900_v56 = vmax.f32 %v868_v48, 0.0  ;;  %v916_v57 = vmax.f32 %v884_v49, 0.0  ;;  %v1459_v58 = vpop.f32.mrb[4].mxu0  ;;  %v1475_v59 = vpop.f32.mrb[4].mxu1 }
 0x103   : > { %v1326_v60 = vpack.c.bf16 %v902_v52, %v901_v50  ;;  %v1366_v61 = vpack.c.bf16 %v918_v53, %v917_v51  ;;  %v834_v62 = vmul.f32 %v1459_v58, %v1669_v24  ;;  %v850_v63 = vmul.f32 %v1475_v59, %v1669_v24  ;;  %v611_v0 = vpop.f32.mrb[5].mxu0  ;;  %v675_v1 = vpop.f32.mrb[5].mxu1 }
 0x104   : > { %v1321_v2 = vpack.c.bf16 %v900_v56, %v899_v54  ;;  %v1361_v3 = vpack.c.bf16 %v916_v57, %v915_v55  ;;  %v832_v4 = vmul.f32 %v1669_v24, %v611_v0  ;;  %v848_v5 = vmul.f32 %v1669_v24, %v675_v1  ;;  %v1460_v6 = vpop.f32.mrb[6].mxu0  ;;  %v1476_v7 = vpop.f32.mrb[6].mxu1 }
 0x105   : > { %1398 = vst [vmem:[%s1697_s24 + $0x8] sm:$0xff] %v1326_v60   ;;  %1406 = vst [vmem:[%s1697_s24 + $0x48] sm:$0xff] %v1366_v61   ;;  %v873_v8 = vadd.f32 %v1674_v26, %v834_v62  ;;  %v889_v9 = vadd.f32 %v1674_v26, %v850_v63  ;;  %v835_v10 = vmul.f32 %v1460_v6, %v1669_v24  ;;  %v614_v12 = vpop.f32.mrb[7].mxu0  ;;  %v678_v13 = vpop.f32.mrb[7].mxu1 }
 0x106   : > { %v851_v11 = vmul.f32 %v1476_v7, %v1669_v24  ;;  %1322 = vst [vmem:[%s1697_s24] sm:$0xff] %v1321_v2   ;;  %1405 = vst [vmem:[%s1697_s24 + $0x40] sm:$0xff] %v1361_v3   ;;  %v871_v14 = vadd.f32 %v1674_v26, %v832_v4  ;;  %v887_v15 = vadd.f32 %v1674_v26, %v848_v5 }
 0x107   : > { %v833_v16 = vmul.f32 %v1669_v24, %v614_v12  ;;  %v849_v17 = vmul.f32 %v1669_v24, %v678_v13  ;;  %v874_v18 = vadd.f32 %v1674_v26, %v835_v10  ;;  %v905_v22 = vmax.f32 %v873_v8, 0.0 }
 0x108   : > { %v890_v19 = vadd.f32 %v1674_v26, %v851_v11  ;;  %v921_v23 = vmax.f32 %v889_v9, 0.0  ;;  %v903_v28 = vmax.f32 %v871_v14, 0.0  ;;  %v919_v29 = vmax.f32 %v887_v15, 0.0 }
 0x109   : > { %v872_v20 = vadd.f32 %v1674_v26, %v833_v16  ;;  %v888_v21 = vadd.f32 %v1674_v26, %v849_v17  ;;  %v906_v25 = vmax.f32 %v874_v18, 0.0 }
 0x10a   : > { %v922_v27 = vmax.f32 %v890_v19, 0.0  ;;  %v1463_v32 = vpop.f32.mrb[8].mxu0  ;;  %v1479_v33 = vpop.f32.mrb[8].mxu1 }
 0x10b   : > { %v904_v30 = vmax.f32 %v872_v20, 0.0  ;;  %v920_v31 = vmax.f32 %v888_v21, 0.0  ;;  %v1336_v34 = vpack.c.bf16 %v906_v25, %v905_v22  ;;  %v838_v36 = vmul.f32 %v1463_v32, %v1669_v24  ;;  %v627_v38 = vpop.f32.mrb[9].mxu0  ;;  %v691_v39 = vpop.f32.mrb[9].mxu1 }
 0x10c   : > { %v1376_v35 = vpack.c.bf16 %v922_v27, %v921_v23  ;;  %v854_v37 = vmul.f32 %v1479_v33, %v1669_v24  ;;  %v836_v42 = vmul.f32 %v1669_v24, %v627_v38  ;;  %v852_v43 = vmul.f32 %v1669_v24, %v691_v39  ;;  %v1464_v44 = vpop.f32.mrb[10].mxu0  ;;  %v1480_v45 = vpop.f32.mrb[10].mxu1 }
 0x10d   : > { %v1331_v40 = vpack.c.bf16 %v904_v30, %v903_v28  ;;  %v1371_v41 = vpack.c.bf16 %v920_v31, %v919_v29  ;;  %1400 = vst [vmem:[%s1697_s24 + $0x18] sm:$0xff] %v1336_v34   ;;  %v877_v46 = vadd.f32 %v1674_v26, %v838_v36  ;;  %v839_v48 = vmul.f32 %v1464_v44, %v1669_v24  ;;  %v630_v50 = vpop.f32.mrb[11].mxu0  ;;  %v694_v51 = vpop.f32.mrb[11].mxu1 }
 0x10e   : > { %1408 = vst [vmem:[%s1697_s24 + $0x58] sm:$0xff] %v1376_v35   ;;  %v893_v47 = vadd.f32 %v1674_v26, %v854_v37  ;;  %v855_v49 = vmul.f32 %v1480_v45, %v1669_v24  ;;  %v875_v52 = vadd.f32 %v1674_v26, %v836_v42  ;;  %v891_v53 = vadd.f32 %v1674_v26, %v852_v43 }
 0x10f   : > { %1399 = vst [vmem:[%s1697_s24 + $0x10] sm:$0xff] %v1331_v40   ;;  %1407 = vst [vmem:[%s1697_s24 + $0x50] sm:$0xff] %v1371_v41   ;;  %v837_v54 = vmul.f32 %v1669_v24, %v630_v50  ;;  %v853_v55 = vmul.f32 %v1669_v24, %v694_v51  ;;  %v878_v56 = vadd.f32 %v1674_v26, %v839_v48  ;;  %v909_v60 = vmax.f32 %v877_v46, 0.0 }
 0x110   : > { %v894_v57 = vadd.f32 %v1674_v26, %v855_v49  ;;  %v925_v61 = vmax.f32 %v893_v47, 0.0  ;;  %v907_v0 = vmax.f32 %v875_v52, 0.0  ;;  %v923_v1 = vmax.f32 %v891_v53, 0.0 }
 0x111   : > { %v876_v58 = vadd.f32 %v1674_v26, %v837_v54  ;;  %v892_v59 = vadd.f32 %v1674_v26, %v853_v55  ;;  %v910_v62 = vmax.f32 %v878_v56, 0.0 }
 0x112   : > { %v926_v63 = vmax.f32 %v894_v57, 0.0  ;;  %v1467_v4 = vpop.f32.mrb[12].mxu0  ;;  %v1483_v5 = vpop.f32.mrb[12].mxu1 }
 0x113   : > { %v908_v2 = vmax.f32 %v876_v58, 0.0  ;;  %v924_v3 = vmax.f32 %v892_v59, 0.0  ;;  %v1346_v6 = vpack.c.bf16 %v910_v62, %v909_v60  ;;  %v842_v8 = vmul.f32 %v1467_v4, %v1669_v24  ;;  %v643_v10 = vpop.f32.mrb[13].mxu0  ;;  %v707_v11 = vpop.f32.mrb[13].mxu1 }
 0x114   : > { %v1386_v7 = vpack.c.bf16 %v926_v63, %v925_v61  ;;  %v858_v9 = vmul.f32 %v1483_v5, %v1669_v24  ;;  %v840_v14 = vmul.f32 %v1669_v24, %v643_v10  ;;  %v856_v15 = vmul.f32 %v1669_v24, %v707_v11  ;;  %v1468_v16 = vpop.f32.mrb[14].mxu0  ;;  %v1484_v17 = vpop.f32.mrb[14].mxu1 }
 0x115   : > { %v1341_v12 = vpack.c.bf16 %v908_v2, %v907_v0  ;;  %v1381_v13 = vpack.c.bf16 %v924_v3, %v923_v1  ;;  %1402 = vst [vmem:[%s1697_s24 + $0x28] sm:$0xff] %v1346_v6   ;;  %v881_v18 = vadd.f32 %v1674_v26, %v842_v8  ;;  %v843_v20 = vmul.f32 %v1468_v16, %v1669_v24  ;;  %v646_v22 = vpop.f32.mrb[15].mxu0  ;;  %v710_v23 = vpop.f32.mrb[15].mxu1 }
 0x116   : > { %1410 = vst [vmem:[%s1697_s24 + $0x68] sm:$0xff] %v1386_v7   ;;  %v897_v19 = vadd.f32 %v1674_v26, %v858_v9  ;;  %v859_v21 = vmul.f32 %v1484_v17, %v1669_v24  ;;  %v879_v25 = vadd.f32 %v1674_v26, %v840_v14  ;;  %v895_v27 = vadd.f32 %v1674_v26, %v856_v15 }
 0x117   : > { %1401 = vst [vmem:[%s1697_s24 + $0x20] sm:$0xff] %v1341_v12   ;;  %1409 = vst [vmem:[%s1697_s24 + $0x60] sm:$0xff] %v1381_v13   ;;  %v841_v28 = vmul.f32 %v1669_v24, %v646_v22  ;;  %v857_v29 = vmul.f32 %v1669_v24, %v710_v23  ;;  %v882_v30 = vadd.f32 %v1674_v26, %v843_v20  ;;  %v913_v34 = vmax.f32 %v881_v18, 0.0 }
 0x118   : > { %v898_v31 = vadd.f32 %v1674_v26, %v859_v21  ;;  %v929_v35 = vmax.f32 %v897_v19, 0.0  ;;  %v911_v38 = vmax.f32 %v879_v25, 0.0  ;;  %v927_v39 = vmax.f32 %v895_v27, 0.0 }
 0x119   : > { %v880_v32 = vadd.f32 %v1674_v26, %v841_v28  ;;  %v896_v33 = vadd.f32 %v1674_v26, %v857_v29  ;;  %v914_v36 = vmax.f32 %v882_v30, 0.0 }
 0x11a   : > { %v930_v37 = vmax.f32 %v898_v31, 0.0 }
 0x11b   : > { %v912_v40 = vmax.f32 %v880_v32, 0.0  ;;  %v928_v24 = vmax.f32 %v896_v33, 0.0  ;;  %v1356_v41 = vpack.c.bf16 %v914_v36, %v913_v34 }
 0x11c   : > { %v1396_v42 = vpack.c.bf16 %v930_v37, %v929_v35 }
 0x11d   : > { %v1351_v43 = vpack.c.bf16 %v912_v40, %v911_v38  ;;  %v1391_v44 = vpack.c.bf16 %v928_v24, %v927_v39  ;;  %1404 = vst [vmem:[%s1697_s24 + $0x38] sm:$0xff] %v1356_v41  }
 0x11e   : > { %1412 = vst [vmem:[%s1697_s24 + $0x78] sm:$0xff] %v1396_v42  }
 0x11f   : > { %1403 = vst [vmem:[%s1697_s24 + $0x30] sm:$0xff] %v1351_v43   ;;  %1411 = vst [vmem:[%s1697_s24 + $0x70] sm:$0xff] %v1391_v44  }
 0x120 PF: > { %s14_s17 = sadd.s32 1, %s1571_s17   ;;  %s1777_s15 = smov %s1567_s16 }
 0x121   : > { %p11_p5 = scmp.ge.s32.totalorder %s14_s17, 4   ;;  %s1778_s16 = smov %s1780_s18 }
 0x123   :  { %13 = sbr.rel (!%p11_p5) target bundleno = 2 (0x2), region = 83 }

// kernel: pspnet_forward.23
= control target key start
LH: loop header
LB: loop body
LE: loop exit
PB: predicated region body
PF: predicated region fallthrough
CT: control target
= control target key end

     0   :  { %s1598_s15 = smov 0   ;;  %s1600_s16 = smov 0   ;;  %s1772_s0 = inlined_call_operand.vmem [shape: bf16[512,128], index: 0, kind: input, shape index: {}]   ;;  %s1773_s1 = inlined_call_operand.vmem [shape: bf16[128,128], index: 1, kind: input, shape index: {}]   ;;  %s1774_s2 = inlined_call_operand.vmem [shape: f32[1,128], index: 2, kind: input, shape index: {}]   ;;  %s1775_s3 = inlined_call_operand.vmem [shape: f32[1,128], index: 3, kind: input, shape index: {}]   ;;  %s1776_s4 = inlined_call_operand.vmem [shape: bf16[512,128], index: 4, kind: output, shape index: {}]  }
   0x1   :  { %s1602_s17 = smov 0  }
   0x2 LB: > { %s33_s18 = sadd.s32 1, %s1567_s16  ;;  %p1221_p0 = scmp.ge.s32.totalorder %s1571_s17, 1  ;;  %s1571_s17 = sphi %s1602_s17, %s14_s17   ;;  %s1567_s16 = sphi %s1600_s16, %s1778_s16   ;;  %s1563_s15 = sphi %s1598_s15, %s1777_s15  }
   0x3   : > { %p35_p1 = scmp.ge.s32.totalorder %s33_s18, 2  ;;  %p221_p2 = scmp.lt.s32.totalorder %s1571_s17, 3 }
   0x5   : > { %s1780_s18 = smov (%p35_p1, %s33_s18), 0  ;;  %p222_p3 = pnand %p1221_p0, %p221_p2 }
   0x6   : > { %v1525_v0 = vld [vmem:[%s1773_s1] sm:$0xff] (!%p222_p3)   ;;  %s1222_s21 = sshll.u32 (!%p222_p3), %s1563_s15, 5  ;;  %v1526_v1 = vld [vmem:[%s1773_s1 + $0x8] sm:$0xff] (!%p222_p3)   ;;  %v1527_v2 = vld [vmem:[%s1773_s1 + $0x10] sm:$0xff] (!%p222_p3)  }
   0x7   : > { %225 = sbr.rel (%p222_p3) target bundleno = 288 (0x120), region = 36  ;;  %p268_p4 = scmp.lt.s32.totalorder (!%p222_p3), %s1222_s21, 63  ;;  %1437 = vmatprep.subr.bf16.mxu0 (!%p222_p3), %v1525_v0  ;;  %1485 = vmatprep.subr.bf16.mxu1 (!%p222_p3), %v1525_v0  ;;  %v1528_v3 = vld [vmem:[%s1773_s1 + $0x18] sm:$0xff] (!%p222_p3)   ;;  %v1529_v6 = vld [vmem:[%s1773_s1 + $0x20] sm:$0xff] (!%p222_p3)   ;;  %v1530_v7 = vld [vmem:[%s1773_s1 + $0x28] sm:$0xff] (!%p222_p3)  }
   0x8   : > { %1438 = vmatpush3.bf16.msra.mxu0 (!%p222_p3), %v1525_v0  ;;  %1493 = vmatpush3.bf16.msra.mxu1 (!%p222_p3), %v1525_v0  ;;  %v1531_v8 = vld [vmem:[%s1773_s1 + $0x30] sm:$0xff] (!%p222_p3)   ;;  %v1532_v9 = vld [vmem:[%s1773_s1 + $0x38] sm:$0xff] (!%p222_p3)   ;;  %v1669_v24 = vld [vmem:[%s1774_s2] ss:$0 sm:$0xff] (!%p222_p3) }
   0x9   : > { %1439 = vmatprep.subr.bf16.mxu0 (!%p222_p3), %v1526_v1  ;;  %1486 = vmatprep.subr.bf16.mxu1 (!%p222_p3), %v1526_v1  ;;  %v1674_v26 = vld [vmem:[%s1775_s3] ss:$0 sm:$0xff] (!%p222_p3) }
   0xc   : > { %1440 = vmatpush3.bf16.msra.mxu0 (!%p222_p3), %v1526_v1  ;;  %1494 = vmatpush3.bf16.msra.mxu1 (!%p222_p3), %v1526_v1 }
   0xd   : > { %1441 = vmatprep.subr.bf16.mxu0 (!%p222_p3), %v1527_v2  ;;  %1487 = vmatprep.subr.bf16.mxu1 (!%p222_p3), %v1527_v2 }
   0xe   : > { %s1782_s21 = smov (!%p268_p4, %s1222_s21), 63 }
   0xf   : > { %s1223_s26 = sshll.u32 %s1782_s21, 2 }
  0x10   : > { %s1633_s29 = scalar_lea.vmem %s1772_s0, %s1223_s26  ;;  %1442 = vmatpush3.bf16.msra.mxu0 %v1527_v2  ;;  %1495 = vmatpush3.bf16.msra.mxu1 %v1527_v2  ;;  %s1697_s24 = scalar_lea.vmem %s1776_s4, %s1223_s26 }
  0x11   : > { %v1533_v4 = vld [vmem:[%s1633_s29] sm:$0xff]   ;;  %1443 = vmatprep.subr.bf16.mxu0 %v1528_v3  ;;  %1488 = vmatprep.subr.bf16.mxu1 %v1528_v3  ;;  %v1535_v10 = vld [vmem:[%s1633_s29 + $0x8] sm:$0xff]   ;;  %v1537_v12 = vld [vmem:[%s1633_s29 + $0x10] sm:$0xff]  }
  0x12   : > { %v1534_v5 = vld [vmem:[%s1633_s29 + $0x40] sm:$0xff]   ;;  %1453 = vmatprep.mubr.bf16.mxu0 %v1533_v4  ;;  %v1536_v11 = vld [vmem:[%s1633_s29 + $0x48] sm:$0xff]   ;;  %v1538_v13 = vld [vmem:[%s1633_s29 + $0x50] sm:$0xff]  }
  0x13   : > { %1469 = vmatprep.mubr.bf16.mxu1 %v1534_v5  ;;  %v1539_v14 = vld [vmem:[%s1633_s29 + $0x18] sm:$0xff]   ;;  %v1541_v16 = vld [vmem:[%s1633_s29 + $0x20] sm:$0xff]   ;;  %v1543_v18 = vld [vmem:[%s1633_s29 + $0x28] sm:$0xff]  }
  0x14   : > { %1444 = vmatpush3.bf16.msra.mxu0 %v1528_v3  ;;  %1496 = vmatpush3.bf16.msra.mxu1 %v1528_v3  ;;  %v1540_v15 = vld [vmem:[%s1633_s29 + $0x58] sm:$0xff]   ;;  %v1542_v17 = vld [vmem:[%s1633_s29 + $0x60] sm:$0xff]   ;;  %v1544_v19 = vld [vmem:[%s1633_s29 + $0x68] sm:$0xff]  }
  0x15   : > { %1445 = vmatprep.subr.bf16.mxu0 %v1529_v6  ;;  %1489 = vmatprep.subr.bf16.mxu1 %v1529_v6  ;;  %v1545_v20 = vld [vmem:[%s1633_s29 + $0x30] sm:$0xff]   ;;  %v1547_v22 = vld [vmem:[%s1633_s29 + $0x38] sm:$0xff]  }
  0x16   : > { %v1546_v21 = vld [vmem:[%s1633_s29 + $0x70] sm:$0xff]   ;;  %v1548_v23 = vld [vmem:[%s1633_s29 + $0x78] sm:$0xff]  }
  0x18   : > { %1446 = vmatpush3.bf16.msra.mxu0 %v1529_v6  ;;  %1497 = vmatpush3.bf16.msra.mxu1 %v1529_v6 }
  0x19   : > { %1447 = vmatprep.subr.bf16.mxu0 %v1530_v7  ;;  %1490 = vmatprep.subr.bf16.mxu1 %v1530_v7 }
  0x1c   : > { %1448 = vmatpush3.bf16.msra.mxu0 %v1530_v7  ;;  %1498 = vmatpush3.bf16.msra.mxu1 %v1530_v7 }
  0x1d   : > { %1449 = vmatprep.subr.bf16.mxu0 %v1531_v8  ;;  %1491 = vmatprep.subr.bf16.mxu1 %v1531_v8 }
  0x20   : > { %1450 = vmatpush3.bf16.msra.mxu0 %v1531_v8  ;;  %1499 = vmatpush3.bf16.msra.mxu1 %v1531_v8 }
  0x21   : > { %1451 = vmatprep.subr.bf16.mxu0 %v1532_v9  ;;  %1492 = vmatprep.subr.bf16.mxu1 %v1532_v9 }
  0x24   : > { %1452 = vmatpush3.bf16.msra.mxu0 %v1532_v9  ;;  %1500 = vmatpush3.bf16.msra.mxu1 %v1532_v9 }
  0x27   : > { %1454 = vmatmul.mubr.bf16.vlgmr.msra.gmra.mrb[0].mxu0 %v1535_v10  ;;  %1470 = vmatmul.mubr.bf16.vlgmr.msra.gmra.mrb[0].mxu1 %v1536_v11 }
  0x28   : > { %1457 = vmatprep.mubr.bf16.mxu0 %v1537_v12  ;;  %1473 = vmatprep.mubr.bf16.mxu1 %v1538_v13 }
  0x2f   : > { %1458 = vmatmul.mubr.bf16.gmra.mrb[4].mxu0 %v1539_v14  ;;  %1474 = vmatmul.mubr.bf16.gmra.mrb[4].mxu1 %v1540_v15 }
  0x30   : > { %1461 = vmatprep.mubr.bf16.mxu0 %v1541_v16  ;;  %1477 = vmatprep.mubr.bf16.mxu1 %v1542_v17 }
  0x37   : > { %1462 = vmatmul.mubr.bf16.gmra.mrb[8].mxu0 %v1543_v18  ;;  %1478 = vmatmul.mubr.bf16.gmra.mrb[8].mxu1 %v1544_v19 }
  0x38   : > { %1465 = vmatprep.mubr.bf16.mxu0 %v1545_v20  ;;  %1481 = vmatprep.mubr.bf16.mxu1 %v1546_v21 }
  0x3f   : > { %1466 = vmatmul.mubr.bf16.gmra.mrb[12].mxu0 %v1547_v22  ;;  %1482 = vmatmul.mubr.bf16.gmra.mrb[12].mxu1 %v1548_v23 }
  0xfa   : > { %v1455_v25 = vpop.f32.mrb[0].mxu0  ;;  %v1471_v27 = vpop.f32.mrb[0].mxu1 }
  0xfb   : > { %v830_v28 = vmul.f32 %v1455_v25, %v1669_v24  ;;  %v846_v29 = vmul.f32 %v1471_v27, %v1669_v24  ;;  %v595_v30 = vpop.f32.mrb[1].mxu0  ;;  %v659_v31 = vpop.f32.mrb[1].mxu1 }
  0xfc   : > { %v828_v32 = vmul.f32 %v1669_v24, %v595_v30  ;;  %v844_v33 = vmul.f32 %v1669_v24, %v659_v31  ;;  %v1456_v34 = vpop.f32.mrb[2].mxu0  ;;  %v1472_v35 = vpop.f32.mrb[2].mxu1 }
  0xfd   : > { %v869_v36 = vadd.f32 %v1674_v26, %v830_v28  ;;  %v885_v37 = vadd.f32 %v1674_v26, %v846_v29  ;;  %v831_v38 = vmul.f32 %v1456_v34, %v1669_v24  ;;  %v847_v39 = vmul.f32 %v1472_v35, %v1669_v24  ;;  %v598_v40 = vpop.f32.mrb[3].mxu0  ;;  %v662_v41 = vpop.f32.mrb[3].mxu1 }
  0xfe   : > { %v867_v42 = vadd.f32 %v1674_v26, %v828_v32  ;;  %v883_v43 = vadd.f32 %v1674_v26, %v844_v33  ;;  %v829_v44 = vmul.f32 %v1669_v24, %v598_v40  ;;  %v845_v45 = vmul.f32 %v1669_v24, %v662_v41 }
  0xff   : > { %v870_v46 = vadd.f32 %v1674_v26, %v831_v38  ;;  %v886_v47 = vadd.f32 %v1674_v26, %v847_v39  ;;  %v901_v50 = vmax.f32 %v869_v36, 0.0  ;;  %v917_v51 = vmax.f32 %v885_v37, 0.0 }
 0x100   : > { %v868_v48 = vadd.f32 %v1674_v26, %v829_v44  ;;  %v884_v49 = vadd.f32 %v1674_v26, %v845_v45  ;;  %v899_v54 = vmax.f32 %v867_v42, 0.0  ;;  %v915_v55 = vmax.f32 %v883_v43, 0.0 }
 0x101   : > { %v902_v52 = vmax.f32 %v870_v46, 0.0  ;;  %v918_v53 = vmax.f32 %v886_v47, 0.0 }
 0x102   : > { %v900_v56 = vmax.f32 %v868_v48, 0.0  ;;  %v916_v57 = vmax.f32 %v884_v49, 0.0  ;;  %v1459_v58 = vpop.f32.mrb[4].mxu0  ;;  %v1475_v59 = vpop.f32.mrb[4].mxu1 }
 0x103   : > { %v1326_v60 = vpack.c.bf16 %v902_v52, %v901_v50  ;;  %v1366_v61 = vpack.c.bf16 %v918_v53, %v917_v51  ;;  %v834_v62 = vmul.f32 %v1459_v58, %v1669_v24  ;;  %v850_v63 = vmul.f32 %v1475_v59, %v1669_v24  ;;  %v611_v0 = vpop.f32.mrb[5].mxu0  ;;  %v675_v1 = vpop.f32.mrb[5].mxu1 }
 0x104   : > { %v1321_v2 = vpack.c.bf16 %v900_v56, %v899_v54  ;;  %v1361_v3 = vpack.c.bf16 %v916_v57, %v915_v55  ;;  %v832_v4 = vmul.f32 %v1669_v24, %v611_v0  ;;  %v848_v5 = vmul.f32 %v1669_v24, %v675_v1  ;;  %v1460_v6 = vpop.f32.mrb[6].mxu0  ;;  %v1476_v7 = vpop.f32.mrb[6].mxu1 }
 0x105   : > { %1398 = vst [vmem:[%s1697_s24 + $0x8] sm:$0xff] %v1326_v60   ;;  %1406 = vst [vmem:[%s1697_s24 + $0x48] sm:$0xff] %v1366_v61   ;;  %v873_v8 = vadd.f32 %v1674_v26, %v834_v62  ;;  %v889_v9 = vadd.f32 %v1674_v26, %v850_v63  ;;  %v835_v10 = vmul.f32 %v1460_v6, %v1669_v24  ;;  %v614_v12 = vpop.f32.mrb[7].mxu0  ;;  %v678_v13 = vpop.f32.mrb[7].mxu1 }
 0x106   : > { %v851_v11 = vmul.f32 %v1476_v7, %v1669_v24  ;;  %1322 = vst [vmem:[%s1697_s24] sm:$0xff] %v1321_v2   ;;  %1405 = vst [vmem:[%s1697_s24 + $0x40] sm:$0xff] %v1361_v3   ;;  %v871_v14 = vadd.f32 %v1674_v26, %v832_v4  ;;  %v887_v15 = vadd.f32 %v1674_v26, %v848_v5 }
 0x107   : > { %v833_v16 = vmul.f32 %v1669_v24, %v614_v12  ;;  %v849_v17 = vmul.f32 %v1669_v24, %v678_v13  ;;  %v874_v18 = vadd.f32 %v1674_v26, %v835_v10  ;;  %v905_v22 = vmax.f32 %v873_v8, 0.0 }
 0x108   : > { %v890_v19 = vadd.f32 %v1674_v26, %v851_v11  ;;  %v921_v23 = vmax.f32 %v889_v9, 0.0  ;;  %v903_v28 = vmax.f32 %v871_v14, 0.0  ;;  %v919_v29 = vmax.f32 %v887_v15, 0.0 }
 0x109   : > { %v872_v20 = vadd.f32 %v1674_v26, %v833_v16  ;;  %v888_v21 = vadd.f32 %v1674_v26, %v849_v17  ;;  %v906_v25 = vmax.f32 %v874_v18, 0.0 }
 0x10a   : > { %v922_v27 = vmax.f32 %v890_v19, 0.0  ;;  %v1463_v32 = vpop.f32.mrb[8].mxu0  ;;  %v1479_v33 = vpop.f32.mrb[8].mxu1 }
 0x10b   : > { %v904_v30 = vmax.f32 %v872_v20, 0.0  ;;  %v920_v31 = vmax.f32 %v888_v21, 0.0  ;;  %v1336_v34 = vpack.c.bf16 %v906_v25, %v905_v22  ;;  %v838_v36 = vmul.f32 %v1463_v32, %v1669_v24  ;;  %v627_v38 = vpop.f32.mrb[9].mxu0  ;;  %v691_v39 = vpop.f32.mrb[9].mxu1 }
 0x10c   : > { %v1376_v35 = vpack.c.bf16 %v922_v27, %v921_v23  ;;  %v854_v37 = vmul.f32 %v1479_v33, %v1669_v24  ;;  %v836_v42 = vmul.f32 %v1669_v24, %v627_v38  ;;  %v852_v43 = vmul.f32 %v1669_v24, %v691_v39  ;;  %v1464_v44 = vpop.f32.mrb[10].mxu0  ;;  %v1480_v45 = vpop.f32.mrb[10].mxu1 }
 0x10d   : > { %v1331_v40 = vpack.c.bf16 %v904_v30, %v903_v28  ;;  %v1371_v41 = vpack.c.bf16 %v920_v31, %v919_v29  ;;  %1400 = vst [vmem:[%s1697_s24 + $0x18] sm:$0xff] %v1336_v34   ;;  %v877_v46 = vadd.f32 %v1674_v26, %v838_v36  ;;  %v839_v48 = vmul.f32 %v1464_v44, %v1669_v24  ;;  %v630_v50 = vpop.f32.mrb[11].mxu0  ;;  %v694_v51 = vpop.f32.mrb[11].mxu1 }
 0x10e   : > { %1408 = vst [vmem:[%s1697_s24 + $0x58] sm:$0xff] %v1376_v35   ;;  %v893_v47 = vadd.f32 %v1674_v26, %v854_v37  ;;  %v855_v49 = vmul.f32 %v1480_v45, %v1669_v24  ;;  %v875_v52 = vadd.f32 %v1674_v26, %v836_v42  ;;  %v891_v53 = vadd.f32 %v1674_v26, %v852_v43 }
 0x10f   : > { %1399 = vst [vmem:[%s1697_s24 + $0x10] sm:$0xff] %v1331_v40   ;;  %1407 = vst [vmem:[%s1697_s24 + $0x50] sm:$0xff] %v1371_v41   ;;  %v837_v54 = vmul.f32 %v1669_v24, %v630_v50  ;;  %v853_v55 = vmul.f32 %v1669_v24, %v694_v51  ;;  %v878_v56 = vadd.f32 %v1674_v26, %v839_v48  ;;  %v909_v60 = vmax.f32 %v877_v46, 0.0 }
 0x110   : > { %v894_v57 = vadd.f32 %v1674_v26, %v855_v49  ;;  %v925_v61 = vmax.f32 %v893_v47, 0.0  ;;  %v907_v0 = vmax.f32 %v875_v52, 0.0  ;;  %v923_v1 = vmax.f32 %v891_v53, 0.0 }
 0x111   : > { %v876_v58 = vadd.f32 %v1674_v26, %v837_v54  ;;  %v892_v59 = vadd.f32 %v1674_v26, %v853_v55  ;;  %v910_v62 = vmax.f32 %v878_v56, 0.0 }
 0x112   : > { %v926_v63 = vmax.f32 %v894_v57, 0.0  ;;  %v1467_v4 = vpop.f32.mrb[12].mxu0  ;;  %v1483_v5 = vpop.f32.mrb[12].mxu1 }
 0x113   : > { %v908_v2 = vmax.f32 %v876_v58, 0.0  ;;  %v924_v3 = vmax.f32 %v892_v59, 0.0  ;;  %v1346_v6 = vpack.c.bf16 %v910_v62, %v909_v60  ;;  %v842_v8 = vmul.f32 %v1467_v4, %v1669_v24  ;;  %v643_v10 = vpop.f32.mrb[13].mxu0  ;;  %v707_v11 = vpop.f32.mrb[13].mxu1 }
 0x114   : > { %v1386_v7 = vpack.c.bf16 %v926_v63, %v925_v61  ;;  %v858_v9 = vmul.f32 %v1483_v5, %v1669_v24  ;;  %v840_v14 = vmul.f32 %v1669_v24, %v643_v10  ;;  %v856_v15 = vmul.f32 %v1669_v24, %v707_v11  ;;  %v1468_v16 = vpop.f32.mrb[14].mxu0  ;;  %v1484_v17 = vpop.f32.mrb[14].mxu1 }
 0x115   : > { %v1341_v12 = vpack.c.bf16 %v908_v2, %v907_v0  ;;  %v1381_v13 = vpack.c.bf16 %v924_v3, %v923_v1  ;;  %1402 = vst [vmem:[%s1697_s24 + $0x28] sm:$0xff] %v1346_v6   ;;  %v881_v18 = vadd.f32 %v1674_v26, %v842_v8  ;;  %v843_v20 = vmul.f32 %v1468_v16, %v1669_v24  ;;  %v646_v22 = vpop.f32.mrb[15].mxu0  ;;  %v710_v23 = vpop.f32.mrb[15].mxu1 }
 0x116   : > { %1410 = vst [vmem:[%s1697_s24 + $0x68] sm:$0xff] %v1386_v7   ;;  %v897_v19 = vadd.f32 %v1674_v26, %v858_v9  ;;  %v859_v21 = vmul.f32 %v1484_v17, %v1669_v24  ;;  %v879_v25 = vadd.f32 %v1674_v26, %v840_v14  ;;  %v895_v27 = vadd.f32 %v1674_v26, %v856_v15 }
 0x117   : > { %1401 = vst [vmem:[%s1697_s24 + $0x20] sm:$0xff] %v1341_v12   ;;  %1409 = vst [vmem:[%s1697_s24 + $0x60] sm:$0xff] %v1381_v13   ;;  %v841_v28 = vmul.f32 %v1669_v24, %v646_v22  ;;  %v857_v29 = vmul.f32 %v1669_v24, %v710_v23  ;;  %v882_v30 = vadd.f32 %v1674_v26, %v843_v20  ;;  %v913_v34 = vmax.f32 %v881_v18, 0.0 }
 0x118   : > { %v898_v31 = vadd.f32 %v1674_v26, %v859_v21  ;;  %v929_v35 = vmax.f32 %v897_v19, 0.0  ;;  %v911_v38 = vmax.f32 %v879_v25, 0.0  ;;  %v927_v39 = vmax.f32 %v895_v27, 0.0 }
 0x119   : > { %v880_v32 = vadd.f32 %v1674_v26, %v841_v28  ;;  %v896_v33 = vadd.f32 %v1674_v26, %v857_v29  ;;  %v914_v36 = vmax.f32 %v882_v30, 0.0 }
 0x11a   : > { %v930_v37 = vmax.f32 %v898_v31, 0.0 }
 0x11b   : > { %v912_v40 = vmax.f32 %v880_v32, 0.0  ;;  %v928_v24 = vmax.f32 %v896_v33, 0.0  ;;  %v1356_v41 = vpack.c.bf16 %v914_v36, %v913_v34 }
 0x11c   : > { %v1396_v42 = vpack.c.bf16 %v930_v37, %v929_v35 }
 0x11d   : > { %v1351_v43 = vpack.c.bf16 %v912_v40, %v911_v38  ;;  %v1391_v44 = vpack.c.bf16 %v928_v24, %v927_v39  ;;  %1404 = vst [vmem:[%s1697_s24 + $0x38] sm:$0xff] %v1356_v41  }
 0x11e   : > { %1412 = vst [vmem:[%s1697_s24 + $0x78] sm:$0xff] %v1396_v42  }
 0x11f   : > { %1403 = vst [vmem:[%s1697_s24 + $0x30] sm:$0xff] %v1351_v43   ;;  %1411 = vst [vmem:[%s1697_s24 + $0x70] sm:$0xff] %v1391_v44  }
 0x120 PF: > { %s14_s17 = sadd.s32 1, %s1571_s17   ;;  %s1777_s15 = smov %s1567_s16 }
 0x121   : > { %p11_p5 = scmp.ge.s32.totalorder %s14_s17, 4   ;;  %s1778_s16 = smov %s1780_s18 }
 0x123   :  { %13 = sbr.rel (!%p11_p5) target bundleno = 2 (0x2), region = 83 }

</bundles_post_ra>
